<compile_context>
chip_gen: v6e
topology: v6e:2x2x1
jax: 0.10.0
libtpu: 0.0.40
codegen_flags: <defaults>
</compile_context>

<pallas_src>
import functools

import jax
import jax.numpy as jnp
from jax.experimental import pallas as pl
from jax.experimental.pallas import tpu as pltpu


# --------------------------------------------------------------------------
# In-kernel building blocks (flat (H*W, C) activations, bf16 matmul operands)
# --------------------------------------------------------------------------
def _mm_bias_relu(x_bf, w_ref, b_ref):
    """(HW, Cin)bf16 @ (Cin, Co)bf16 -> f32, + bias, ReLU."""
    y = jnp.dot(x_bf, w_ref[...], preferred_element_type=jnp.float32)
    return jnp.maximum(y + b_ref[...], 0.0)


def _conv7_h(xf, w_ref, b_ref, h, w):
    """(7,1) conv (pad 3 along H), stride 1, + bias + ReLU, flat layout.

    Shifting by one H row == shifting by W flat rows, so each tap is a flat
    leading-dim slice of a zero-row-padded buffer.  No masks needed.
    xf: (H*W, C) f32, w_ref: (7, C, Co) bf16, b_ref: (1, Co) f32.
    """
    hw, c = xf.shape
    x_bf = xf.astype(jnp.bfloat16)
    zp = jnp.zeros((3 * w, c), jnp.bfloat16)
    xp = jnp.concatenate([zp, x_bf, zp], axis=0)          # ((H+6)*W, C)
    acc = None
    for t in range(7):
        d = jnp.dot(xp[t * w:t * w + hw], w_ref[t],
                    preferred_element_type=jnp.float32)
        acc = d if acc is None else acc + d
    return jnp.maximum(acc + b_ref[...], 0.0)             # (H*W, Co) f32


def _conv7_w(xf, w_ref, b_ref, masks_bf):
    """(1,7) conv (pad 3 along W), stride 1, + bias + ReLU, flat layout.

    Tap t reads flat position p + (t-3); cross-row bleed is killed by the
    per-column boundary mask (0/1, shape (H*W, 1)); the 3 zero rows at either
    end keep the slices in bounds.
    xf: (H*W, C) f32, w_ref: (7, C, Co) bf16, b_ref: (1, Co) f32.
    """
    hw, c = xf.shape
    x_bf = xf.astype(jnp.bfloat16)
    zp = jnp.zeros((3, c), jnp.bfloat16)
    xp = jnp.concatenate([zp, x_bf, zp], axis=0)          # (H*W+6, C)
    acc = None
    for t in range(7):
        xs = xp[t:t + hw]
        if t != 3:                                        # center tap: mask==1
            xs = xs * masks_bf[t]
        d = jnp.dot(xs, w_ref[t], preferred_element_type=jnp.float32)
        acc = d if acc is None else acc + d
    return jnp.maximum(acc + b_ref[...], 0.0)             # (H*W, Co) f32


def _avg_pool3x3_flat(y, h, w, m_left, m_right):
    """3x3 stride-1 avg pool, pad 1, count_include_pad (divisor 9), flat layout.

    y: (H*W, C) f32; m_left / m_right: (H*W, 1) f32 column-boundary masks.
    """
    hw, c = y.shape
    zrow = jnp.zeros((w, c), jnp.float32)
    yv = jnp.concatenate([zrow, y, zrow], axis=0)         # ((H+2)*W, C)
    v = yv[0:hw] + yv[w:w + hw] + yv[2 * w:2 * w + hw]    # vertical 3-sum
    z1 = jnp.zeros((1, c), jnp.float32)
    vh = jnp.concatenate([z1, v, z1], axis=0)             # (H*W+2, C)
    total = m_left * vh[0:hw] + vh[1:1 + hw] + m_right * vh[2:2 + hw]
    return total * (1.0 / 9.0)


# --------------------------------------------------------------------------
# Fused InceptionC kernel (one grid step = one batch element)
# --------------------------------------------------------------------------
def _inception_c_kernel(
        x_ref, col_ref,
        w_b1_ref, b_b1_ref,        # branch1x1:        1x1, Cin -> 192
        w_b7a_ref, b_b7a_ref,      # branch7x7_1:      1x1, Cin -> c7
        w_b7b_ref, b_b7b_ref,      # branch7x7_2:      (1,7), c7 -> c7
        w_b7c_ref, b_b7c_ref,      # branch7x7_3:      (7,1), c7 -> 192
        w_bda_ref, b_bda_ref,      # branch7x7dbl_1:   1x1, Cin -> c7
        w_bdb_ref, b_bdb_ref,      # branch7x7dbl_2:   (7,1), c7 -> c7
        w_bdc_ref, b_bdc_ref,      # branch7x7dbl_3:   (1,7), c7 -> c7
        w_bdd_ref, b_bdd_ref,      # branch7x7dbl_4:   (7,1), c7 -> c7
        w_bde_ref, b_bde_ref,      # branch7x7dbl_5:   (1,7), c7 -> 192
        w_bp_ref, b_bp_ref,        # branch_pool conv: 1x1, Cin -> 192
        o_ref,                     # (1, 4, H*W, 192) f32, branch-major
        *, h, w):
    hw = h * w
    odt = o_ref.dtype

    x_bf = x_ref[0]                                        # (H*W, Cin) bf16

    # Per-column boundary masks, shared by all (1,7) convs and the pool.
    col = col_ref[...]                                     # (H*W, 1) int32

    def cmask(d, dtype):
        valid = jnp.logical_and(col + d >= 0, col + d < w)
        return jnp.where(valid, 1.0, 0.0).astype(dtype)

    masks_bf = [cmask(t - 3, jnp.bfloat16) for t in range(7)]

    # --- branch1x1: store as soon as ready (overlaps later conv compute) ----
    b1 = _mm_bias_relu(x_bf, w_b1_ref, b_b1_ref)           # (H*W, 192)
    o_ref[0, 0] = b1.astype(odt)

    # --- branch7x7: 1x1 -> (1,7) -> (7,1) ------------------------------------
    t7 = _mm_bias_relu(x_bf, w_b7a_ref, b_b7a_ref)         # (H*W, c7)
    t7 = _conv7_w(t7, w_b7b_ref, b_b7b_ref, masks_bf)
    t7 = _conv7_h(t7, w_b7c_ref, b_b7c_ref, h, w)          # (H*W, 192)
    o_ref[0, 1] = t7.astype(odt)

    # --- branch7x7dbl: 1x1 -> (7,1) -> (1,7) -> (7,1) -> (1,7) ---------------
    td = _mm_bias_relu(x_bf, w_bda_ref, b_bda_ref)
    td = _conv7_h(td, w_bdb_ref, b_bdb_ref, h, w)
    td = _conv7_w(td, w_bdc_ref, b_bdc_ref, masks_bf)
    td = _conv7_h(td, w_bdd_ref, b_bdd_ref, h, w)
    td = _conv7_w(td, w_bde_ref, b_bde_ref, masks_bf)      # (H*W, 192)
    o_ref[0, 2] = td.astype(odt)

    # --- branch_pool: 1x1 conv commuted ahead of the (linear) avg pool -------
    bp_lin = jnp.dot(x_bf, w_bp_ref[...],
                     preferred_element_type=jnp.float32)   # (H*W, 192)
    pooled = _avg_pool3x3_flat(bp_lin, h, w,
                               cmask(-1, jnp.float32), cmask(+1, jnp.float32))
    o_ref[0, 3] = jnp.maximum(pooled + b_bp_ref[...], 0.0).astype(odt)


# --------------------------------------------------------------------------
# pallas_call wrapper
# --------------------------------------------------------------------------
_PARAM_ORDER = (
    "branch1x1",
    "branch7x7_1", "branch7x7_2", "branch7x7_3",
    "branch7x7dbl_1", "branch7x7dbl_2", "branch7x7dbl_3",
    "branch7x7dbl_4", "branch7x7dbl_5",
    "branch_pool",
)


def _replicated_spec(shape):
    zeros = (0,) * len(shape)
    return pl.BlockSpec(shape, lambda i, _z=zeros: _z)


def _inception_c_pallas(x_flat, col_idx, params, h, w):
    n, hw, cin = x_flat.shape
    kernel = functools.partial(_inception_c_kernel, h=h, w=w)

    operands = [x_flat, col_idx]
    in_specs = [
        pl.BlockSpec((1, hw, cin), lambda i: (i, 0, 0)),
        _replicated_spec(col_idx.shape),
    ]
    for name in _PARAM_ORDER:
        for arr in params[name]:
            operands.append(arr)
            in_specs.append(_replicated_spec(arr.shape))

    return pl.pallas_call(
        kernel,
        out_shape=jax.ShapeDtypeStruct((n, 4, hw, 192), jnp.float32),
        grid=(n,),
        in_specs=in_specs,
        out_specs=pl.BlockSpec((1, 4, hw, 192), lambda i: (i, 0, 0, 0)),
        compiler_params=pltpu.CompilerParams(
            dimension_semantics=("parallel",),     # batch -> both TCs on v7x
            vmem_limit_bytes=32 * 1024 * 1024,     # ample with bf16 weights
        ),
    )(*operands)


@jax.jit
def inception_c_forward(x_nchw, params):
    """InceptionC forward: NCHW in -> NCHW out (like the PyTorch module)."""
    # TODO(synk): if the surrounding model is NHWC, drop these transposes.
    n, cin, h, w = x_nchw.shape
    x = jnp.transpose(x_nchw, (0, 2, 3, 1)).reshape(n, h * w, cin)
    x = x.astype(jnp.bfloat16)                       # bf16 MXU operands
    col_idx = (jnp.arange(h * w, dtype=jnp.int32) % w).reshape(h * w, 1)
    o = _inception_c_pallas(x, col_idx, params, h, w)     # (N, 4, H*W, 192)
    o = o.reshape(n, 4, h, w, 192)
    # branch-major -> channel concat (torch.cat along dim=1), back to NCHW.
    return jnp.transpose(o, (0, 1, 4, 2, 3)).reshape(n, 4 * 192, h, w)


# --------------------------------------------------------------------------
# Parameter construction (deterministic, BN folded into conv, bf16 weights)
# --------------------------------------------------------------------------
def make_conv_bn(key, cin, cout, kh, kw):
    """Random BasicConv2d params with BatchNorm (eps=1e-3) folded in.

    Returns kernel-ready tensors (weights cast once to bf16):
      1x1 conv         -> weight (cin, cout)      bf16
      (1,7)/(7,1) conv -> weight (7, cin, cout)   bf16 (taps on shifted axis)
    plus an f32 bias of shape (1, cout).
    """
    k1, k2, k3, k4, k5 = jax.random.split(key, 5)
    wgt = 0.1 * jax.random.normal(k1, (kh, kw, cin, cout), jnp.float32)
    gamma = 1.0 + 0.1 * jax.random.normal(k2, (cout,), jnp.float32)
    beta = 0.05 * jax.random.normal(k3, (cout,), jnp.float32)
    mean = 0.02 * jax.random.normal(k4, (cout,), jnp.float32)
    var = 0.5 + 0.5 * jax.random.uniform(k5, (cout,), jnp.float32)
    eps = 1e-3                                   # BatchNorm2d(eps=0.001)
    scale = gamma / jnp.sqrt(var + eps)
    wf = wgt * scale
    bf = (beta - mean * scale).reshape(1, cout)
    if kh == 1 and kw == 1:
        wf = wf.reshape(cin, cout)
    else:                                        # one of (kh, kw) is 1, other 7
        wf = wf.reshape(kh * kw, cin, cout)
    return wf.astype(jnp.bfloat16), bf.astype(jnp.float32)


def make_inception_c_params(key, in_channels, c7):
    keys = jax.random.split(key, 10)
    return {
        "branch1x1":      make_conv_bn(keys[0], in_channels, 192, 1, 1),
        "branch7x7_1":    make_conv_bn(keys[1], in_channels, c7, 1, 1),
        "branch7x7_2":    make_conv_bn(keys[2], c7, c7, 1, 7),
        "branch7x7_3":    make_conv_bn(keys[3], c7, 192, 7, 1),
        "branch7x7dbl_1": make_conv_bn(keys[4], in_channels, c7, 1, 1),
        "branch7x7dbl_2": make_conv_bn(keys[5], c7, c7, 7, 1),
        "branch7x7dbl_3": make_conv_bn(keys[6], c7, c7, 1, 7),
        "branch7x7dbl_4": make_conv_bn(keys[7], c7, c7, 7, 1),
        "branch7x7dbl_5": make_conv_bn(keys[8], c7, 192, 1, 7),
        "branch_pool":    make_conv_bn(keys[9], in_channels, 192, 1, 1),
    }


# --------------------------------------------------------------------------
# Pure-JAX (XLA) reference for a correctness check (f32, HIGHEST precision;
# uses the exact same bf16-valued weights, so only the kernel's bf16
# activation rounding differs).
# --------------------------------------------------------------------------
def _ref_conv_bn_relu(x, w_hwio, b, pad):
    y = jax.lax.conv_general_dilated(
        x, w_hwio, window_strides=(1, 1),
        padding=((pad[0], pad[0]), (pad[1], pad[1])),
        dimension_numbers=("NHWC", "HWIO", "NHWC"),
        precision=jax.lax.Precision.HIGHEST)
    return jnp.maximum(y + b.reshape(1, 1, 1, -1), 0.0)


def inception_c_reference(x_nchw, params):
    x = jnp.transpose(x_nchw, (0, 2, 3, 1))

    def hwio(name, kh, kw):
        wgt, b = params[name]
        w32 = wgt.astype(jnp.float32).reshape(kh, kw, -1, wgt.shape[-1])
        return w32, b

    b1 = _ref_conv_bn_relu(x, *hwio("branch1x1", 1, 1), (0, 0))
    b7 = _ref_conv_bn_relu(x, *hwio("branch7x7_1", 1, 1), (0, 0))
    b7 = _ref_conv_bn_relu(b7, *hwio("branch7x7_2", 1, 7), (0, 3))
    b7 = _ref_conv_bn_relu(b7, *hwio("branch7x7_3", 7, 1), (3, 0))
    bd = _ref_conv_bn_relu(x, *hwio("branch7x7dbl_1", 1, 1), (0, 0))
    bd = _ref_conv_bn_relu(bd, *hwio("branch7x7dbl_2", 7, 1), (3, 0))
    bd = _ref_conv_bn_relu(bd, *hwio("branch7x7dbl_3", 1, 7), (0, 3))
    bd = _ref_conv_bn_relu(bd, *hwio("branch7x7dbl_4", 7, 1), (3, 0))
    bd = _ref_conv_bn_relu(bd, *hwio("branch7x7dbl_5", 1, 7), (0, 3))
    pooled = jax.lax.reduce_window(
        x, 0.0, jax.lax.add, (1, 3, 3, 1), (1, 1, 1, 1),
        ((0, 0), (1, 1), (1, 1), (0, 0))) / 9.0
    bp = _ref_conv_bn_relu(pooled, *hwio("branch_pool", 1, 1), (0, 0))
    out = jnp.concatenate([b1, b7, bd, bp], axis=-1)
    return jnp.transpose(out, (0, 3, 1, 2))


if __name__ == "__main__":
    key = jax.random.PRNGKey(0)
    kx, kp = jax.random.split(key)

    # Small shapes: batch=2, in_channels=16, 8x8 spatial, channels_7x7=8.
    N, C_IN, H, W = 2, 16, 8, 8
    C7 = 8

    x = jax.random.normal(kx, (N, C_IN, H, W), jnp.float32)   # NCHW like PyTorch
    params = make_inception_c_params(kp, C_IN, C7)

    out = inception_c_forward(x, params)
    jax.block_until_ready(out)

    assert out.shape == (N, 192 * 4, H, W), out.shape

    ref = inception_c_reference(x, params)
    max_err = float(jnp.max(jnp.abs(out - ref)))
    ref_mag = float(jnp.max(jnp.abs(ref)))
    tol = 2e-2 * (1.0 + ref_mag)          # bf16-operand vs f32 reference
    assert max_err < tol, f"max abs error {max_err} vs tol {tol}"

    print("KERNEL_OK")
</pallas_src>

<mosaic_0001>
module attributes {stable_mosaic.version = 11 : i64} {
  func.func @_inception_c_kernel(%arg0: i32, %arg1: memref<1x64x16xbf16, #tpu.memory_space<vmem>>, %arg2: memref<64x1xi32, #tpu.memory_space<vmem>>, %arg3: memref<16x192xbf16, #tpu.memory_space<vmem>>, %arg4: memref<1x192xf32, #tpu.memory_space<vmem>>, %arg5: memref<16x8xbf16, #tpu.memory_space<vmem>>, %arg6: memref<1x8xf32, #tpu.memory_space<vmem>>, %arg7: memref<7x8x8xbf16, #tpu.memory_space<vmem>>, %arg8: memref<1x8xf32, #tpu.memory_space<vmem>>, %arg9: memref<7x8x192xbf16, #tpu.memory_space<vmem>>, %arg10: memref<1x192xf32, #tpu.memory_space<vmem>>, %arg11: memref<16x8xbf16, #tpu.memory_space<vmem>>, %arg12: memref<1x8xf32, #tpu.memory_space<vmem>>, %arg13: memref<7x8x8xbf16, #tpu.memory_space<vmem>>, %arg14: memref<1x8xf32, #tpu.memory_space<vmem>>, %arg15: memref<7x8x8xbf16, #tpu.memory_space<vmem>>, %arg16: memref<1x8xf32, #tpu.memory_space<vmem>>, %arg17: memref<7x8x8xbf16, #tpu.memory_space<vmem>>, %arg18: memref<1x8xf32, #tpu.memory_space<vmem>>, %arg19: memref<7x8x192xbf16, #tpu.memory_space<vmem>>, %arg20: memref<1x192xf32, #tpu.memory_space<vmem>>, %arg21: memref<16x192xbf16, #tpu.memory_space<vmem>>, %arg22: memref<1x192xf32, #tpu.memory_space<vmem>>, %arg23: memref<1x4x64x192xf32, #tpu.memory_space<vmem>>) attributes {dimension_semantics = [#tpu.dimension_semantics<parallel>], iteration_bounds = array<i64: 2>, scalar_prefetch = 0 : i64, scratch_operands = 0 : i64, tpu.core_type = #tpu.core_type<tc>, window_params = [{transform_indices = @transform_0, window_bounds = array<i64: 1, 64, 16>}, {pipeline_mode = #tpu.pipeline_mode<synchronous>, transform_indices = @transform_1, window_bounds = array<i64: 64, 1>}, {pipeline_mode = #tpu.pipeline_mode<synchronous>, transform_indices = @transform_2, window_bounds = array<i64: 16, 192>}, {pipeline_mode = #tpu.pipeline_mode<synchronous>, transform_indices = @transform_3, window_bounds = array<i64: 1, 192>}, {pipeline_mode = #tpu.pipeline_mode<synchronous>, transform_indices = @transform_4, window_bounds = array<i64: 16, 8>}, {pipeline_mode = #tpu.pipeline_mode<synchronous>, transform_indices = @transform_5, window_bounds = array<i64: 1, 8>}, {pipeline_mode = #tpu.pipeline_mode<synchronous>, transform_indices = @transform_6, window_bounds = array<i64: 7, 8, 8>}, {pipeline_mode = #tpu.pipeline_mode<synchronous>, transform_indices = @transform_7, window_bounds = array<i64: 1, 8>}, {pipeline_mode = #tpu.pipeline_mode<synchronous>, transform_indices = @transform_8, window_bounds = array<i64: 7, 8, 192>}, {pipeline_mode = #tpu.pipeline_mode<synchronous>, transform_indices = @transform_9, window_bounds = array<i64: 1, 192>}, {pipeline_mode = #tpu.pipeline_mode<synchronous>, transform_indices = @transform_10, window_bounds = array<i64: 16, 8>}, {pipeline_mode = #tpu.pipeline_mode<synchronous>, transform_indices = @transform_11, window_bounds = array<i64: 1, 8>}, {pipeline_mode = #tpu.pipeline_mode<synchronous>, transform_indices = @transform_12, window_bounds = array<i64: 7, 8, 8>}, {pipeline_mode = #tpu.pipeline_mode<synchronous>, transform_indices = @transform_13, window_bounds = array<i64: 1, 8>}, {pipeline_mode = #tpu.pipeline_mode<synchronous>, transform_indices = @transform_14, window_bounds = array<i64: 7, 8, 8>}, {pipeline_mode = #tpu.pipeline_mode<synchronous>, transform_indices = @transform_15, window_bounds = array<i64: 1, 8>}, {pipeline_mode = #tpu.pipeline_mode<synchronous>, transform_indices = @transform_16, window_bounds = array<i64: 7, 8, 8>}, {pipeline_mode = #tpu.pipeline_mode<synchronous>, transform_indices = @transform_17, window_bounds = array<i64: 1, 8>}, {pipeline_mode = #tpu.pipeline_mode<synchronous>, transform_indices = @transform_18, window_bounds = array<i64: 7, 8, 192>}, {pipeline_mode = #tpu.pipeline_mode<synchronous>, transform_indices = @transform_19, window_bounds = array<i64: 1, 192>}, {pipeline_mode = #tpu.pipeline_mode<synchronous>, transform_indices = @transform_20, window_bounds = array<i64: 16, 192>}, {pipeline_mode = #tpu.pipeline_mode<synchronous>, transform_indices = @transform_21, window_bounds = array<i64: 1, 192>}, {transform_indices = @transform_22, window_bounds = array<i64: 1, 4, 64, 192>}]} {
    %c0 = arith.constant 0 : index
    %c0_0 = arith.constant 0 : index
    %c0_1 = arith.constant 0 : index
    %0 = vector.load %arg1[%c0, %c0_0, %c0_1] : memref<1x64x16xbf16, #tpu.memory_space<vmem>>, vector<1x64x16xbf16>
    %1 = vector.shape_cast %0 : vector<1x64x16xbf16> to vector<64x16xbf16>
    %c0_2 = arith.constant 0 : index
    %c0_3 = arith.constant 0 : index
    %2 = vector.load %arg2[%c0_2, %c0_3] : memref<64x1xi32, #tpu.memory_space<vmem>>, vector<64x1xi32>
    %c-3_i32 = arith.constant -3 : i32
    %3 = vector.broadcast %c-3_i32 : i32 to vector<64x1xi32>
    %4 = arith.addi %2, %3 : vector<64x1xi32>
    %c0_i32 = arith.constant 0 : i32
    %5 = vector.broadcast %c0_i32 : i32 to vector<64x1xi32>
    %6 = arith.cmpi sge, %4, %5 : vector<64x1xi32>
    %c-3_i32_4 = arith.constant -3 : i32
    %7 = vector.broadcast %c-3_i32_4 : i32 to vector<64x1xi32>
    %8 = arith.addi %2, %7 : vector<64x1xi32>
    %c8_i32 = arith.constant 8 : i32
    %9 = vector.broadcast %c8_i32 : i32 to vector<64x1xi32>
    %10 = arith.cmpi slt, %8, %9 : vector<64x1xi32>
    %11 = arith.andi %6, %10 : vector<64x1xi1>
    %cst = arith.constant 1.000000e+00 : f32
    %cst_5 = arith.constant 0.000000e+00 : f32
    %12 = vector.broadcast %cst : f32 to vector<64x1xf32>
    %13 = vector.broadcast %cst_5 : f32 to vector<64x1xf32>
    %14 = arith.select %11, %12, %13 : vector<64x1xi1>, vector<64x1xf32>
    %15 = arith.truncf %14 : vector<64x1xf32> to vector<64x1xbf16>
    %c-2_i32 = arith.constant -2 : i32
    %16 = vector.broadcast %c-2_i32 : i32 to vector<64x1xi32>
    %17 = arith.addi %2, %16 : vector<64x1xi32>
    %c0_i32_6 = arith.constant 0 : i32
    %18 = vector.broadcast %c0_i32_6 : i32 to vector<64x1xi32>
    %19 = arith.cmpi sge, %17, %18 : vector<64x1xi32>
    %c-2_i32_7 = arith.constant -2 : i32
    %20 = vector.broadcast %c-2_i32_7 : i32 to vector<64x1xi32>
    %21 = arith.addi %2, %20 : vector<64x1xi32>
    %c8_i32_8 = arith.constant 8 : i32
    %22 = vector.broadcast %c8_i32_8 : i32 to vector<64x1xi32>
    %23 = arith.cmpi slt, %21, %22 : vector<64x1xi32>
    %24 = arith.andi %19, %23 : vector<64x1xi1>
    %cst_9 = arith.constant 1.000000e+00 : f32
    %cst_10 = arith.constant 0.000000e+00 : f32
    %25 = vector.broadcast %cst_9 : f32 to vector<64x1xf32>
    %26 = vector.broadcast %cst_10 : f32 to vector<64x1xf32>
    %27 = arith.select %24, %25, %26 : vector<64x1xi1>, vector<64x1xf32>
    %28 = arith.truncf %27 : vector<64x1xf32> to vector<64x1xbf16>
    %c-1_i32 = arith.constant -1 : i32
    %29 = vector.broadcast %c-1_i32 : i32 to vector<64x1xi32>
    %30 = arith.addi %2, %29 : vector<64x1xi32>
    %c0_i32_11 = arith.constant 0 : i32
    %31 = vector.broadcast %c0_i32_11 : i32 to vector<64x1xi32>
    %32 = arith.cmpi sge, %30, %31 : vector<64x1xi32>
    %c-1_i32_12 = arith.constant -1 : i32
    %33 = vector.broadcast %c-1_i32_12 : i32 to vector<64x1xi32>
    %34 = arith.addi %2, %33 : vector<64x1xi32>
    %c8_i32_13 = arith.constant 8 : i32
    %35 = vector.broadcast %c8_i32_13 : i32 to vector<64x1xi32>
    %36 = arith.cmpi slt, %34, %35 : vector<64x1xi32>
    %37 = arith.andi %32, %36 : vector<64x1xi1>
    %cst_14 = arith.constant 1.000000e+00 : f32
    %cst_15 = arith.constant 0.000000e+00 : f32
    %38 = vector.broadcast %cst_14 : f32 to vector<64x1xf32>
    %39 = vector.broadcast %cst_15 : f32 to vector<64x1xf32>
    %40 = arith.select %37, %38, %39 : vector<64x1xi1>, vector<64x1xf32>
    %41 = arith.truncf %40 : vector<64x1xf32> to vector<64x1xbf16>
    %c1_i32 = arith.constant 1 : i32
    %42 = vector.broadcast %c1_i32 : i32 to vector<64x1xi32>
    %43 = arith.addi %2, %42 : vector<64x1xi32>
    %c0_i32_16 = arith.constant 0 : i32
    %44 = vector.broadcast %c0_i32_16 : i32 to vector<64x1xi32>
    %45 = arith.cmpi sge, %43, %44 : vector<64x1xi32>
    %c1_i32_17 = arith.constant 1 : i32
    %46 = vector.broadcast %c1_i32_17 : i32 to vector<64x1xi32>
    %47 = arith.addi %2, %46 : vector<64x1xi32>
    %c8_i32_18 = arith.constant 8 : i32
    %48 = vector.broadcast %c8_i32_18 : i32 to vector<64x1xi32>
    %49 = arith.cmpi slt, %47, %48 : vector<64x1xi32>
    %50 = arith.andi %45, %49 : vector<64x1xi1>
    %cst_19 = arith.constant 1.000000e+00 : f32
    %cst_20 = arith.constant 0.000000e+00 : f32
    %51 = vector.broadcast %cst_19 : f32 to vector<64x1xf32>
    %52 = vector.broadcast %cst_20 : f32 to vector<64x1xf32>
    %53 = arith.select %50, %51, %52 : vector<64x1xi1>, vector<64x1xf32>
    %54 = arith.truncf %53 : vector<64x1xf32> to vector<64x1xbf16>
    %c2_i32 = arith.constant 2 : i32
    %55 = vector.broadcast %c2_i32 : i32 to vector<64x1xi32>
    %56 = arith.addi %2, %55 : vector<64x1xi32>
    %c0_i32_21 = arith.constant 0 : i32
    %57 = vector.broadcast %c0_i32_21 : i32 to vector<64x1xi32>
    %58 = arith.cmpi sge, %56, %57 : vector<64x1xi32>
    %c2_i32_22 = arith.constant 2 : i32
    %59 = vector.broadcast %c2_i32_22 : i32 to vector<64x1xi32>
    %60 = arith.addi %2, %59 : vector<64x1xi32>
    %c8_i32_23 = arith.constant 8 : i32
    %61 = vector.broadcast %c8_i32_23 : i32 to vector<64x1xi32>
    %62 = arith.cmpi slt, %60, %61 : vector<64x1xi32>
    %63 = arith.andi %58, %62 : vector<64x1xi1>
    %cst_24 = arith.constant 1.000000e+00 : f32
    %cst_25 = arith.constant 0.000000e+00 : f32
    %64 = vector.broadcast %cst_24 : f32 to vector<64x1xf32>
    %65 = vector.broadcast %cst_25 : f32 to vector<64x1xf32>
    %66 = arith.select %63, %64, %65 : vector<64x1xi1>, vector<64x1xf32>
    %67 = arith.truncf %66 : vector<64x1xf32> to vector<64x1xbf16>
    %c3_i32 = arith.constant 3 : i32
    %68 = vector.broadcast %c3_i32 : i32 to vector<64x1xi32>
    %69 = arith.addi %2, %68 : vector<64x1xi32>
    %c0_i32_26 = arith.constant 0 : i32
    %70 = vector.broadcast %c0_i32_26 : i32 to vector<64x1xi32>
    %71 = arith.cmpi sge, %69, %70 : vector<64x1xi32>
    %c3_i32_27 = arith.constant 3 : i32
    %72 = vector.broadcast %c3_i32_27 : i32 to vector<64x1xi32>
    %73 = arith.addi %2, %72 : vector<64x1xi32>
    %c8_i32_28 = arith.constant 8 : i32
    %74 = vector.broadcast %c8_i32_28 : i32 to vector<64x1xi32>
    %75 = arith.cmpi slt, %73, %74 : vector<64x1xi32>
    %76 = arith.andi %71, %75 : vector<64x1xi1>
    %cst_29 = arith.constant 1.000000e+00 : f32
    %cst_30 = arith.constant 0.000000e+00 : f32
    %77 = vector.broadcast %cst_29 : f32 to vector<64x1xf32>
    %78 = vector.broadcast %cst_30 : f32 to vector<64x1xf32>
    %79 = arith.select %76, %77, %78 : vector<64x1xi1>, vector<64x1xf32>
    %80 = arith.truncf %79 : vector<64x1xf32> to vector<64x1xbf16>
    %c0_31 = arith.constant 0 : index
    %c0_32 = arith.constant 0 : index
    %81 = vector.load %arg3[%c0_31, %c0_32] : memref<16x192xbf16, #tpu.memory_space<vmem>>, vector<16x192xbf16>
    %cst_33 = arith.constant dense<0.000000e+00> : vector<64x192xf32>
    %82 = tpu.matmul %1, %81, %cst_33 {dimension_numbers = #tpu.dot_dimension_numbers<[1], [0], [0], [1], [0, 0, 1, 1], [], []>} : vector<64x16xbf16>, vector<16x192xbf16>, vector<64x192xf32> -> vector<64x192xf32>
    %c0_34 = arith.constant 0 : index
    %c0_35 = arith.constant 0 : index
    %83 = vector.load %arg4[%c0_34, %c0_35] : memref<1x192xf32, #tpu.memory_space<vmem>>, vector<1x192xf32>
    %84 = vector.broadcast %83 : vector<1x192xf32> to vector<64x192xf32>
    %85 = arith.addf %82, %84 : vector<64x192xf32>
    %cst_36 = arith.constant 0.000000e+00 : f32
    %86 = vector.broadcast %cst_36 : f32 to vector<64x192xf32>
    %87 = arith.maximumf %85, %86 : vector<64x192xf32>
    %c0_37 = arith.constant 0 : index
    %c0_38 = arith.constant 0 : index
    %c0_39 = arith.constant 0 : index
    %c0_40 = arith.constant 0 : index
    %88 = vector.load %arg23[%c0_37, %c0_38, %c0_39, %c0_40] : memref<1x4x64x192xf32, #tpu.memory_space<vmem>>, vector<1x1x64x192xf32>
    %89 = vector.shape_cast %88 : vector<1x1x64x192xf32> to vector<64x192xf32>
    %90 = vector.shape_cast %87 : vector<64x192xf32> to vector<1x1x64x192xf32>
    tpu.vector_store %arg23[%c0_37, %c0_38, %c0_39, %c0_40], %90 {strides = array<i32>} : memref<1x4x64x192xf32, #tpu.memory_space<vmem>>, vector<1x1x64x192xf32>,
    %c0_41 = arith.constant 0 : index
    %c0_42 = arith.constant 0 : index
    %91 = vector.load %arg5[%c0_41, %c0_42] : memref<16x8xbf16, #tpu.memory_space<vmem>>, vector<16x8xbf16>
    %cst_43 = arith.constant dense<0.000000e+00> : vector<64x8xf32>
    %92 = tpu.matmul %1, %91, %cst_43 {dimension_numbers = #tpu.dot_dimension_numbers<[1], [0], [0], [1], [0, 0, 1, 1], [], []>} : vector<64x16xbf16>, vector<16x8xbf16>, vector<64x8xf32> -> vector<64x8xf32>
    %c0_44 = arith.constant 0 : index
    %c0_45 = arith.constant 0 : index
    %93 = vector.load %arg6[%c0_44, %c0_45] : memref<1x8xf32, #tpu.memory_space<vmem>>, vector<1x8xf32>
    %94 = vector.broadcast %93 : vector<1x8xf32> to vector<64x8xf32>
    %95 = arith.addf %92, %94 : vector<64x8xf32>
    %cst_46 = arith.constant 0.000000e+00 : f32
    %96 = vector.broadcast %cst_46 : f32 to vector<64x8xf32>
    %97 = arith.maximumf %95, %96 : vector<64x8xf32>
    %98 = arith.truncf %97 : vector<64x8xf32> to vector<64x8xbf16>
    %cst_47 = arith.constant 0.000000e+00 : bf16
    %99 = vector.broadcast %cst_47 : bf16 to vector<3x8xbf16>
    %100 = tpu.concatenate %99, %98, %99 in 0 : vector<3x8xbf16>, vector<64x8xbf16>, vector<3x8xbf16> -> vector<70x8xbf16>
    %101 = vector.extract_strided_slice %100 {offsets = [0, 0], sizes = [64, 8], strides = [1, 1]} : vector<70x8xbf16> to vector<64x8xbf16>
    %102 = vector.broadcast %15 : vector<64x1xbf16> to vector<64x8xbf16>
    %103 = arith.mulf %101, %102 : vector<64x8xbf16>
    %c0_48 = arith.constant 0 : index
    %c0_49 = arith.constant 0 : index
    %c0_50 = arith.constant 0 : index
    %104 = vector.load %arg7[%c0_48, %c0_49, %c0_50] : memref<7x8x8xbf16, #tpu.memory_space<vmem>>, vector<1x8x8xbf16>
    %105 = vector.shape_cast %104 : vector<1x8x8xbf16> to vector<8x8xbf16>
    %cst_51 = arith.constant dense<0.000000e+00> : vector<64x8xf32>
    %106 = tpu.matmul %103, %105, %cst_51 {dimension_numbers = #tpu.dot_dimension_numbers<[1], [0], [0], [1], [0, 0, 1, 1], [], []>} : vector<64x8xbf16>, vector<8x8xbf16>, vector<64x8xf32> -> vector<64x8xf32>
    %107 = vector.extract_strided_slice %100 {offsets = [1, 0], sizes = [64, 8], strides = [1, 1]} : vector<70x8xbf16> to vector<64x8xbf16>
    %108 = vector.broadcast %28 : vector<64x1xbf16> to vector<64x8xbf16>
    %109 = arith.mulf %107, %108 : vector<64x8xbf16>
    %c1 = arith.constant 1 : index
    %c0_52 = arith.constant 0 : index
    %c0_53 = arith.constant 0 : index
    %110 = vector.load %arg7[%c1, %c0_52, %c0_53] : memref<7x8x8xbf16, #tpu.memory_space<vmem>>, vector<1x8x8xbf16>
    %111 = vector.shape_cast %110 : vector<1x8x8xbf16> to vector<8x8xbf16>
    %cst_54 = arith.constant dense<0.000000e+00> : vector<64x8xf32>
    %112 = tpu.matmul %109, %111, %cst_54 {dimension_numbers = #tpu.dot_dimension_numbers<[1], [0], [0], [1], [0, 0, 1, 1], [], []>} : vector<64x8xbf16>, vector<8x8xbf16>, vector<64x8xf32> -> vector<64x8xf32>
    %113 = arith.addf %106, %112 : vector<64x8xf32>
    %114 = vector.extract_strided_slice %100 {offsets = [2, 0], sizes = [64, 8], strides = [1, 1]} : vector<70x8xbf16> to vector<64x8xbf16>
    %115 = vector.broadcast %41 : vector<64x1xbf16> to vector<64x8xbf16>
    %116 = arith.mulf %114, %115 : vector<64x8xbf16>
    %c2 = arith.constant 2 : index
    %c0_55 = arith.constant 0 : index
    %c0_56 = arith.constant 0 : index
    %117 = vector.load %arg7[%c2, %c0_55, %c0_56] : memref<7x8x8xbf16, #tpu.memory_space<vmem>>, vector<1x8x8xbf16>
    %118 = vector.shape_cast %117 : vector<1x8x8xbf16> to vector<8x8xbf16>
    %cst_57 = arith.constant dense<0.000000e+00> : vector<64x8xf32>
    %119 = tpu.matmul %116, %118, %cst_57 {dimension_numbers = #tpu.dot_dimension_numbers<[1], [0], [0], [1], [0, 0, 1, 1], [], []>} : vector<64x8xbf16>, vector<8x8xbf16>, vector<64x8xf32> -> vector<64x8xf32>
    %120 = arith.addf %113, %119 : vector<64x8xf32>
    %121 = vector.extract_strided_slice %100 {offsets = [3, 0], sizes = [64, 8], strides = [1, 1]} : vector<70x8xbf16> to vector<64x8xbf16>
    %c3 = arith.constant 3 : index
    %c0_58 = arith.constant 0 : index
    %c0_59 = arith.constant 0 : index
    %122 = vector.load %arg7[%c3, %c0_58, %c0_59] : memref<7x8x8xbf16, #tpu.memory_space<vmem>>, vector<1x8x8xbf16>
    %123 = vector.shape_cast %122 : vector<1x8x8xbf16> to vector<8x8xbf16>
    %cst_60 = arith.constant dense<0.000000e+00> : vector<64x8xf32>
    %124 = tpu.matmul %121, %123, %cst_60 {dimension_numbers = #tpu.dot_dimension_numbers<[1], [0], [0], [1], [0, 0, 1, 1], [], []>} : vector<64x8xbf16>, vector<8x8xbf16>, vector<64x8xf32> -> vector<64x8xf32>
    %125 = arith.addf %120, %124 : vector<64x8xf32>
    %126 = vector.extract_strided_slice %100 {offsets = [4, 0], sizes = [64, 8], strides = [1, 1]} : vector<70x8xbf16> to vector<64x8xbf16>
    %127 = vector.broadcast %54 : vector<64x1xbf16> to vector<64x8xbf16>
    %128 = arith.mulf %126, %127 : vector<64x8xbf16>
    %c4 = arith.constant 4 : index
    %c0_61 = arith.constant 0 : index
    %c0_62 = arith.constant 0 : index
    %129 = vector.load %arg7[%c4, %c0_61, %c0_62] : memref<7x8x8xbf16, #tpu.memory_space<vmem>>, vector<1x8x8xbf16>
    %130 = vector.shape_cast %129 : vector<1x8x8xbf16> to vector<8x8xbf16>
    %cst_63 = arith.constant dense<0.000000e+00> : vector<64x8xf32>
    %131 = tpu.matmul %128, %130, %cst_63 {dimension_numbers = #tpu.dot_dimension_numbers<[1], [0], [0], [1], [0, 0, 1, 1], [], []>} : vector<64x8xbf16>, vector<8x8xbf16>, vector<64x8xf32> -> vector<64x8xf32>
    %132 = arith.addf %125, %131 : vector<64x8xf32>
    %133 = vector.extract_strided_slice %100 {offsets = [5, 0], sizes = [64, 8], strides = [1, 1]} : vector<70x8xbf16> to vector<64x8xbf16>
    %134 = vector.broadcast %67 : vector<64x1xbf16> to vector<64x8xbf16>
    %135 = arith.mulf %133, %134 : vector<64x8xbf16>
    %c5 = arith.constant 5 : index
    %c0_64 = arith.constant 0 : index
    %c0_65 = arith.constant 0 : index
    %136 = vector.load %arg7[%c5, %c0_64, %c0_65] : memref<7x8x8xbf16, #tpu.memory_space<vmem>>, vector<1x8x8xbf16>
    %137 = vector.shape_cast %136 : vector<1x8x8xbf16> to vector<8x8xbf16>
    %cst_66 = arith.constant dense<0.000000e+00> : vector<64x8xf32>
    %138 = tpu.matmul %135, %137, %cst_66 {dimension_numbers = #tpu.dot_dimension_numbers<[1], [0], [0], [1], [0, 0, 1, 1], [], []>} : vector<64x8xbf16>, vector<8x8xbf16>, vector<64x8xf32> -> vector<64x8xf32>
    %139 = arith.addf %132, %138 : vector<64x8xf32>
    %140 = vector.extract_strided_slice %100 {offsets = [6, 0], sizes = [64, 8], strides = [1, 1]} : vector<70x8xbf16> to vector<64x8xbf16>
    %141 = vector.broadcast %80 : vector<64x1xbf16> to vector<64x8xbf16>
    %142 = arith.mulf %140, %141 : vector<64x8xbf16>
    %c6 = arith.constant 6 : index
    %c0_67 = arith.constant 0 : index
    %c0_68 = arith.constant 0 : index
    %143 = vector.load %arg7[%c6, %c0_67, %c0_68] : memref<7x8x8xbf16, #tpu.memory_space<vmem>>, vector<1x8x8xbf16>
    %144 = vector.shape_cast %143 : vector<1x8x8xbf16> to vector<8x8xbf16>
    %cst_69 = arith.constant dense<0.000000e+00> : vector<64x8xf32>
    %145 = tpu.matmul %142, %144, %cst_69 {dimension_numbers = #tpu.dot_dimension_numbers<[1], [0], [0], [1], [0, 0, 1, 1], [], []>} : vector<64x8xbf16>, vector<8x8xbf16>, vector<64x8xf32> -> vector<64x8xf32>
    %146 = arith.addf %139, %145 : vector<64x8xf32>
    %c0_70 = arith.constant 0 : index
    %c0_71 = arith.constant 0 : index
    %147 = vector.load %arg8[%c0_70, %c0_71] : memref<1x8xf32, #tpu.memory_space<vmem>>, vector<1x8xf32>
    %148 = vector.broadcast %147 : vector<1x8xf32> to vector<64x8xf32>
    %149 = arith.addf %146, %148 : vector<64x8xf32>
    %cst_72 = arith.constant 0.000000e+00 : f32
    %150 = vector.broadcast %cst_72 : f32 to vector<64x8xf32>
    %151 = arith.maximumf %149, %150 : vector<64x8xf32>
    %152 = arith.truncf %151 : vector<64x8xf32> to vector<64x8xbf16>
    %cst_73 = arith.constant 0.000000e+00 : bf16
    %153 = vector.broadcast %cst_73 : bf16 to vector<24x8xbf16>
    %154 = tpu.concatenate %153, %152, %153 in 0 : vector<24x8xbf16>, vector<64x8xbf16>, vector<24x8xbf16> -> vector<112x8xbf16>
    %155 = vector.extract_strided_slice %154 {offsets = [0, 0], sizes = [64, 8], strides = [1, 1]} : vector<112x8xbf16> to vector<64x8xbf16>
    %c0_74 = arith.constant 0 : index
    %c0_75 = arith.constant 0 : index
    %c0_76 = arith.constant 0 : index
    %156 = vector.load %arg9[%c0_74, %c0_75, %c0_76] : memref<7x8x192xbf16, #tpu.memory_space<vmem>>, vector<1x8x192xbf16>
    %157 = vector.shape_cast %156 : vector<1x8x192xbf16> to vector<8x192xbf16>
    %cst_77 = arith.constant dense<0.000000e+00> : vector<64x192xf32>
    %158 = tpu.matmul %155, %157, %cst_77 {dimension_numbers = #tpu.dot_dimension_numbers<[1], [0], [0], [1], [0, 0, 1, 1], [], []>} : vector<64x8xbf16>, vector<8x192xbf16>, vector<64x192xf32> -> vector<64x192xf32>
    %159 = vector.extract_strided_slice %154 {offsets = [8, 0], sizes = [64, 8], strides = [1, 1]} : vector<112x8xbf16> to vector<64x8xbf16>
    %c1_78 = arith.constant 1 : index
    %c0_79 = arith.constant 0 : index
    %c0_80 = arith.constant 0 : index
    %160 = vector.load %arg9[%c1_78, %c0_79, %c0_80] : memref<7x8x192xbf16, #tpu.memory_space<vmem>>, vector<1x8x192xbf16>
    %161 = vector.shape_cast %160 : vector<1x8x192xbf16> to vector<8x192xbf16>
    %cst_81 = arith.constant dense<0.000000e+00> : vector<64x192xf32>
    %162 = tpu.matmul %159, %161, %cst_81 {dimension_numbers = #tpu.dot_dimension_numbers<[1], [0], [0], [1], [0, 0, 1, 1], [], []>} : vector<64x8xbf16>, vector<8x192xbf16>, vector<64x192xf32> -> vector<64x192xf32>
    %163 = arith.addf %158, %162 : vector<64x192xf32>
    %164 = vector.extract_strided_slice %154 {offsets = [16, 0], sizes = [64, 8], strides = [1, 1]} : vector<112x8xbf16> to vector<64x8xbf16>
    %c2_82 = arith.constant 2 : index
    %c0_83 = arith.constant 0 : index
    %c0_84 = arith.constant 0 : index
    %165 = vector.load %arg9[%c2_82, %c0_83, %c0_84] : memref<7x8x192xbf16, #tpu.memory_space<vmem>>, vector<1x8x192xbf16>
    %166 = vector.shape_cast %165 : vector<1x8x192xbf16> to vector<8x192xbf16>
    %cst_85 = arith.constant dense<0.000000e+00> : vector<64x192xf32>
    %167 = tpu.matmul %164, %166, %cst_85 {dimension_numbers = #tpu.dot_dimension_numbers<[1], [0], [0], [1], [0, 0, 1, 1], [], []>} : vector<64x8xbf16>, vector<8x192xbf16>, vector<64x192xf32> -> vector<64x192xf32>
    %168 = arith.addf %163, %167 : vector<64x192xf32>
    %169 = vector.extract_strided_slice %154 {offsets = [24, 0], sizes = [64, 8], strides = [1, 1]} : vector<112x8xbf16> to vector<64x8xbf16>
    %c3_86 = arith.constant 3 : index
    %c0_87 = arith.constant 0 : index
    %c0_88 = arith.constant 0 : index
    %170 = vector.load %arg9[%c3_86, %c0_87, %c0_88] : memref<7x8x192xbf16, #tpu.memory_space<vmem>>, vector<1x8x192xbf16>
    %171 = vector.shape_cast %170 : vector<1x8x192xbf16> to vector<8x192xbf16>
    %cst_89 = arith.constant dense<0.000000e+00> : vector<64x192xf32>
    %172 = tpu.matmul %169, %171, %cst_89 {dimension_numbers = #tpu.dot_dimension_numbers<[1], [0], [0], [1], [0, 0, 1, 1], [], []>} : vector<64x8xbf16>, vector<8x192xbf16>, vector<64x192xf32> -> vector<64x192xf32>
    %173 = arith.addf %168, %172 : vector<64x192xf32>
    %174 = vector.extract_strided_slice %154 {offsets = [32, 0], sizes = [64, 8], strides = [1, 1]} : vector<112x8xbf16> to vector<64x8xbf16>
    %c4_90 = arith.constant 4 : index
    %c0_91 = arith.constant 0 : index
    %c0_92 = arith.constant 0 : index
    %175 = vector.load %arg9[%c4_90, %c0_91, %c0_92] : memref<7x8x192xbf16, #tpu.memory_space<vmem>>, vector<1x8x192xbf16>
    %176 = vector.shape_cast %175 : vector<1x8x192xbf16> to vector<8x192xbf16>
    %cst_93 = arith.constant dense<0.000000e+00> : vector<64x192xf32>
    %177 = tpu.matmul %174, %176, %cst_93 {dimension_numbers = #tpu.dot_dimension_numbers<[1], [0], [0], [1], [0, 0, 1, 1], [], []>} : vector<64x8xbf16>, vector<8x192xbf16>, vector<64x192xf32> -> vector<64x192xf32>
    %178 = arith.addf %173, %177 : vector<64x192xf32>
    %179 = vector.extract_strided_slice %154 {offsets = [40, 0], sizes = [64, 8], strides = [1, 1]} : vector<112x8xbf16> to vector<64x8xbf16>
    %c5_94 = arith.constant 5 : index
    %c0_95 = arith.constant 0 : index
    %c0_96 = arith.constant 0 : index
    %180 = vector.load %arg9[%c5_94, %c0_95, %c0_96] : memref<7x8x192xbf16, #tpu.memory_space<vmem>>, vector<1x8x192xbf16>
    %181 = vector.shape_cast %180 : vector<1x8x192xbf16> to vector<8x192xbf16>
    %cst_97 = arith.constant dense<0.000000e+00> : vector<64x192xf32>
    %182 = tpu.matmul %179, %181, %cst_97 {dimension_numbers = #tpu.dot_dimension_numbers<[1], [0], [0], [1], [0, 0, 1, 1], [], []>} : vector<64x8xbf16>, vector<8x192xbf16>, vector<64x192xf32> -> vector<64x192xf32>
    %183 = arith.addf %178, %182 : vector<64x192xf32>
    %184 = vector.extract_strided_slice %154 {offsets = [48, 0], sizes = [64, 8], strides = [1, 1]} : vector<112x8xbf16> to vector<64x8xbf16>
    %c6_98 = arith.constant 6 : index
    %c0_99 = arith.constant 0 : index
    %c0_100 = arith.constant 0 : index
    %185 = vector.load %arg9[%c6_98, %c0_99, %c0_100] : memref<7x8x192xbf16, #tpu.memory_space<vmem>>, vector<1x8x192xbf16>
    %186 = vector.shape_cast %185 : vector<1x8x192xbf16> to vector<8x192xbf16>
    %cst_101 = arith.constant dense<0.000000e+00> : vector<64x192xf32>
    %187 = tpu.matmul %184, %186, %cst_101 {dimension_numbers = #tpu.dot_dimension_numbers<[1], [0], [0], [1], [0, 0, 1, 1], [], []>} : vector<64x8xbf16>, vector<8x192xbf16>, vector<64x192xf32> -> vector<64x192xf32>
    %188 = arith.addf %183, %187 : vector<64x192xf32>
    %c0_102 = arith.constant 0 : index
    %c0_103 = arith.constant 0 : index
    %189 = vector.load %arg10[%c0_102, %c0_103] : memref<1x192xf32, #tpu.memory_space<vmem>>, vector<1x192xf32>
    %190 = vector.broadcast %189 : vector<1x192xf32> to vector<64x192xf32>
    %191 = arith.addf %188, %190 : vector<64x192xf32>
    %cst_104 = arith.constant 0.000000e+00 : f32
    %192 = vector.broadcast %cst_104 : f32 to vector<64x192xf32>
    %193 = arith.maximumf %191, %192 : vector<64x192xf32>
    %c0_105 = arith.constant 0 : index
    %c1_106 = arith.constant 1 : index
    %c0_107 = arith.constant 0 : index
    %c0_108 = arith.constant 0 : index
    %194 = vector.load %arg23[%c0_105, %c1_106, %c0_107, %c0_108] : memref<1x4x64x192xf32, #tpu.memory_space<vmem>>, vector<1x1x64x192xf32>
    %195 = vector.shape_cast %194 : vector<1x1x64x192xf32> to vector<64x192xf32>
    %196 = vector.shape_cast %193 : vector<64x192xf32> to vector<1x1x64x192xf32>
    tpu.vector_store %arg23[%c0_105, %c1_106, %c0_107, %c0_108], %196 {strides = array<i32>} : memref<1x4x64x192xf32, #tpu.memory_space<vmem>>, vector<1x1x64x192xf32>,
    %c0_109 = arith.constant 0 : index
    %c0_110 = arith.constant 0 : index
    %197 = vector.load %arg11[%c0_109, %c0_110] : memref<16x8xbf16, #tpu.memory_space<vmem>>, vector<16x8xbf16>
    %cst_111 = arith.constant dense<0.000000e+00> : vector<64x8xf32>
    %198 = tpu.matmul %1, %197, %cst_111 {dimension_numbers = #tpu.dot_dimension_numbers<[1], [0], [0], [1], [0, 0, 1, 1], [], []>} : vector<64x16xbf16>, vector<16x8xbf16>, vector<64x8xf32> -> vector<64x8xf32>
    %c0_112 = arith.constant 0 : index
    %c0_113 = arith.constant 0 : index
    %199 = vector.load %arg12[%c0_112, %c0_113] : memref<1x8xf32, #tpu.memory_space<vmem>>, vector<1x8xf32>
    %200 = vector.broadcast %199 : vector<1x8xf32> to vector<64x8xf32>
    %201 = arith.addf %198, %200 : vector<64x8xf32>
    %cst_114 = arith.constant 0.000000e+00 : f32
    %202 = vector.broadcast %cst_114 : f32 to vector<64x8xf32>
    %203 = arith.maximumf %201, %202 : vector<64x8xf32>
    %204 = arith.truncf %203 : vector<64x8xf32> to vector<64x8xbf16>
    %cst_115 = arith.constant 0.000000e+00 : bf16
    %205 = vector.broadcast %cst_115 : bf16 to vector<24x8xbf16>
    %206 = tpu.concatenate %205, %204, %205 in 0 : vector<24x8xbf16>, vector<64x8xbf16>, vector<24x8xbf16> -> vector<112x8xbf16>
    %207 = vector.extract_strided_slice %206 {offsets = [0, 0], sizes = [64, 8], strides = [1, 1]} : vector<112x8xbf16> to vector<64x8xbf16>
    %c0_116 = arith.constant 0 : index
    %c0_117 = arith.constant 0 : index
    %c0_118 = arith.constant 0 : index
    %208 = vector.load %arg13[%c0_116, %c0_117, %c0_118] : memref<7x8x8xbf16, #tpu.memory_space<vmem>>, vector<1x8x8xbf16>
    %209 = vector.shape_cast %208 : vector<1x8x8xbf16> to vector<8x8xbf16>
    %cst_119 = arith.constant dense<0.000000e+00> : vector<64x8xf32>
    %210 = tpu.matmul %207, %209, %cst_119 {dimension_numbers = #tpu.dot_dimension_numbers<[1], [0], [0], [1], [0, 0, 1, 1], [], []>} : vector<64x8xbf16>, vector<8x8xbf16>, vector<64x8xf32> -> vector<64x8xf32>
    %211 = vector.extract_strided_slice %206 {offsets = [8, 0], sizes = [64, 8], strides = [1, 1]} : vector<112x8xbf16> to vector<64x8xbf16>
    %c1_120 = arith.constant 1 : index
    %c0_121 = arith.constant 0 : index
    %c0_122 = arith.constant 0 : index
    %212 = vector.load %arg13[%c1_120, %c0_121, %c0_122] : memref<7x8x8xbf16, #tpu.memory_space<vmem>>, vector<1x8x8xbf16>
    %213 = vector.shape_cast %212 : vector<1x8x8xbf16> to vector<8x8xbf16>
    %cst_123 = arith.constant dense<0.000000e+00> : vector<64x8xf32>
    %214 = tpu.matmul %211, %213, %cst_123 {dimension_numbers = #tpu.dot_dimension_numbers<[1], [0], [0], [1], [0, 0, 1, 1], [], []>} : vector<64x8xbf16>, vector<8x8xbf16>, vector<64x8xf32> -> vector<64x8xf32>
    %215 = arith.addf %210, %214 : vector<64x8xf32>
    %216 = vector.extract_strided_slice %206 {offsets = [16, 0], sizes = [64, 8], strides = [1, 1]} : vector<112x8xbf16> to vector<64x8xbf16>
    %c2_124 = arith.constant 2 : index
    %c0_125 = arith.constant 0 : index
    %c0_126 = arith.constant 0 : index
    %217 = vector.load %arg13[%c2_124, %c0_125, %c0_126] : memref<7x8x8xbf16, #tpu.memory_space<vmem>>, vector<1x8x8xbf16>
    %218 = vector.shape_cast %217 : vector<1x8x8xbf16> to vector<8x8xbf16>
    %cst_127 = arith.constant dense<0.000000e+00> : vector<64x8xf32>
    %219 = tpu.matmul %216, %218, %cst_127 {dimension_numbers = #tpu.dot_dimension_numbers<[1], [0], [0], [1], [0, 0, 1, 1], [], []>} : vector<64x8xbf16>, vector<8x8xbf16>, vector<64x8xf32> -> vector<64x8xf32>
    %220 = arith.addf %215, %219 : vector<64x8xf32>
    %221 = vector.extract_strided_slice %206 {offsets = [24, 0], sizes = [64, 8], strides = [1, 1]} : vector<112x8xbf16> to vector<64x8xbf16>
    %c3_128 = arith.constant 3 : index
    %c0_129 = arith.constant 0 : index
    %c0_130 = arith.constant 0 : index
    %222 = vector.load %arg13[%c3_128, %c0_129, %c0_130] : memref<7x8x8xbf16, #tpu.memory_space<vmem>>, vector<1x8x8xbf16>
    %223 = vector.shape_cast %222 : vector<1x8x8xbf16> to vector<8x8xbf16>
    %cst_131 = arith.constant dense<0.000000e+00> : vector<64x8xf32>
    %224 = tpu.matmul %221, %223, %cst_131 {dimension_numbers = #tpu.dot_dimension_numbers<[1], [0], [0], [1], [0, 0, 1, 1], [], []>} : vector<64x8xbf16>, vector<8x8xbf16>, vector<64x8xf32> -> vector<64x8xf32>
    %225 = arith.addf %220, %224 : vector<64x8xf32>
    %226 = vector.extract_strided_slice %206 {offsets = [32, 0], sizes = [64, 8], strides = [1, 1]} : vector<112x8xbf16> to vector<64x8xbf16>
    %c4_132 = arith.constant 4 : index
    %c0_133 = arith.constant 0 : index
    %c0_134 = arith.constant 0 : index
    %227 = vector.load %arg13[%c4_132, %c0_133, %c0_134] : memref<7x8x8xbf16, #tpu.memory_space<vmem>>, vector<1x8x8xbf16>
    %228 = vector.shape_cast %227 : vector<1x8x8xbf16> to vector<8x8xbf16>
    %cst_135 = arith.constant dense<0.000000e+00> : vector<64x8xf32>
    %229 = tpu.matmul %226, %228, %cst_135 {dimension_numbers = #tpu.dot_dimension_numbers<[1], [0], [0], [1], [0, 0, 1, 1], [], []>} : vector<64x8xbf16>, vector<8x8xbf16>, vector<64x8xf32> -> vector<64x8xf32>
    %230 = arith.addf %225, %229 : vector<64x8xf32>
    %231 = vector.extract_strided_slice %206 {offsets = [40, 0], sizes = [64, 8], strides = [1, 1]} : vector<112x8xbf16> to vector<64x8xbf16>
    %c5_136 = arith.constant 5 : index
    %c0_137 = arith.constant 0 : index
    %c0_138 = arith.constant 0 : index
    %232 = vector.load %arg13[%c5_136, %c0_137, %c0_138] : memref<7x8x8xbf16, #tpu.memory_space<vmem>>, vector<1x8x8xbf16>
    %233 = vector.shape_cast %232 : vector<1x8x8xbf16> to vector<8x8xbf16>
    %cst_139 = arith.constant dense<0.000000e+00> : vector<64x8xf32>
    %234 = tpu.matmul %231, %233, %cst_139 {dimension_numbers = #tpu.dot_dimension_numbers<[1], [0], [0], [1], [0, 0, 1, 1], [], []>} : vector<64x8xbf16>, vector<8x8xbf16>, vector<64x8xf32> -> vector<64x8xf32>
    %235 = arith.addf %230, %234 : vector<64x8xf32>
    %236 = vector.extract_strided_slice %206 {offsets = [48, 0], sizes = [64, 8], strides = [1, 1]} : vector<112x8xbf16> to vector<64x8xbf16>
    %c6_140 = arith.constant 6 : index
    %c0_141 = arith.constant 0 : index
    %c0_142 = arith.constant 0 : index
    %237 = vector.load %arg13[%c6_140, %c0_141, %c0_142] : memref<7x8x8xbf16, #tpu.memory_space<vmem>>, vector<1x8x8xbf16>
    %238 = vector.shape_cast %237 : vector<1x8x8xbf16> to vector<8x8xbf16>
    %cst_143 = arith.constant dense<0.000000e+00> : vector<64x8xf32>
    %239 = tpu.matmul %236, %238, %cst_143 {dimension_numbers = #tpu.dot_dimension_numbers<[1], [0], [0], [1], [0, 0, 1, 1], [], []>} : vector<64x8xbf16>, vector<8x8xbf16>, vector<64x8xf32> -> vector<64x8xf32>
    %240 = arith.addf %235, %239 : vector<64x8xf32>
    %c0_144 = arith.constant 0 : index
    %c0_145 = arith.constant 0 : index
    %241 = vector.load %arg14[%c0_144, %c0_145] : memref<1x8xf32, #tpu.memory_space<vmem>>, vector<1x8xf32>
    %242 = vector.broadcast %241 : vector<1x8xf32> to vector<64x8xf32>
    %243 = arith.addf %240, %242 : vector<64x8xf32>
    %cst_146 = arith.constant 0.000000e+00 : f32
    %244 = vector.broadcast %cst_146 : f32 to vector<64x8xf32>
    %245 = arith.maximumf %243, %244 : vector<64x8xf32>
    %246 = arith.truncf %245 : vector<64x8xf32> to vector<64x8xbf16>
    %cst_147 = arith.constant 0.000000e+00 : bf16
    %247 = vector.broadcast %cst_147 : bf16 to vector<3x8xbf16>
    %248 = tpu.concatenate %247, %246, %247 in 0 : vector<3x8xbf16>, vector<64x8xbf16>, vector<3x8xbf16> -> vector<70x8xbf16>
    %249 = vector.extract_strided_slice %248 {offsets = [0, 0], sizes = [64, 8], strides = [1, 1]} : vector<70x8xbf16> to vector<64x8xbf16>
    %250 = vector.broadcast %15 : vector<64x1xbf16> to vector<64x8xbf16>
    %251 = arith.mulf %249, %250 : vector<64x8xbf16>
    %c0_148 = arith.constant 0 : index
    %c0_149 = arith.constant 0 : index
    %c0_150 = arith.constant 0 : index
    %252 = vector.load %arg15[%c0_148, %c0_149, %c0_150] : memref<7x8x8xbf16, #tpu.memory_space<vmem>>, vector<1x8x8xbf16>
    %253 = vector.shape_cast %252 : vector<1x8x8xbf16> to vector<8x8xbf16>
    %cst_151 = arith.constant dense<0.000000e+00> : vector<64x8xf32>
    %254 = tpu.matmul %251, %253, %cst_151 {dimension_numbers = #tpu.dot_dimension_numbers<[1], [0], [0], [1], [0, 0, 1, 1], [], []>} : vector<64x8xbf16>, vector<8x8xbf16>, vector<64x8xf32> -> vector<64x8xf32>
    %255 = vector.extract_strided_slice %248 {offsets = [1, 0], sizes = [64, 8], strides = [1, 1]} : vector<70x8xbf16> to vector<64x8xbf16>
    %256 = vector.broadcast %28 : vector<64x1xbf16> to vector<64x8xbf16>
    %257 = arith.mulf %255, %256 : vector<64x8xbf16>
    %c1_152 = arith.constant 1 : index
    %c0_153 = arith.constant 0 : index
    %c0_154 = arith.constant 0 : index
    %258 = vector.load %arg15[%c1_152, %c0_153, %c0_154] : memref<7x8x8xbf16, #tpu.memory_space<vmem>>, vector<1x8x8xbf16>
    %259 = vector.shape_cast %258 : vector<1x8x8xbf16> to vector<8x8xbf16>
    %cst_155 = arith.constant dense<0.000000e+00> : vector<64x8xf32>
    %260 = tpu.matmul %257, %259, %cst_155 {dimension_numbers = #tpu.dot_dimension_numbers<[1], [0], [0], [1], [0, 0, 1, 1], [], []>} : vector<64x8xbf16>, vector<8x8xbf16>, vector<64x8xf32> -> vector<64x8xf32>
    %261 = arith.addf %254, %260 : vector<64x8xf32>
    %262 = vector.extract_strided_slice %248 {offsets = [2, 0], sizes = [64, 8], strides = [1, 1]} : vector<70x8xbf16> to vector<64x8xbf16>
    %263 = vector.broadcast %41 : vector<64x1xbf16> to vector<64x8xbf16>
    %264 = arith.mulf %262, %263 : vector<64x8xbf16>
    %c2_156 = arith.constant 2 : index
    %c0_157 = arith.constant 0 : index
    %c0_158 = arith.constant 0 : index
    %265 = vector.load %arg15[%c2_156, %c0_157, %c0_158] : memref<7x8x8xbf16, #tpu.memory_space<vmem>>, vector<1x8x8xbf16>
    %266 = vector.shape_cast %265 : vector<1x8x8xbf16> to vector<8x8xbf16>
    %cst_159 = arith.constant dense<0.000000e+00> : vector<64x8xf32>
    %267 = tpu.matmul %264, %266, %cst_159 {dimension_numbers = #tpu.dot_dimension_numbers<[1], [0], [0], [1], [0, 0, 1, 1], [], []>} : vector<64x8xbf16>, vector<8x8xbf16>, vector<64x8xf32> -> vector<64x8xf32>
    %268 = arith.addf %261, %267 : vector<64x8xf32>
    %269 = vector.extract_strided_slice %248 {offsets = [3, 0], sizes = [64, 8], strides = [1, 1]} : vector<70x8xbf16> to vector<64x8xbf16>
    %c3_160 = arith.constant 3 : index
    %c0_161 = arith.constant 0 : index
    %c0_162 = arith.constant 0 : index
    %270 = vector.load %arg15[%c3_160, %c0_161, %c0_162] : memref<7x8x8xbf16, #tpu.memory_space<vmem>>, vector<1x8x8xbf16>
    %271 = vector.shape_cast %270 : vector<1x8x8xbf16> to vector<8x8xbf16>
    %cst_163 = arith.constant dense<0.000000e+00> : vector<64x8xf32>
    %272 = tpu.matmul %269, %271, %cst_163 {dimension_numbers = #tpu.dot_dimension_numbers<[1], [0], [0], [1], [0, 0, 1, 1], [], []>} : vector<64x8xbf16>, vector<8x8xbf16>, vector<64x8xf32> -> vector<64x8xf32>
    %273 = arith.addf %268, %272 : vector<64x8xf32>
    %274 = vector.extract_strided_slice %248 {offsets = [4, 0], sizes = [64, 8], strides = [1, 1]} : vector<70x8xbf16> to vector<64x8xbf16>
    %275 = vector.broadcast %54 : vector<64x1xbf16> to vector<64x8xbf16>
    %276 = arith.mulf %274, %275 : vector<64x8xbf16>
    %c4_164 = arith.constant 4 : index
    %c0_165 = arith.constant 0 : index
    %c0_166 = arith.constant 0 : index
    %277 = vector.load %arg15[%c4_164, %c0_165, %c0_166] : memref<7x8x8xbf16, #tpu.memory_space<vmem>>, vector<1x8x8xbf16>
    %278 = vector.shape_cast %277 : vector<1x8x8xbf16> to vector<8x8xbf16>
    %cst_167 = arith.constant dense<0.000000e+00> : vector<64x8xf32>
    %279 = tpu.matmul %276, %278, %cst_167 {dimension_numbers = #tpu.dot_dimension_numbers<[1], [0], [0], [1], [0, 0, 1, 1], [], []>} : vector<64x8xbf16>, vector<8x8xbf16>, vector<64x8xf32> -> vector<64x8xf32>
    %280 = arith.addf %273, %279 : vector<64x8xf32>
    %281 = vector.extract_strided_slice %248 {offsets = [5, 0], sizes = [64, 8], strides = [1, 1]} : vector<70x8xbf16> to vector<64x8xbf16>
    %282 = vector.broadcast %67 : vector<64x1xbf16> to vector<64x8xbf16>
    %283 = arith.mulf %281, %282 : vector<64x8xbf16>
    %c5_168 = arith.constant 5 : index
    %c0_169 = arith.constant 0 : index
    %c0_170 = arith.constant 0 : index
    %284 = vector.load %arg15[%c5_168, %c0_169, %c0_170] : memref<7x8x8xbf16, #tpu.memory_space<vmem>>, vector<1x8x8xbf16>
    %285 = vector.shape_cast %284 : vector<1x8x8xbf16> to vector<8x8xbf16>
    %cst_171 = arith.constant dense<0.000000e+00> : vector<64x8xf32>
    %286 = tpu.matmul %283, %285, %cst_171 {dimension_numbers = #tpu.dot_dimension_numbers<[1], [0], [0], [1], [0, 0, 1, 1], [], []>} : vector<64x8xbf16>, vector<8x8xbf16>, vector<64x8xf32> -> vector<64x8xf32>
    %287 = arith.addf %280, %286 : vector<64x8xf32>
    %288 = vector.extract_strided_slice %248 {offsets = [6, 0], sizes = [64, 8], strides = [1, 1]} : vector<70x8xbf16> to vector<64x8xbf16>
    %289 = vector.broadcast %80 : vector<64x1xbf16> to vector<64x8xbf16>
    %290 = arith.mulf %288, %289 : vector<64x8xbf16>
    %c6_172 = arith.constant 6 : index
    %c0_173 = arith.constant 0 : index
    %c0_174 = arith.constant 0 : index
    %291 = vector.load %arg15[%c6_172, %c0_173, %c0_174] : memref<7x8x8xbf16, #tpu.memory_space<vmem>>, vector<1x8x8xbf16>
    %292 = vector.shape_cast %291 : vector<1x8x8xbf16> to vector<8x8xbf16>
    %cst_175 = arith.constant dense<0.000000e+00> : vector<64x8xf32>
    %293 = tpu.matmul %290, %292, %cst_175 {dimension_numbers = #tpu.dot_dimension_numbers<[1], [0], [0], [1], [0, 0, 1, 1], [], []>} : vector<64x8xbf16>, vector<8x8xbf16>, vector<64x8xf32> -> vector<64x8xf32>
    %294 = arith.addf %287, %293 : vector<64x8xf32>
    %c0_176 = arith.constant 0 : index
    %c0_177 = arith.constant 0 : index
    %295 = vector.load %arg16[%c0_176, %c0_177] : memref<1x8xf32, #tpu.memory_space<vmem>>, vector<1x8xf32>
    %296 = vector.broadcast %295 : vector<1x8xf32> to vector<64x8xf32>
    %297 = arith.addf %294, %296 : vector<64x8xf32>
    %cst_178 = arith.constant 0.000000e+00 : f32
    %298 = vector.broadcast %cst_178 : f32 to vector<64x8xf32>
    %299 = arith.maximumf %297, %298 : vector<64x8xf32>
    %300 = arith.truncf %299 : vector<64x8xf32> to vector<64x8xbf16>
    %cst_179 = arith.constant 0.000000e+00 : bf16
    %301 = vector.broadcast %cst_179 : bf16 to vector<24x8xbf16>
    %302 = tpu.concatenate %301, %300, %301 in 0 : vector<24x8xbf16>, vector<64x8xbf16>, vector<24x8xbf16> -> vector<112x8xbf16>
    %303 = vector.extract_strided_slice %302 {offsets = [0, 0], sizes = [64, 8], strides = [1, 1]} : vector<112x8xbf16> to vector<64x8xbf16>
    %c0_180 = arith.constant 0 : index
    %c0_181 = arith.constant 0 : index
    %c0_182 = arith.constant 0 : index
    %304 = vector.load %arg17[%c0_180, %c0_181, %c0_182] : memref<7x8x8xbf16, #tpu.memory_space<vmem>>, vector<1x8x8xbf16>
    %305 = vector.shape_cast %304 : vector<1x8x8xbf16> to vector<8x8xbf16>
    %cst_183 = arith.constant dense<0.000000e+00> : vector<64x8xf32>
    %306 = tpu.matmul %303, %305, %cst_183 {dimension_numbers = #tpu.dot_dimension_numbers<[1], [0], [0], [1], [0, 0, 1, 1], [], []>} : vector<64x8xbf16>, vector<8x8xbf16>, vector<64x8xf32> -> vector<64x8xf32>
    %307 = vector.extract_strided_slice %302 {offsets = [8, 0], sizes = [64, 8], strides = [1, 1]} : vector<112x8xbf16> to vector<64x8xbf16>
    %c1_184 = arith.constant 1 : index
    %c0_185 = arith.constant 0 : index
    %c0_186 = arith.constant 0 : index
    %308 = vector.load %arg17[%c1_184, %c0_185, %c0_186] : memref<7x8x8xbf16, #tpu.memory_space<vmem>>, vector<1x8x8xbf16>
    %309 = vector.shape_cast %308 : vector<1x8x8xbf16> to vector<8x8xbf16>
    %cst_187 = arith.constant dense<0.000000e+00> : vector<64x8xf32>
    %310 = tpu.matmul %307, %309, %cst_187 {dimension_numbers = #tpu.dot_dimension_numbers<[1], [0], [0], [1], [0, 0, 1, 1], [], []>} : vector<64x8xbf16>, vector<8x8xbf16>, vector<64x8xf32> -> vector<64x8xf32>
    %311 = arith.addf %306, %310 : vector<64x8xf32>
    %312 = vector.extract_strided_slice %302 {offsets = [16, 0], sizes = [64, 8], strides = [1, 1]} : vector<112x8xbf16> to vector<64x8xbf16>
    %c2_188 = arith.constant 2 : index
    %c0_189 = arith.constant 0 : index
    %c0_190 = arith.constant 0 : index
    %313 = vector.load %arg17[%c2_188, %c0_189, %c0_190] : memref<7x8x8xbf16, #tpu.memory_space<vmem>>, vector<1x8x8xbf16>
    %314 = vector.shape_cast %313 : vector<1x8x8xbf16> to vector<8x8xbf16>
    %cst_191 = arith.constant dense<0.000000e+00> : vector<64x8xf32>
    %315 = tpu.matmul %312, %314, %cst_191 {dimension_numbers = #tpu.dot_dimension_numbers<[1], [0], [0], [1], [0, 0, 1, 1], [], []>} : vector<64x8xbf16>, vector<8x8xbf16>, vector<64x8xf32> -> vector<64x8xf32>
    %316 = arith.addf %311, %315 : vector<64x8xf32>
    %317 = vector.extract_strided_slice %302 {offsets = [24, 0], sizes = [64, 8], strides = [1, 1]} : vector<112x8xbf16> to vector<64x8xbf16>
    %c3_192 = arith.constant 3 : index
    %c0_193 = arith.constant 0 : index
    %c0_194 = arith.constant 0 : index
    %318 = vector.load %arg17[%c3_192, %c0_193, %c0_194] : memref<7x8x8xbf16, #tpu.memory_space<vmem>>, vector<1x8x8xbf16>
    %319 = vector.shape_cast %318 : vector<1x8x8xbf16> to vector<8x8xbf16>
    %cst_195 = arith.constant dense<0.000000e+00> : vector<64x8xf32>
    %320 = tpu.matmul %317, %319, %cst_195 {dimension_numbers = #tpu.dot_dimension_numbers<[1], [0], [0], [1], [0, 0, 1, 1], [], []>} : vector<64x8xbf16>, vector<8x8xbf16>, vector<64x8xf32> -> vector<64x8xf32>
    %321 = arith.addf %316, %320 : vector<64x8xf32>
    %322 = vector.extract_strided_slice %302 {offsets = [32, 0], sizes = [64, 8], strides = [1, 1]} : vector<112x8xbf16> to vector<64x8xbf16>
    %c4_196 = arith.constant 4 : index
    %c0_197 = arith.constant 0 : index
    %c0_198 = arith.constant 0 : index
    %323 = vector.load %arg17[%c4_196, %c0_197, %c0_198] : memref<7x8x8xbf16, #tpu.memory_space<vmem>>, vector<1x8x8xbf16>
    %324 = vector.shape_cast %323 : vector<1x8x8xbf16> to vector<8x8xbf16>
    %cst_199 = arith.constant dense<0.000000e+00> : vector<64x8xf32>
    %325 = tpu.matmul %322, %324, %cst_199 {dimension_numbers = #tpu.dot_dimension_numbers<[1], [0], [0], [1], [0, 0, 1, 1], [], []>} : vector<64x8xbf16>, vector<8x8xbf16>, vector<64x8xf32> -> vector<64x8xf32>
    %326 = arith.addf %321, %325 : vector<64x8xf32>
    %327 = vector.extract_strided_slice %302 {offsets = [40, 0], sizes = [64, 8], strides = [1, 1]} : vector<112x8xbf16> to vector<64x8xbf16>
    %c5_200 = arith.constant 5 : index
    %c0_201 = arith.constant 0 : index
    %c0_202 = arith.constant 0 : index
    %328 = vector.load %arg17[%c5_200, %c0_201, %c0_202] : memref<7x8x8xbf16, #tpu.memory_space<vmem>>, vector<1x8x8xbf16>
    %329 = vector.shape_cast %328 : vector<1x8x8xbf16> to vector<8x8xbf16>
    %cst_203 = arith.constant dense<0.000000e+00> : vector<64x8xf32>
    %330 = tpu.matmul %327, %329, %cst_203 {dimension_numbers = #tpu.dot_dimension_numbers<[1], [0], [0], [1], [0, 0, 1, 1], [], []>} : vector<64x8xbf16>, vector<8x8xbf16>, vector<64x8xf32> -> vector<64x8xf32>
    %331 = arith.addf %326, %330 : vector<64x8xf32>
    %332 = vector.extract_strided_slice %302 {offsets = [48, 0], sizes = [64, 8], strides = [1, 1]} : vector<112x8xbf16> to vector<64x8xbf16>
    %c6_204 = arith.constant 6 : index
    %c0_205 = arith.constant 0 : index
    %c0_206 = arith.constant 0 : index
    %333 = vector.load %arg17[%c6_204, %c0_205, %c0_206] : memref<7x8x8xbf16, #tpu.memory_space<vmem>>, vector<1x8x8xbf16>
    %334 = vector.shape_cast %333 : vector<1x8x8xbf16> to vector<8x8xbf16>
    %cst_207 = arith.constant dense<0.000000e+00> : vector<64x8xf32>
    %335 = tpu.matmul %332, %334, %cst_207 {dimension_numbers = #tpu.dot_dimension_numbers<[1], [0], [0], [1], [0, 0, 1, 1], [], []>} : vector<64x8xbf16>, vector<8x8xbf16>, vector<64x8xf32> -> vector<64x8xf32>
    %336 = arith.addf %331, %335 : vector<64x8xf32>
    %c0_208 = arith.constant 0 : index
    %c0_209 = arith.constant 0 : index
    %337 = vector.load %arg18[%c0_208, %c0_209] : memref<1x8xf32, #tpu.memory_space<vmem>>, vector<1x8xf32>
    %338 = vector.broadcast %337 : vector<1x8xf32> to vector<64x8xf32>
    %339 = arith.addf %336, %338 : vector<64x8xf32>
    %cst_210 = arith.constant 0.000000e+00 : f32
    %340 = vector.broadcast %cst_210 : f32 to vector<64x8xf32>
    %341 = arith.maximumf %339, %340 : vector<64x8xf32>
    %342 = arith.truncf %341 : vector<64x8xf32> to vector<64x8xbf16>
    %cst_211 = arith.constant 0.000000e+00 : bf16
    %343 = vector.broadcast %cst_211 : bf16 to vector<3x8xbf16>
    %344 = tpu.concatenate %343, %342, %343 in 0 : vector<3x8xbf16>, vector<64x8xbf16>, vector<3x8xbf16> -> vector<70x8xbf16>
    %345 = vector.extract_strided_slice %344 {offsets = [0, 0], sizes = [64, 8], strides = [1, 1]} : vector<70x8xbf16> to vector<64x8xbf16>
    %346 = vector.broadcast %15 : vector<64x1xbf16> to vector<64x8xbf16>
    %347 = arith.mulf %345, %346 : vector<64x8xbf16>
    %c0_212 = arith.constant 0 : index
    %c0_213 = arith.constant 0 : index
    %c0_214 = arith.constant 0 : index
    %348 = vector.load %arg19[%c0_212, %c0_213, %c0_214] : memref<7x8x192xbf16, #tpu.memory_space<vmem>>, vector<1x8x192xbf16>
    %349 = vector.shape_cast %348 : vector<1x8x192xbf16> to vector<8x192xbf16>
    %cst_215 = arith.constant dense<0.000000e+00> : vector<64x192xf32>
    %350 = tpu.matmul %347, %349, %cst_215 {dimension_numbers = #tpu.dot_dimension_numbers<[1], [0], [0], [1], [0, 0, 1, 1], [], []>} : vector<64x8xbf16>, vector<8x192xbf16>, vector<64x192xf32> -> vector<64x192xf32>
    %351 = vector.extract_strided_slice %344 {offsets = [1, 0], sizes = [64, 8], strides = [1, 1]} : vector<70x8xbf16> to vector<64x8xbf16>
    %352 = vector.broadcast %28 : vector<64x1xbf16> to vector<64x8xbf16>
    %353 = arith.mulf %351, %352 : vector<64x8xbf16>
    %c1_216 = arith.constant 1 : index
    %c0_217 = arith.constant 0 : index
    %c0_218 = arith.constant 0 : index
    %354 = vector.load %arg19[%c1_216, %c0_217, %c0_218] : memref<7x8x192xbf16, #tpu.memory_space<vmem>>, vector<1x8x192xbf16>
    %355 = vector.shape_cast %354 : vector<1x8x192xbf16> to vector<8x192xbf16>
    %cst_219 = arith.constant dense<0.000000e+00> : vector<64x192xf32>
    %356 = tpu.matmul %353, %355, %cst_219 {dimension_numbers = #tpu.dot_dimension_numbers<[1], [0], [0], [1], [0, 0, 1, 1], [], []>} : vector<64x8xbf16>, vector<8x192xbf16>, vector<64x192xf32> -> vector<64x192xf32>
    %357 = arith.addf %350, %356 : vector<64x192xf32>
    %358 = vector.extract_strided_slice %344 {offsets = [2, 0], sizes = [64, 8], strides = [1, 1]} : vector<70x8xbf16> to vector<64x8xbf16>
    %359 = vector.broadcast %41 : vector<64x1xbf16> to vector<64x8xbf16>
    %360 = arith.mulf %358, %359 : vector<64x8xbf16>
    %c2_220 = arith.constant 2 : index
    %c0_221 = arith.constant 0 : index
    %c0_222 = arith.constant 0 : index
    %361 = vector.load %arg19[%c2_220, %c0_221, %c0_222] : memref<7x8x192xbf16, #tpu.memory_space<vmem>>, vector<1x8x192xbf16>
    %362 = vector.shape_cast %361 : vector<1x8x192xbf16> to vector<8x192xbf16>
    %cst_223 = arith.constant dense<0.000000e+00> : vector<64x192xf32>
    %363 = tpu.matmul %360, %362, %cst_223 {dimension_numbers = #tpu.dot_dimension_numbers<[1], [0], [0], [1], [0, 0, 1, 1], [], []>} : vector<64x8xbf16>, vector<8x192xbf16>, vector<64x192xf32> -> vector<64x192xf32>
    %364 = arith.addf %357, %363 : vector<64x192xf32>
    %365 = vector.extract_strided_slice %344 {offsets = [3, 0], sizes = [64, 8], strides = [1, 1]} : vector<70x8xbf16> to vector<64x8xbf16>
    %c3_224 = arith.constant 3 : index
    %c0_225 = arith.constant 0 : index
    %c0_226 = arith.constant 0 : index
    %366 = vector.load %arg19[%c3_224, %c0_225, %c0_226] : memref<7x8x192xbf16, #tpu.memory_space<vmem>>, vector<1x8x192xbf16>
    %367 = vector.shape_cast %366 : vector<1x8x192xbf16> to vector<8x192xbf16>
    %cst_227 = arith.constant dense<0.000000e+00> : vector<64x192xf32>
    %368 = tpu.matmul %365, %367, %cst_227 {dimension_numbers = #tpu.dot_dimension_numbers<[1], [0], [0], [1], [0, 0, 1, 1], [], []>} : vector<64x8xbf16>, vector<8x192xbf16>, vector<64x192xf32> -> vector<64x192xf32>
    %369 = arith.addf %364, %368 : vector<64x192xf32>
    %370 = vector.extract_strided_slice %344 {offsets = [4, 0], sizes = [64, 8], strides = [1, 1]} : vector<70x8xbf16> to vector<64x8xbf16>
    %371 = vector.broadcast %54 : vector<64x1xbf16> to vector<64x8xbf16>
    %372 = arith.mulf %370, %371 : vector<64x8xbf16>
    %c4_228 = arith.constant 4 : index
    %c0_229 = arith.constant 0 : index
    %c0_230 = arith.constant 0 : index
    %373 = vector.load %arg19[%c4_228, %c0_229, %c0_230] : memref<7x8x192xbf16, #tpu.memory_space<vmem>>, vector<1x8x192xbf16>
    %374 = vector.shape_cast %373 : vector<1x8x192xbf16> to vector<8x192xbf16>
    %cst_231 = arith.constant dense<0.000000e+00> : vector<64x192xf32>
    %375 = tpu.matmul %372, %374, %cst_231 {dimension_numbers = #tpu.dot_dimension_numbers<[1], [0], [0], [1], [0, 0, 1, 1], [], []>} : vector<64x8xbf16>, vector<8x192xbf16>, vector<64x192xf32> -> vector<64x192xf32>
    %376 = arith.addf %369, %375 : vector<64x192xf32>
    %377 = vector.extract_strided_slice %344 {offsets = [5, 0], sizes = [64, 8], strides = [1, 1]} : vector<70x8xbf16> to vector<64x8xbf16>
    %378 = vector.broadcast %67 : vector<64x1xbf16> to vector<64x8xbf16>
    %379 = arith.mulf %377, %378 : vector<64x8xbf16>
    %c5_232 = arith.constant 5 : index
    %c0_233 = arith.constant 0 : index
    %c0_234 = arith.constant 0 : index
    %380 = vector.load %arg19[%c5_232, %c0_233, %c0_234] : memref<7x8x192xbf16, #tpu.memory_space<vmem>>, vector<1x8x192xbf16>
    %381 = vector.shape_cast %380 : vector<1x8x192xbf16> to vector<8x192xbf16>
    %cst_235 = arith.constant dense<0.000000e+00> : vector<64x192xf32>
    %382 = tpu.matmul %379, %381, %cst_235 {dimension_numbers = #tpu.dot_dimension_numbers<[1], [0], [0], [1], [0, 0, 1, 1], [], []>} : vector<64x8xbf16>, vector<8x192xbf16>, vector<64x192xf32> -> vector<64x192xf32>
    %383 = arith.addf %376, %382 : vector<64x192xf32>
    %384 = vector.extract_strided_slice %344 {offsets = [6, 0], sizes = [64, 8], strides = [1, 1]} : vector<70x8xbf16> to vector<64x8xbf16>
    %385 = vector.broadcast %80 : vector<64x1xbf16> to vector<64x8xbf16>
    %386 = arith.mulf %384, %385 : vector<64x8xbf16>
    %c6_236 = arith.constant 6 : index
    %c0_237 = arith.constant 0 : index
    %c0_238 = arith.constant 0 : index
    %387 = vector.load %arg19[%c6_236, %c0_237, %c0_238] : memref<7x8x192xbf16, #tpu.memory_space<vmem>>, vector<1x8x192xbf16>
    %388 = vector.shape_cast %387 : vector<1x8x192xbf16> to vector<8x192xbf16>
    %cst_239 = arith.constant dense<0.000000e+00> : vector<64x192xf32>
    %389 = tpu.matmul %386, %388, %cst_239 {dimension_numbers = #tpu.dot_dimension_numbers<[1], [0], [0], [1], [0, 0, 1, 1], [], []>} : vector<64x8xbf16>, vector<8x192xbf16>, vector<64x192xf32> -> vector<64x192xf32>
    %390 = arith.addf %383, %389 : vector<64x192xf32>
    %c0_240 = arith.constant 0 : index
    %c0_241 = arith.constant 0 : index
    %391 = vector.load %arg20[%c0_240, %c0_241] : memref<1x192xf32, #tpu.memory_space<vmem>>, vector<1x192xf32>
    %392 = vector.broadcast %391 : vector<1x192xf32> to vector<64x192xf32>
    %393 = arith.addf %390, %392 : vector<64x192xf32>
    %cst_242 = arith.constant 0.000000e+00 : f32
    %394 = vector.broadcast %cst_242 : f32 to vector<64x192xf32>
    %395 = arith.maximumf %393, %394 : vector<64x192xf32>
    %c0_243 = arith.constant 0 : index
    %c2_244 = arith.constant 2 : index
    %c0_245 = arith.constant 0 : index
    %c0_246 = arith.constant 0 : index
    %396 = vector.load %arg23[%c0_243, %c2_244, %c0_245, %c0_246] : memref<1x4x64x192xf32, #tpu.memory_space<vmem>>, vector<1x1x64x192xf32>
    %397 = vector.shape_cast %396 : vector<1x1x64x192xf32> to vector<64x192xf32>
    %398 = vector.shape_cast %395 : vector<64x192xf32> to vector<1x1x64x192xf32>
    tpu.vector_store %arg23[%c0_243, %c2_244, %c0_245, %c0_246], %398 {strides = array<i32>} : memref<1x4x64x192xf32, #tpu.memory_space<vmem>>, vector<1x1x64x192xf32>,
    %c0_247 = arith.constant 0 : index
    %c0_248 = arith.constant 0 : index
    %399 = vector.load %arg21[%c0_247, %c0_248] : memref<16x192xbf16, #tpu.memory_space<vmem>>, vector<16x192xbf16>
    %cst_249 = arith.constant dense<0.000000e+00> : vector<64x192xf32>
    %400 = tpu.matmul %1, %399, %cst_249 {dimension_numbers = #tpu.dot_dimension_numbers<[1], [0], [0], [1], [0, 0, 1, 1], [], []>} : vector<64x16xbf16>, vector<16x192xbf16>, vector<64x192xf32> -> vector<64x192xf32>
    %c-1_i32_250 = arith.constant -1 : i32
    %401 = vector.broadcast %c-1_i32_250 : i32 to vector<64x1xi32>
    %402 = arith.addi %2, %401 : vector<64x1xi32>
    %c0_i32_251 = arith.constant 0 : i32
    %403 = vector.broadcast %c0_i32_251 : i32 to vector<64x1xi32>
    %404 = arith.cmpi sge, %402, %403 : vector<64x1xi32>
    %c-1_i32_252 = arith.constant -1 : i32
    %405 = vector.broadcast %c-1_i32_252 : i32 to vector<64x1xi32>
    %406 = arith.addi %2, %405 : vector<64x1xi32>
    %c8_i32_253 = arith.constant 8 : i32
    %407 = vector.broadcast %c8_i32_253 : i32 to vector<64x1xi32>
    %408 = arith.cmpi slt, %406, %407 : vector<64x1xi32>
    %409 = arith.andi %404, %408 : vector<64x1xi1>
    %cst_254 = arith.constant 1.000000e+00 : f32
    %cst_255 = arith.constant 0.000000e+00 : f32
    %410 = vector.broadcast %cst_254 : f32 to vector<64x1xf32>
    %411 = vector.broadcast %cst_255 : f32 to vector<64x1xf32>
    %412 = arith.select %409, %410, %411 : vector<64x1xi1>, vector<64x1xf32>
    %c1_i32_256 = arith.constant 1 : i32
    %413 = vector.broadcast %c1_i32_256 : i32 to vector<64x1xi32>
    %414 = arith.addi %2, %413 : vector<64x1xi32>
    %c0_i32_257 = arith.constant 0 : i32
    %415 = vector.broadcast %c0_i32_257 : i32 to vector<64x1xi32>
    %416 = arith.cmpi sge, %414, %415 : vector<64x1xi32>
    %c1_i32_258 = arith.constant 1 : i32
    %417 = vector.broadcast %c1_i32_258 : i32 to vector<64x1xi32>
    %418 = arith.addi %2, %417 : vector<64x1xi32>
    %c8_i32_259 = arith.constant 8 : i32
    %419 = vector.broadcast %c8_i32_259 : i32 to vector<64x1xi32>
    %420 = arith.cmpi slt, %418, %419 : vector<64x1xi32>
    %421 = arith.andi %416, %420 : vector<64x1xi1>
    %cst_260 = arith.constant 1.000000e+00 : f32
    %cst_261 = arith.constant 0.000000e+00 : f32
    %422 = vector.broadcast %cst_260 : f32 to vector<64x1xf32>
    %423 = vector.broadcast %cst_261 : f32 to vector<64x1xf32>
    %424 = arith.select %421, %422, %423 : vector<64x1xi1>, vector<64x1xf32>
    %cst_262 = arith.constant 0.000000e+00 : f32
    %425 = vector.broadcast %cst_262 : f32 to vector<8x192xf32>
    %426 = tpu.concatenate %425, %400, %425 in 0 : vector<8x192xf32>, vector<64x192xf32>, vector<8x192xf32> -> vector<80x192xf32>
    %427 = vector.extract_strided_slice %426 {offsets = [0, 0], sizes = [64, 192], strides = [1, 1]} : vector<80x192xf32> to vector<64x192xf32>
    %428 = vector.extract_strided_slice %426 {offsets = [8, 0], sizes = [64, 192], strides = [1, 1]} : vector<80x192xf32> to vector<64x192xf32>
    %429 = arith.addf %427, %428 : vector<64x192xf32>
    %430 = vector.extract_strided_slice %426 {offsets = [16, 0], sizes = [64, 192], strides = [1, 1]} : vector<80x192xf32> to vector<64x192xf32>
    %431 = arith.addf %429, %430 : vector<64x192xf32>
    %cst_263 = arith.constant 0.000000e+00 : f32
    %432 = vector.broadcast %cst_263 : f32 to vector<1x192xf32>
    %433 = tpu.concatenate %432, %431, %432 in 0 : vector<1x192xf32>, vector<64x192xf32>, vector<1x192xf32> -> vector<66x192xf32>
    %434 = vector.extract_strided_slice %433 {offsets = [0, 0], sizes = [64, 192], strides = [1, 1]} : vector<66x192xf32> to vector<64x192xf32>
    %435 = vector.broadcast %412 : vector<64x1xf32> to vector<64x192xf32>
    %436 = arith.mulf %435, %434 : vector<64x192xf32>
    %437 = vector.extract_strided_slice %433 {offsets = [1, 0], sizes = [64, 192], strides = [1, 1]} : vector<66x192xf32> to vector<64x192xf32>
    %438 = arith.addf %436, %437 : vector<64x192xf32>
    %439 = vector.extract_strided_slice %433 {offsets = [2, 0], sizes = [64, 192], strides = [1, 1]} : vector<66x192xf32> to vector<64x192xf32>
    %440 = vector.broadcast %424 : vector<64x1xf32> to vector<64x192xf32>
    %441 = arith.mulf %440, %439 : vector<64x192xf32>
    %442 = arith.addf %438, %441 : vector<64x192xf32>
    %cst_264 = arith.constant 0.111111112 : f32
    %443 = vector.broadcast %cst_264 : f32 to vector<64x192xf32>
    %444 = arith.mulf %442, %443 : vector<64x192xf32>
    %c0_265 = arith.constant 0 : index
    %c0_266 = arith.constant 0 : index
    %445 = vector.load %arg22[%c0_265, %c0_266] : memref<1x192xf32, #tpu.memory_space<vmem>>, vector<1x192xf32>
    %446 = vector.broadcast %445 : vector<1x192xf32> to vector<64x192xf32>
    %447 = arith.addf %444, %446 : vector<64x192xf32>
    %cst_267 = arith.constant 0.000000e+00 : f32
    %448 = vector.broadcast %cst_267 : f32 to vector<64x192xf32>
    %449 = arith.maximumf %447, %448 : vector<64x192xf32>
    %c0_268 = arith.constant 0 : index
    %c3_269 = arith.constant 3 : index
    %c0_270 = arith.constant 0 : index
    %c0_271 = arith.constant 0 : index
    %450 = vector.load %arg23[%c0_268, %c3_269, %c0_270, %c0_271] : memref<1x4x64x192xf32, #tpu.memory_space<vmem>>, vector<1x1x64x192xf32>
    %451 = vector.shape_cast %450 : vector<1x1x64x192xf32> to vector<64x192xf32>
    %452 = vector.shape_cast %449 : vector<64x192xf32> to vector<1x1x64x192xf32>
    tpu.vector_store %arg23[%c0_268, %c3_269, %c0_270, %c0_271], %452 {strides = array<i32>} : memref<1x4x64x192xf32, #tpu.memory_space<vmem>>, vector<1x1x64x192xf32>,
    return
  }
  func.func @transform_0(%arg0: i32) -> (i32, i32, i32) {
    %c0_i32 = arith.constant 0 : i32
    %c0_i32_0 = arith.constant 0 : i32
    %c0_i32_1 = arith.constant 0 : i32
    return %arg0, %c0_i32, %c0_i32_0 : i32, i32, i32
  }
  func.func @transform_1(%arg0: i32) -> (i32, i32) {
    %c0_i32 = arith.constant 0 : i32
    %c0_i32_0 = arith.constant 0 : i32
    %c0_i32_1 = arith.constant 0 : i32
    return %c0_i32, %c0_i32_0 : i32, i32
  }
  func.func @transform_2(%arg0: i32) -> (i32, i32) {
    %c0_i32 = arith.constant 0 : i32
    %c0_i32_0 = arith.constant 0 : i32
    %c0_i32_1 = arith.constant 0 : i32
    return %c0_i32, %c0_i32_0 : i32, i32
  }
  func.func @transform_3(%arg0: i32) -> (i32, i32) {
    %c0_i32 = arith.constant 0 : i32
    %c0_i32_0 = arith.constant 0 : i32
    %c0_i32_1 = arith.constant 0 : i32
    return %c0_i32, %c0_i32_0 : i32, i32
  }
  func.func @transform_4(%arg0: i32) -> (i32, i32) {
    %c0_i32 = arith.constant 0 : i32
    %c0_i32_0 = arith.constant 0 : i32
    %c0_i32_1 = arith.constant 0 : i32
    return %c0_i32, %c0_i32_0 : i32, i32
  }
  func.func @transform_5(%arg0: i32) -> (i32, i32) {
    %c0_i32 = arith.constant 0 : i32
    %c0_i32_0 = arith.constant 0 : i32
    %c0_i32_1 = arith.constant 0 : i32
    return %c0_i32, %c0_i32_0 : i32, i32
  }
  func.func @transform_6(%arg0: i32) -> (i32, i32, i32) {
    %c0_i32 = arith.constant 0 : i32
    %c0_i32_0 = arith.constant 0 : i32
    %c0_i32_1 = arith.constant 0 : i32
    %c0_i32_2 = arith.constant 0 : i32
    return %c0_i32, %c0_i32_0, %c0_i32_1 : i32, i32, i32
  }
  func.func @transform_7(%arg0: i32) -> (i32, i32) {
    %c0_i32 = arith.constant 0 : i32
    %c0_i32_0 = arith.constant 0 : i32
    %c0_i32_1 = arith.constant 0 : i32
    return %c0_i32, %c0_i32_0 : i32, i32
  }
  func.func @transform_8(%arg0: i32) -> (i32, i32, i32) {
    %c0_i32 = arith.constant 0 : i32
    %c0_i32_0 = arith.constant 0 : i32
    %c0_i32_1 = arith.constant 0 : i32
    %c0_i32_2 = arith.constant 0 : i32
    return %c0_i32, %c0_i32_0, %c0_i32_1 : i32, i32, i32
  }
  func.func @transform_9(%arg0: i32) -> (i32, i32) {
    %c0_i32 = arith.constant 0 : i32
    %c0_i32_0 = arith.constant 0 : i32
    %c0_i32_1 = arith.constant 0 : i32
    return %c0_i32, %c0_i32_0 : i32, i32
  }
  func.func @transform_10(%arg0: i32) -> (i32, i32) {
    %c0_i32 = arith.constant 0 : i32
    %c0_i32_0 = arith.constant 0 : i32
    %c0_i32_1 = arith.constant 0 : i32
    return %c0_i32, %c0_i32_0 : i32, i32
  }
  func.func @transform_11(%arg0: i32) -> (i32, i32) {
    %c0_i32 = arith.constant 0 : i32
    %c0_i32_0 = arith.constant 0 : i32
    %c0_i32_1 = arith.constant 0 : i32
    return %c0_i32, %c0_i32_0 : i32, i32
  }
  func.func @transform_12(%arg0: i32) -> (i32, i32, i32) {
    %c0_i32 = arith.constant 0 : i32
    %c0_i32_0 = arith.constant 0 : i32
    %c0_i32_1 = arith.constant 0 : i32
    %c0_i32_2 = arith.constant 0 : i32
    return %c0_i32, %c0_i32_0, %c0_i32_1 : i32, i32, i32
  }
  func.func @transform_13(%arg0: i32) -> (i32, i32) {
    %c0_i32 = arith.constant 0 : i32
    %c0_i32_0 = arith.constant 0 : i32
    %c0_i32_1 = arith.constant 0 : i32
    return %c0_i32, %c0_i32_0 : i32, i32
  }
  func.func @transform_14(%arg0: i32) -> (i32, i32, i32) {
    %c0_i32 = arith.constant 0 : i32
    %c0_i32_0 = arith.constant 0 : i32
    %c0_i32_1 = arith.constant 0 : i32
    %c0_i32_2 = arith.constant 0 : i32
    return %c0_i32, %c0_i32_0, %c0_i32_1 : i32, i32, i32
  }
  func.func @transform_15(%arg0: i32) -> (i32, i32) {
    %c0_i32 = arith.constant 0 : i32
    %c0_i32_0 = arith.constant 0 : i32
    %c0_i32_1 = arith.constant 0 : i32
    return %c0_i32, %c0_i32_0 : i32, i32
  }
  func.func @transform_16(%arg0: i32) -> (i32, i32, i32) {
    %c0_i32 = arith.constant 0 : i32
    %c0_i32_0 = arith.constant 0 : i32
    %c0_i32_1 = arith.constant 0 : i32
    %c0_i32_2 = arith.constant 0 : i32
    return %c0_i32, %c0_i32_0, %c0_i32_1 : i32, i32, i32
  }
  func.func @transform_17(%arg0: i32) -> (i32, i32) {
    %c0_i32 = arith.constant 0 : i32
    %c0_i32_0 = arith.constant 0 : i32
    %c0_i32_1 = arith.constant 0 : i32
    return %c0_i32, %c0_i32_0 : i32, i32
  }
  func.func @transform_18(%arg0: i32) -> (i32, i32, i32) {
    %c0_i32 = arith.constant 0 : i32
    %c0_i32_0 = arith.constant 0 : i32
    %c0_i32_1 = arith.constant 0 : i32
    %c0_i32_2 = arith.constant 0 : i32
    return %c0_i32, %c0_i32_0, %c0_i32_1 : i32, i32, i32
  }
  func.func @transform_19(%arg0: i32) -> (i32, i32) {
    %c0_i32 = arith.constant 0 : i32
    %c0_i32_0 = arith.constant 0 : i32
    %c0_i32_1 = arith.constant 0 : i32
    return %c0_i32, %c0_i32_0 : i32, i32
  }
  func.func @transform_20(%arg0: i32) -> (i32, i32) {
    %c0_i32 = arith.constant 0 : i32
    %c0_i32_0 = arith.constant 0 : i32
    %c0_i32_1 = arith.constant 0 : i32
    return %c0_i32, %c0_i32_0 : i32, i32
  }
  func.func @transform_21(%arg0: i32) -> (i32, i32) {
    %c0_i32 = arith.constant 0 : i32
    %c0_i32_0 = arith.constant 0 : i32
    %c0_i32_1 = arith.constant 0 : i32
    return %c0_i32, %c0_i32_0 : i32, i32
  }
  func.func @transform_22(%arg0: i32) -> (i32, i32, i32, i32) {
    %c0_i32 = arith.constant 0 : i32
    %c0_i32_0 = arith.constant 0 : i32
    %c0_i32_1 = arith.constant 0 : i32
    %c0_i32_2 = arith.constant 0 : i32
    return %arg0, %c0_i32, %c0_i32_0, %c0_i32_1 : i32, i32, i32, i32
  }
}

</mosaic_0001>

<bundles_post_ra>
// kernel: inception_c_forward.1
= control target key start
LH: loop header
LB: loop body
LE: loop exit
PB: predicated region body
PF: predicated region fallthrough
CT: control target
= control target key end

     0   :  { %s10243_s0 = inlined_call_operand.vmem [shape: bf16[2,64,16], index: 0, kind: input, shape index: {}]   ;;  %s10244_s1 = inlined_call_operand.vmem [shape: s32[64,1], index: 1, kind: input, shape index: {}]   ;;  %s10245_s2 = inlined_call_operand.vmem [shape: bf16[16,192], index: 2, kind: input, shape index: {}]   ;;  %s10246_s3 = inlined_call_operand.vmem [shape: f32[1,192], index: 3, kind: input, shape index: {}]   ;;  %s10247_s4 = inlined_call_operand.vmem [shape: bf16[16,8], index: 4, kind: input, shape index: {}]   ;;  %s10248_s5 = inlined_call_operand.vmem [shape: f32[1,8], index: 5, kind: input, shape index: {}]   ;;  %s10249_s6 = inlined_call_operand.vmem [shape: bf16[7,8,8], index: 6, kind: input, shape index: {}]   ;;  %s10250_s7 = inlined_call_operand.vmem [shape: f32[1,8], index: 7, kind: input, shape index: {}]   ;;  %s10251_s8 = inlined_call_operand.vmem [shape: bf16[7,8,192], index: 8, kind: input, shape index: {}]   ;;  %s10252_s9 = inlined_call_operand.vmem [shape: f32[1,192], index: 9, kind: input, shape index: {}]   ;;  %s10253_s10 = inlined_call_operand.vmem [shape: bf16[16,8], index: 10, kind: input, shape index: {}]   ;;  %s10254_s11 = inlined_call_operand.vmem [shape: f32[1,8], index: 11, kind: input, shape index: {}]   ;;  %s10255_s12 = inlined_call_operand.vmem [shape: bf16[7,8,8], index: 12, kind: input, shape index: {}]   ;;  %s10256_s13 = inlined_call_operand.vmem [shape: f32[1,8], index: 13, kind: input, shape index: {}]   ;;  %s10257_s14 = inlined_call_operand.vmem [shape: bf16[7,8,8], index: 14, kind: input, shape index: {}]   ;;  %s10258_s15 = inlined_call_operand.vmem [shape: f32[1,8], index: 15, kind: input, shape index: {}]   ;;  %s10259_s16 = inlined_call_operand.vmem [shape: bf16[7,8,8], index: 16, kind: input, shape index: {}]   ;;  %s10260_s17 = inlined_call_operand.vmem [shape: f32[1,8], index: 17, kind: input, shape index: {}]   ;;  %s10261_s18 = inlined_call_operand.vmem [shape: bf16[7,8,192], index: 18, kind: input, shape index: {}]   ;;  %s10262_s19 = inlined_call_operand.vmem [shape: f32[1,192], index: 19, kind: input, shape index: {}]   ;;  %s10263_s20 = inlined_call_operand.vmem [shape: bf16[16,192], index: 20, kind: input, shape index: {}]   ;;  %s10264_s21 = inlined_call_operand.vmem [shape: f32[1,192], index: 21, kind: input, shape index: {}]   ;;  %s10265_s22 = inlined_call_operand.vmem [shape: f32[2,4,64,192], index: 22, kind: output, shape index: {}]  }
   0x1   :  { %10344 = sst [smem:[#allocation48_spill]] %s10243_s0 }
   0x2   :  { %10345 = sst [smem:[#allocation49_spill]] %s10244_s1 }
   0x3   :  { %10346 = sst [smem:[#allocation50_spill]] %s10245_s2 }
   0x4   :  { %10347 = sst [smem:[#allocation51_spill]] %s10246_s3  ;;  %s8001_s3 = smov 0  }
   0x5   :  { %10348 = sst [smem:[#allocation52_spill]] %s10247_s4 }
   0x6   :  { %10349 = sst [smem:[#allocation53_spill]] %s10248_s5 }
   0x7   :  { %10350 = sst [smem:[#allocation54_spill]] %s10249_s6 }
   0x8 LB: > { %s6965_s28 = sadd.s32 4294967295, %s7882_s3   ;;  %p6969_p0 = scmp.ge.s32.totalorder %s7882_s3, 1  ;;  %s7882_s3 = sphi %s8001_s3, %s32_s3  }
   0x9   : > { %p612_p1 = scmp.lt.s32.totalorder %s7882_s3, 3 }
   0xb   : > { %p613_p2 = pnand %p6969_p0, %p612_p1 }
   0xd   : > { %616 = sbr.rel (%p613_p2) target bundleno = 2003 (0x7d3), region = 108 }
  0x12   : > { %s10351_s4 = sld [smem:[#allocation52_spill]]  ;;  %p674_p3 = scmp.lt.s32.totalorder %s6965_s28, 1  ;;  %vm10269_vm0 = vcmask 130048   ;;  %v10270_v4 = vmov 0   ;;  %v7885_v21 = vmov 0.0  }
  0x13   : > { %s10352_s1 = sld [smem:[#allocation49_spill]]  ;;  %7786 = vset.pattern.permute.xlu0 %v10270_v4  ;;  %7787 = vset.pattern.permute.xlu1 %v10270_v4 }
  0x14   : > { %s10535_s28 = smov (!%p674_p3, %s6965_s28), 1  ;;  %1054 = vmatprep.mubr.bf16.mxu0 %v10270_v4  ;;  %s10353_s24 = sld [smem:[#allocation48_spill]] }
  0x15   : > { %s7296_s30 = sshll.u32 %s10535_s28, 5  ;;  %s10363_s25 = sld [smem:[#allocation54_spill]] }
  0x16   : > { %s10389_s23 = sld [smem:[#allocation51_spill]]  ;;  %s7297_s26 = sshll.u32 %s10535_s28, 9 }
  0x17   : > { %s8588_s27 = scalar_lea.vmem %s10265_s22, %s7297_s26 }
  0x18   : > { %v7828_v0 = vld [vmem:[%s10351_s4] sm:$0xff]   ;;  %s10358_s4 = sld [smem:[#allocation50_spill]] }
  0x19   : > { %v8015_v1 = vld [vmem:[%s10352_s1] sm:$0xff]  ;;  %v8020_v2 = vld [vmem:[%s10352_s1 + $0x8] sm:$0xff]  ;;  %v8025_v3 = vld [vmem:[%s10352_s1 + $0x10] sm:$0xff]  ;;  %7448 = vmatprep.subr.bf16.mxu1 %v7828_v0 }
  0x1a   : > { %v745_v5 = vadd.s32 4294967294, %v8015_v1  ;;  %v746_v6 = vadd.s32 4294967294, %v8020_v2  ;;  %v8035_v7 = vld [vmem:[%s10352_s1 + $0x18] sm:$0xff]  ;;  %v747_v8 = vadd.s32 4294967294, %v8025_v3  ;;  %v8041_v9 = vld [vmem:[%s10352_s1 + $0x20] sm:$0xff]  ;;  %7449 = vmatpush3.bf16.msra.mxu1 %v7828_v0  ;;  %v789_v12 = vadd.s32 4294967295, %v8015_v1  ;;  %s8058_s6 = scalar_lea.vmem %s10353_s24, %s7296_s30 }
  0x1b   : > { %v748_v10 = vadd.s32 4294967294, %v8035_v7  ;;  %v749_v11 = vadd.s32 4294967294, %v8041_v9  ;;  %v8051_v13 = vld [vmem:[%s10352_s1 + $0x28] sm:$0xff]  ;;  %v790_v14 = vadd.s32 4294967295, %v8020_v2  ;;  %v8061_v15 = vld [vmem:[%s8058_s6] sm:$0xff]   ;;  %v8066_v16 = vld [vmem:[%s10352_s1 + $0x30] sm:$0xff] }
  0x1c   : > { %vm753_vm1 = vcmp.ge.s32.totalorder %v745_v5, 0  ;;  %vm754_vm2 = vcmp.ge.s32.totalorder %v746_v6, 0  ;;  %vm761_vm3 = vcmp.lt.s32.totalorder %v745_v5, 8  ;;  %vm762_vm4 = vcmp.lt.s32.totalorder %v746_v6, 8  ;;  %v8069_v17 = vld [vmem:[%s8058_s6 + $0x8] sm:$0xff]   ;;  %v8075_v19 = vld [vmem:[%s10352_s1 + $0x38] sm:$0xff]  ;;  %7450 = vmatprep.mubr.msk.bf16.mxu1 %vm10269_vm0, %v8061_v15 }
  0x1d   : > { %vm769_vm5 = vmand %vm753_vm1, %vm761_vm3  ;;  %vm755_vm6 = vcmp.ge.s32.totalorder %v747_v8, 0  ;;  %vm763_vm8 = vcmp.lt.s32.totalorder %v747_v8, 8  ;;  %vm764_vm9 = vcmp.lt.s32.totalorder %v748_v10, 8  ;;  %v750_v18 = vadd.s32 4294967294, %v8051_v13  ;;  %v8080_v20 = vld [vmem:[%s8058_s6 + $0x10] sm:$0xff]   ;;  %7451 = vmatmul.mubr.msk.bf16.vlgmr.msra.gmra.mxu1 %vm10269_vm0, %v8069_v17  ;;  %v8099_v29 = vld [vmem:[%s8058_s6 + $0x18] sm:$0xff]  }
  0x1e   : > { %v777_v22 = vsel %vm769_vm5, 1.0, %v7885_v21  ;;  %vm757_vm10 = vcmp.ge.s32.totalorder %v749_v11, 0  ;;  %7454 = vmatprep.mubr.msk.bf16.mxu1 %vm10269_vm0, %v8080_v20  ;;  %vm770_vm12 = vmand %vm754_vm2, %vm762_vm4  ;;  %vm765_vm13 = vcmp.lt.s32.totalorder %v749_v11, 8  ;;  %vm797_vm15 = vcmp.ge.s32.totalorder %v789_v12, 0  ;;  %s10369_s24 = sld [smem:[#allocation53_spill]] }
  0x1f   : > { %vm766_vm14 = vcmp.lt.s32.totalorder %v750_v18, 8  ;;  %vm798_vm1 = vcmp.ge.s32.totalorder %v790_v14, 0  ;;  %v778_v23 = vsel %vm770_vm12, 1.0, %v7885_v21  ;;  %vm771_vm3 = vmand %vm755_vm6, %vm763_vm8  ;;  %vm805_vm5 = vcmp.lt.s32.totalorder %v789_v12, 8 }
  0x20   : > { %vm806_vm7 = vcmp.lt.s32.totalorder %v790_v14, 8  ;;  %v751_v24 = vadd.s32 4294967294, %v8066_v16  ;;  %v785_v25 = vpack.c.bf16 %v778_v23, %v777_v22  ;;  %vm10354_vm0 = vcmp.ge.s32.totalorder %v748_v10, 0  ;;  %vm773_vm2 = vmand %vm757_vm10, %vm765_vm13 }
  0x21   : > { %vm772_vm11 = vmand %vm10354_vm0, %vm764_vm9  ;;  %v779_v26 = vsel %vm771_vm3, 1.0, %v7885_v21  ;;  %v752_v27 = vadd.s32 4294967294, %v8075_v19  ;;  %v793_v28 = vadd.s32 4294967295, %v8041_v9  ;;  %v794_v31 = vadd.s32 4294967295, %v8051_v13 }
  0x22   : > { %v780_v30 = vsel %vm772_vm11, 1.0, %v7885_v21  ;;  %vm767_vm6 = vcmp.lt.s32.totalorder %v751_v24, 8  ;;  %1292 = vperm.xlu0 %7786, %v785_v25   ;;  %vm10355_vm0 = vcmp.ge.s32.totalorder %v750_v18, 0  ;;  %v781_v33 = vsel %vm773_vm2, 1.0, %v7885_v21  ;;  %vm813_vm11 = vmand %vm797_vm15, %vm805_vm5 }
  0x23   : > { %v786_v32 = vpack.c.bf16 %v780_v30, %v779_v26  ;;  %vm774_vm8 = vmand %vm10355_vm0, %vm766_vm14  ;;  %vm760_vm9 = vcmp.ge.s32.totalorder %v752_v27, 0  ;;  %vm768_vm12 = vcmp.lt.s32.totalorder %v752_v27, 8  ;;  %vm801_vm3 = vcmp.ge.s32.totalorder %v793_v28, 0 }
  0x24   : > { %v782_v34 = vsel %vm774_vm8, 1.0, %v7885_v21  ;;  %vm802_vm10 = vcmp.ge.s32.totalorder %v794_v31, 0  ;;  %vm809_vm13 = vcmp.lt.s32.totalorder %v793_v28, 8  ;;  %vm814_vm4 = vmand %vm798_vm1, %vm806_vm7  ;;  %v8114_v36 = vsel %vm813_vm11, 1.0, %v7885_v21 }
  0x25   : > { %v787_v35 = vpack.c.bf16 %v782_v34, %v781_v33  ;;  %vm810_vm14 = vcmp.lt.s32.totalorder %v794_v31, 8  ;;  %v791_v37 = vadd.s32 4294967295, %v8025_v3  ;;  %vm10356_vm2 = vcmask 130048   ;;  %vm776_vm7 = vmand %vm760_vm9, %vm768_vm12 }
  0x26   : > { %7455 = vmatmul.mubr.msk.bf16.gmra.mxu1 %vm10356_vm2, %v8099_v29  ;;  %v8120_v38 = vsel %vm814_vm4, 1.0, %v7885_v21  ;;  %vm10357_vm15 = vcmp.ge.s32.totalorder %v751_v24, 0  ;;  %v792_v39 = vadd.s32 4294967295, %v8035_v7  ;;  %v703_v40 = vadd.s32 4294967293, %v8025_v3  ;;  %1296 = vperm.xlu0 %7786, %v786_v32   ;;  %vm818_vm2 = vmand %vm802_vm10, %vm810_vm14 }
  0x27   : > { %vm775_vm5 = vmand %vm10357_vm15, %vm767_vm6  ;;  %v704_v41 = vadd.s32 4294967293, %v8035_v7  ;;  %1300 = vperm.xlu1 %7787, %v787_v35   ;;  %v829_v42 = vpack.c.bf16 %v8120_v38, %v8114_v36  ;;  %vm799_vm1 = vcmp.ge.s32.totalorder %v791_v37, 0  ;;  %vm807_vm4 = vcmp.lt.s32.totalorder %v791_v37, 8 }
  0x28   : > { %v783_v43 = vsel %vm775_vm5, 1.0, %v7885_v21  ;;  %v784_v44 = vsel %vm776_vm7, 1.0, %v7885_v21  ;;  %vm817_vm6 = vmand %vm801_vm3, %vm809_vm13  ;;  %vm800_vm0 = vcmp.ge.s32.totalorder %v792_v39, 0  ;;  %vm808_vm8 = vcmp.lt.s32.totalorder %v792_v39, 8 }
  0x29   : > { %vm711_vm11 = vcmp.ge.s32.totalorder %v703_v40, 0  ;;  %v788_v45 = vpack.c.bf16 %v784_v44, %v783_v43  ;;  %v8138_v46 = vsel %vm817_vm6, 1.0, %v7885_v21  ;;  %vm712_vm9 = vcmp.ge.s32.totalorder %v704_v41, 0  ;;  %vm815_vm15 = vmand %vm799_vm1, %vm807_vm4 }
  0x2a   : > { %vm719_vm12 = vcmp.lt.s32.totalorder %v703_v40, 8  ;;  %v8141_v47 = vsel %vm818_vm2, 1.0, %v7885_v21  ;;  %vm720_vm5 = vcmp.lt.s32.totalorder %v704_v41, 8  ;;  %v701_v48 = vadd.s32 4294967293, %v8015_v1  ;;  %1547 = vperm.xlu0 %7786, %v829_v42   ;;  %vm816_vm3 = vmand %vm800_vm0, %vm808_vm8 }
  0x2b   : > { %v702_v49 = vadd.s32 4294967293, %v8020_v2  ;;  %1304 = vperm.xlu1 %7787, %v788_v45   ;;  %v831_v50 = vpack.c.bf16 %v8141_v47, %v8138_v46  ;;  %v8150_v51 = vsel %vm815_vm15, 1.0, %v7885_v21  ;;  %v705_v52 = vadd.s32 4294967293, %v8041_v9  ;;  %vm727_vm10 = vmand %vm711_vm11, %vm719_vm12 }
  0x2c   : > { %v706_v53 = vadd.s32 4294967293, %v8051_v13  ;;  %v8155_v54 = vsel %vm816_vm3, 1.0, %v7885_v21  ;;  %vm709_vm13 = vcmp.ge.s32.totalorder %v701_v48, 0  ;;  %vm717_vm7 = vcmp.lt.s32.totalorder %v701_v48, 8  ;;  %vm728_vm1 = vmand %vm712_vm9, %vm720_vm5 }
  0x2d   : > { %vm710_vm14 = vcmp.ge.s32.totalorder %v702_v49, 0  ;;  %v830_v55 = vpack.c.bf16 %v8155_v54, %v8150_v51  ;;  %v735_v56 = vsel %vm727_vm10, 1.0, %v7885_v21  ;;  %vm718_vm4 = vcmp.lt.s32.totalorder %v702_v49, 8  ;;  %vm725_vm0 = vmand %vm709_vm13, %vm717_vm7 }
  0x2e   : > { %vm713_vm6 = vcmp.ge.s32.totalorder %v705_v52, 0  ;;  %v736_v57 = vsel %vm728_vm1, 1.0, %v7885_v21  ;;  %vm714_vm8 = vcmp.ge.s32.totalorder %v706_v53, 0  ;;  %vm721_vm2 = vcmp.lt.s32.totalorder %v705_v52, 8  ;;  %1555 = vperm.xlu0 %7786, %v831_v50   ;;  %vm726_vm11 = vmand %vm710_vm14, %vm718_vm4 }
  0x2f   : > { %vm722_vm15 = vcmp.lt.s32.totalorder %v706_v53, 8  ;;  %1551 = vperm.xlu1 %7787, %v830_v55   ;;  %v742_v58 = vpack.c.bf16 %v736_v57, %v735_v56  ;;  %v733_v59 = vsel %vm725_vm0, 1.0, %v7885_v21  ;;  %v795_v60 = vadd.s32 4294967295, %v8066_v16  ;;  %vm729_vm9 = vmand %vm713_vm6, %vm721_vm2 }
  0x30   : > { %v796_v61 = vadd.s32 4294967295, %v8075_v19  ;;  %v734_v62 = vsel %vm726_vm11, 1.0, %v7885_v21  ;;  %v833_v63 = vadd.s32 1, %v8015_v1  ;;  %v834_v0 = vadd.s32 1, %v8020_v2  ;;  %vm730_vm12 = vmand %vm714_vm8, %vm722_vm15 }
  0x31   : > { %v707_v5 = vadd.s32 4294967293, %v8066_v16  ;;  %v741_v6 = vpack.c.bf16 %v734_v62, %v733_v59  ;;  %v737_v8 = vsel %vm729_vm9, 1.0, %v7885_v21  ;;  %vm803_vm5 = vcmp.ge.s32.totalorder %v795_v60, 0  ;;  %v7833_v62 = vld [vmem:[%s10358_s4 + $0x4] ss:$8 sps:$4 sm:$0xff]  }
  0x32   : > { %vm804_vm3 = vcmp.ge.s32.totalorder %v796_v61, 0  ;;  %v738_v10 = vsel %vm730_vm12, 1.0, %v7885_v21  ;;  %vm811_vm10 = vcmp.lt.s32.totalorder %v795_v60, 8  ;;  %vm812_vm13 = vcmp.lt.s32.totalorder %v796_v61, 8  ;;  %1272 = vperm.xlu0 %7786, %v742_v58   ;;  %1036 = vmatprep.subr.bf16.mxu0 %v7833_v62 }
  0x33   : > { %vm841_vm14 = vcmp.ge.s32.totalorder %v833_v63, 0  ;;  %1267 = vperm.xlu1 %7787, %v741_v6   ;;  %v743_v11 = vpack.c.bf16 %v738_v10, %v737_v8  ;;  %vm819_vm7 = vmand %vm803_vm5, %vm811_vm10  ;;  %vm842_vm1 = vcmp.ge.s32.totalorder %v834_v0, 0  ;;  %vm849_vm4 = vcmp.lt.s32.totalorder %v833_v63, 8 }
  0x34   : > { %vm850_vm6 = vcmp.lt.s32.totalorder %v834_v0, 8  ;;  %vm820_vm0 = vmand %vm804_vm3, %vm812_vm13  ;;  %v8176_v12 = vsel %vm819_vm7, 1.0, %v7885_v21  ;;  %v708_v14 = vadd.s32 4294967293, %v8075_v19  ;;  %vm715_vm8 = vcmp.ge.s32.totalorder %v707_v5, 0 }
  0x35   : > { %vm723_vm2 = vcmp.lt.s32.totalorder %v707_v5, 8  ;;  %v8180_v18 = vsel %vm820_vm0, 1.0, %v7885_v21  ;;  %vm857_vm15 = vmand %vm841_vm14, %vm849_vm4  ;;  %v837_v22 = vadd.s32 1, %v8041_v9  ;;  %v838_v23 = vadd.s32 1, %v8051_v13 }
  0x36   : > { %v835_v24 = vadd.s32 1, %v8025_v3  ;;  %v832_v25 = vpack.c.bf16 %v8180_v18, %v8176_v12  ;;  %vm858_vm11 = vmand %vm842_vm1, %vm850_vm6  ;;  %v8188_v26 = vsel %vm857_vm15, 1.0, %v7885_v21  ;;  %vm716_vm9 = vcmp.ge.s32.totalorder %v708_v14, 0  ;;  %1277 = vperm.xlu0 %7786, %v743_v11  }
  0x37   : > { %vm724_vm12 = vcmp.lt.s32.totalorder %v708_v14, 8  ;;  %v8191_v27 = vsel %vm858_vm11, 1.0, %v7885_v21  ;;  %vm731_vm5 = vmand %vm715_vm8, %vm723_vm2  ;;  %vm845_vm3 = vcmp.ge.s32.totalorder %v837_v22, 0  ;;  %vm846_vm10 = vcmp.ge.s32.totalorder %v838_v23, 0 }
  0x38   : > { %vm853_vm13 = vcmp.lt.s32.totalorder %v837_v22, 8  ;;  %1559 = vperm.xlu1 %7787, %v832_v25   ;;  %v873_v28 = vpack.c.bf16 %v8191_v27, %v8188_v26  ;;  %vm732_vm14 = vmand %vm716_vm9, %vm724_vm12  ;;  %v739_v30 = vsel %vm731_vm5, 1.0, %v7885_v21  ;;  %vm854_vm7 = vcmp.lt.s32.totalorder %v838_v23, 8 }
  0x39   : > { %v836_v31 = vadd.s32 1, %v8035_v7  ;;  %v740_v32 = vsel %vm732_vm14, 1.0, %v7885_v21  ;;  %vm861_vm1 = vmand %vm845_vm3, %vm853_vm13  ;;  %vm843_vm4 = vcmp.ge.s32.totalorder %v835_v24, 0  ;;  %vm851_vm6 = vcmp.lt.s32.totalorder %v835_v24, 8 }
  0x3a   : > { %v879_v33 = vadd.s32 2, %v8025_v3  ;;  %v744_v34 = vpack.c.bf16 %v740_v32, %v739_v30  ;;  %vm862_vm0 = vmand %vm846_vm10, %vm854_vm7  ;;  %v8200_v35 = vsel %vm861_vm1, 1.0, %v7885_v21  ;;  %1825 = vperm.xlu0 %7786, %v873_v28   ;;  %v880_v39 = vadd.s32 2, %v8035_v7 }
  0x3b   : > { %vm844_vm8 = vcmp.ge.s32.totalorder %v836_v31, 0  ;;  %vm852_vm2 = vcmp.lt.s32.totalorder %v836_v31, 8  ;;  %v8203_v37 = vsel %vm862_vm0, 1.0, %v7885_v21  ;;  %vm859_vm15 = vmand %vm843_vm4, %vm851_vm6  ;;  %v877_v42 = vadd.s32 2, %v8015_v1 }
  0x3c   : > { %vm887_vm11 = vcmp.ge.s32.totalorder %v879_v33, 0  ;;  %vm895_vm9 = vcmp.lt.s32.totalorder %v879_v33, 8  ;;  %1282 = vperm.xlu1 %7787, %v744_v34   ;;  %v875_v40 = vpack.c.bf16 %v8203_v37, %v8200_v35  ;;  %vm860_vm12 = vmand %vm844_vm8, %vm852_vm2  ;;  %v8209_v41 = vsel %vm859_vm15, 1.0, %v7885_v21 }
  0x3d   : > { %v878_v43 = vadd.s32 2, %v8020_v2  ;;  %v8214_v44 = vsel %vm860_vm12, 1.0, %v7885_v21  ;;  %vm888_vm5 = vcmp.ge.s32.totalorder %v880_v39, 0  ;;  %vm896_vm3 = vcmp.lt.s32.totalorder %v880_v39, 8  ;;  %vm903_vm10 = vmand %vm887_vm11, %vm895_vm9 }
  0x3e   : > { %v839_v45 = vadd.s32 1, %v8066_v16  ;;  %v874_v48 = vpack.c.bf16 %v8214_v44, %v8209_v41  ;;  %vm904_vm13 = vmand %vm888_vm5, %vm896_vm3  ;;  %v911_v49 = vsel %vm903_vm10, 1.0, %v7885_v21  ;;  %vm885_vm14 = vcmp.ge.s32.totalorder %v877_v42, 0  ;;  %1833 = vperm.xlu0 %7786, %v875_v40  }
  0x3f   : > { %vm886_vm7 = vcmp.ge.s32.totalorder %v878_v43, 0  ;;  %v912_v50 = vsel %vm904_vm13, 1.0, %v7885_v21  ;;  %vm893_vm1 = vcmp.lt.s32.totalorder %v877_v42, 8  ;;  %vm894_vm4 = vcmp.lt.s32.totalorder %v878_v43, 8 }
  0x40   : > { %v840_v52 = vadd.s32 1, %v8075_v19  ;;  %1829 = vperm.xlu1 %7787, %v874_v48   ;;  %v918_v53 = vpack.c.bf16 %v912_v50, %v911_v49  ;;  %vm901_vm6 = vmand %vm885_vm14, %vm893_vm1  ;;  %vm847_vm0 = vcmp.ge.s32.totalorder %v839_v45, 0  ;;  %vm855_vm8 = vcmp.lt.s32.totalorder %v839_v45, 8 }
  0x41   : > { %v881_v55 = vadd.s32 2, %v8041_v9  ;;  %vm902_vm2 = vmand %vm886_vm7, %vm894_vm4  ;;  %v909_v56 = vsel %vm901_vm6, 1.0, %v7885_v21  ;;  %v882_v57 = vadd.s32 2, %v8051_v13  ;;  %v923_v59 = vadd.s32 3, %v8025_v3  ;;  %v7835_v3 = vld [vmem:[%s10358_s4] ss:$8 sps:$4 sm:$0xff]  }
  0x42   : > { %vm848_vm15 = vcmp.ge.s32.totalorder %v840_v52, 0  ;;  %vm856_vm11 = vcmp.lt.s32.totalorder %v840_v52, 8  ;;  %v910_v58 = vsel %vm902_vm2, 1.0, %v7885_v21  ;;  %vm863_vm9 = vmand %vm847_vm0, %vm855_vm8  ;;  %1971 = vperm.xlu0 %7786, %v918_v53   ;;  %v924_v0 = vadd.s32 3, %v8035_v7  ;;  %1037 = vmatpush1.bf16.msra.mxu0 %v7835_v3 }
  0x43   : > { %vm889_vm12 = vcmp.ge.s32.totalorder %v881_v55, 0  ;;  %vm897_vm5 = vcmp.lt.s32.totalorder %v881_v55, 8  ;;  %v917_v60 = vpack.c.bf16 %v910_v58, %v909_v56  ;;  %vm864_vm3 = vmand %vm848_vm15, %vm856_vm11  ;;  %v8228_v61 = vsel %vm863_vm9, 1.0, %v7885_v21 }
  0x44   : > { %vm890_vm10 = vcmp.ge.s32.totalorder %v882_v57, 0  ;;  %vm898_vm13 = vcmp.lt.s32.totalorder %v882_v57, 8  ;;  %v8234_v63 = vsel %vm864_vm3, 1.0, %v7885_v21  ;;  %vm905_vm14 = vmand %vm889_vm12, %vm897_vm5  ;;  %vm931_vm7 = vcmp.ge.s32.totalorder %v923_v59, 0 }
  0x45   : > { %vm939_vm1 = vcmp.lt.s32.totalorder %v923_v59, 8  ;;  %1967 = vperm.xlu1 %7787, %v917_v60   ;;  %v876_v5 = vpack.c.bf16 %v8234_v63, %v8228_v61  ;;  %vm906_vm4 = vmand %vm890_vm10, %vm898_vm13  ;;  %v913_v6 = vsel %vm905_vm14, 1.0, %v7885_v21  ;;  %v921_v8 = vadd.s32 3, %v8015_v1 }
  0x46   : > { %v922_v10 = vadd.s32 3, %v8020_v2  ;;  %v914_v7 = vsel %vm906_vm4, 1.0, %v7885_v21  ;;  %vm932_vm6 = vcmp.ge.s32.totalorder %v924_v0, 0  ;;  %vm940_vm0 = vcmp.lt.s32.totalorder %v924_v0, 8  ;;  %vm947_vm8 = vmand %vm931_vm7, %vm939_vm1 }
  0x47   : > { %v883_v11 = vadd.s32 2, %v8066_v16  ;;  %1837 = vperm.xlu0 %7786, %v876_v5   ;;  %v919_v14 = vpack.c.bf16 %v914_v7, %v913_v6  ;;  %vm948_vm2 = vmand %vm932_vm6, %vm940_vm0  ;;  %v955_v22 = vsel %vm947_vm8, 1.0, %v7885_v21  ;;  %vm929_vm15 = vcmp.ge.s32.totalorder %v921_v8, 0 }
  0x48   : > { %vm930_vm11 = vcmp.ge.s32.totalorder %v922_v10, 0  ;;  %v956_v1 = vsel %vm948_vm2, 1.0, %v7885_v21  ;;  %vm937_vm9 = vcmp.lt.s32.totalorder %v921_v8, 8  ;;  %vm938_vm12 = vcmp.lt.s32.totalorder %v922_v10, 8 }
  0x49   : > { %v884_v2 = vadd.s32 2, %v8075_v19  ;;  %1975 = vperm.xlu1 %7787, %v919_v14   ;;  %v962_v23 = vpack.c.bf16 %v956_v1, %v955_v22  ;;  %vm945_vm5 = vmand %vm929_vm15, %vm937_vm9  ;;  %vm891_vm3 = vcmp.ge.s32.totalorder %v883_v11, 0  ;;  %vm899_vm10 = vcmp.lt.s32.totalorder %v883_v11, 8  ;;  %v8328_v11 = vld [vmem:[%s10369_s24] ss:$0 sm:$0xff] }
  0x4a   : > { %v925_v24 = vadd.s32 3, %v8041_v9  ;;  %vm10359_vm13 = vcmask 130048   ;;  %vm946_vm14 = vmand %vm930_vm11, %vm938_vm12  ;;  %v953_v25 = vsel %vm945_vm5, 1.0, %v7885_v21  ;;  %v926_v28 = vadd.s32 3, %v8051_v13 }
  0x4b   : > { %6980 = vmatmul.mubr.msk.bf16.vlgmr.msra.gmra.mxu0 %vm10359_vm13, %v8061_v15  ;;  %vm892_vm7 = vcmp.ge.s32.totalorder %v884_v2, 0  ;;  %vm900_vm1 = vcmp.lt.s32.totalorder %v884_v2, 8  ;;  %2164 = vperm.xlu0 %7786, %v962_v23   ;;  %v954_v30 = vsel %vm946_vm14, 1.0, %v7885_v21  ;;  %vm907_vm4 = vmand %vm891_vm3, %vm899_vm10  ;;  %v927_v32 = vadd.s32 3, %v8066_v16  ;;  %v8335_v2 = vld [vmem:[%s10363_s25 + $0x14] sm:$0xf] }
  0x4c   : > { %1064 = vmatprep.mubr.bf16.mxu0 %v10270_v4  ;;  %vm933_vm6 = vcmp.ge.s32.totalorder %v925_v24, 0  ;;  %vm941_vm0 = vcmp.lt.s32.totalorder %v925_v24, 8  ;;  %v961_v31 = vpack.c.bf16 %v954_v30, %v953_v25  ;;  %vm908_vm8 = vmand %vm892_vm7, %vm900_vm1  ;;  %v915_v9 = vsel %vm907_vm4, 1.0, %v7885_v21 }
  0x4d   : > { %vm934_vm2 = vcmp.ge.s32.totalorder %v926_v28, 0  ;;  %vm942_vm15 = vcmp.lt.s32.totalorder %v926_v28, 8  ;;  %v916_v15 = vsel %vm908_vm8, 1.0, %v7885_v21  ;;  %vm949_vm11 = vmand %vm933_vm6, %vm941_vm0  ;;  %v928_v13 = vadd.s32 3, %v8075_v19 }
  0x4e   : > { %2160 = vperm.xlu1 %7787, %v961_v31   ;;  %v920_v33 = vpack.c.bf16 %v916_v15, %v915_v9  ;;  %vm950_vm9 = vmand %vm934_vm2, %vm942_vm15  ;;  %v957_v34 = vsel %vm949_vm11, 1.0, %v7885_v21  ;;  %vm935_vm12 = vcmp.ge.s32.totalorder %v927_v32, 0  ;;  %vm943_vm3 = vcmp.lt.s32.totalorder %v927_v32, 8 }
  0x4f   : > { %v958_v39 = vsel %vm950_vm9, 1.0, %v7885_v21  ;;  %vm936_vm5 = vcmp.ge.s32.totalorder %v928_v13, 0  ;;  %v7788_v42 = vpack.i.bf16 %v8120_v38, %v8114_v36  ;;  %vm944_vm10 = vcmp.lt.s32.totalorder %v928_v13, 8  ;;  %vm951_vm13 = vmand %vm935_vm12, %vm943_vm3 }
  0x50   : > { %1979 = vperm.xlu0 %7786, %v920_v33   ;;  %v963_v40 = vpack.c.bf16 %v958_v39, %v957_v34  ;;  %vm952_vm14 = vmand %vm936_vm5, %vm944_vm10  ;;  %v959_v16 = vsel %vm951_vm13, 1.0, %v7885_v21  ;;  %vm10360_vm7 = vcmask 130048   ;;  %v7798_v45 = vpack.i.bf16 %v8141_v47, %v8138_v46  ;;  %v1289_v47 = vld [vmem:[%s10363_s25] sm:$0xf] }
  0x51   : > { %v960_v19 = vsel %vm952_vm14, 1.0, %v7885_v21  ;;  %v7793_v36 = vpack.i.bf16 %v8155_v54, %v8150_v51  ;;  %v7808_v38 = vpack.i.bf16 %v8191_v27, %v8188_v26  ;;  %vm10361_vm1 = vmmov %vm10360_vm7  ;;  %v7818_v21 = vpack.i.bf16 %v8203_v37, %v8200_v35  ;;  %v6990_v54 = vld [vmem:[%s10363_s25 + $0x4] sm:$0xf] }
  0x52   : > { %2168 = vperm.xlu1 %7787, %v963_v40   ;;  %v964_v43 = vpack.c.bf16 %v960_v19, %v959_v16  ;;  %v7813_v46 = vpack.i.bf16 %v8214_v44, %v8209_v41  ;;  %vm10362_vm4 = vmmov %vm10361_vm1  ;;  %vm1396_vm6 = vcmask 1043456   ;;  %vm1306_vm0 = vsmask.f32 256 }
  0x53   : > { %6981 = vmatmul.mubr.msk.bf16.gmra.mxu0 %vm10360_vm7, %v8069_v17  ;;  %v7803_v17 = vpack.i.bf16 %v8180_v18, %v8176_v12  ;;  %7749 = vmatprep.subr.msk.bf16.mxu0 %vm1396_vm6, %v1289_v47  ;;  %v1478_v51 = vsel %vm1396_vm6, %v1289_v47, 0  ;;  %v6999_v12 = vld [vmem:[%s10363_s25 + $0x8] sm:$0xf]  ;;  %v7004_v18 = vld [vmem:[%s10363_s25 + $0xc] sm:$0xf]  ;;  %vm1565_vm8 = vcmask 1040384  }
  0x54   : > { %1074 = vmatprep.mubr.bf16.mxu0 %v10270_v4  ;;  %7789 = vperm.xlu0 %7786, %v7788_v42   ;;  %v8339_v31 = vsel %vm1396_vm6, %v6999_v12, 0  ;;  %v8342_v9 = vsel %vm1396_vm6, %v7004_v18, 0  ;;  %v8349_v34 = vsel %vm1396_vm6, %v8335_v2, 0  ;;  %vm1220_vm2 = vsmask.f32 1280 }
  0x55   : > { %7469 = vmatpush3.bf16.msra.mxu0 %v1478_v51  ;;  %7748 = vmatprep.subr.msk.bf16.mxu1 %vm1396_vm6, %v6990_v54  ;;  %vm1261_vm15 = vcmask 1041408   ;;  %vm1383_vm11 = vcmask 64512   ;;  %vm1346_vm12 = vsmask.f32 7424  ;;  %vm1690_vm5 = vsmask.f32 6400 }
  0x56   : > { %2172 = vperm.xlu1 %7787, %v964_v43   ;;  %7751 = vmatprep.subr.msk.bf16.mxu0 %vm1396_vm6, %v7004_v18  ;;  %vm8387_vm9 = vmand %vm1261_vm15, %vm1220_vm2  ;;  %vm1981_vm3 = vsmask.f32 2304  ;;  %vm1590_vm10 = vcmask 1046528   ;;  %vm2025_vm13 = vsmask.f32 5376  ;;  %vm1867_vm14 = vcmask 1045504  }
  0x57   : > { %vm1112_vm7 = vcmask 523264  }
  0x58   : > { %7799 = vperm.xlu0 %7786, %v7798_v45  }
  0x5a   : > { %7794 = vperm.xlu1 %7787, %v7793_v36  }
  0x5b   : > { %6982 = vmatmul.mubr.msk.bf16.gmra.mxu0 %vm10361_vm1, %v8080_v20  ;;  %v7823_v20 = vpack.i.bf16 %v8234_v63, %v8228_v61  ;;  %vm2178_vm1 = vcmask 1042432  }
  0x5c   : > { %1084 = vmatprep.mubr.bf16.mxu0 %v10270_v4  ;;  %7809 = vperm.xlu0 %7786, %v7808_v38  }
  0x5e   : > { %7804 = vperm.xlu1 %7787, %v7803_v17  }
  0x60   : > { %7819 = vperm.xlu0 %7786, %v7818_v21  }
  0x62   : > { %7814 = vperm.xlu1 %7787, %v7813_v46  }
  0x63   : > { %6983 = vmatmul.mubr.msk.bf16.gmra.mxu0 %vm10362_vm4, %v8099_v29  ;;  %v1398_v29 = vsel %vm1396_vm6, %v6990_v54, 0  ;;  %vm2203_vm4 = vcmask 1044480  }
  0x64   : > { %7459 = vmatpush3.bf16.msra.mxu1 %v1398_v29 }
  0x65   : > { %7750 = vmatprep.subr.msk.bf16.mxu1 %vm1396_vm6, %v6999_v12 }
  0x66   : > { %7824 = vperm.xlu1 %7787, %v7823_v20  }
  0x9d   : > { %v1293_v26 = vpop.permute.xlu0 %1292 }
  0x9e   : > { %v1307_v62 = vshrl.u32 %v1293_v26, 16  ;;  %v1310_v22 = vshll.u32 %v1293_v26, 16 }
  0xa0   : > { %v1309_v14 = vrot.slane %v1307_v62, 7 }
  0xa1   : > { %v1297_v27 = vpop.permute.xlu0 %1296 }
  0xa2   : > { %v1301_v37 = vpop.permute.xlu1 %1300  ;;  %v1313_v58 = vshrl.u32 %v1297_v27, 16  ;;  %v1316_v3 = vshll.u32 %v1297_v27, 16  ;;  %v8351_v39 = vor.u32 %v1310_v22, %v1309_v14 }
  0xa3   : > { %v1320_v59 = vshrl.u32 %v1301_v37, 16  ;;  %v1323_v6 = vshll.u32 %v1301_v37, 16 }
  0xa4   : > { %v1315_v0 = vrot.slane %v1313_v58, 7  ;;  %10371 = vst [vmem:[#allocation8_spill] sm:$0xff] %v8351_v39 }
  0xa5   : > { %v1548_v35 = vpop.permute.xlu0 %1547  ;;  %v1322_v5 = vrot.slane %v1320_v59, 7 }
  0xa6   : > { %v1305_v44 = vpop.permute.xlu1 %1304  ;;  %v1318_v23 = vor.u32 %v1316_v3, %v1315_v0  ;;  %v8344_v15 = vrot.slane %v1548_v35, 7 }
  0xa7   : > { %v1327_v61 = vshrl.u32 %v1305_v44, 16  ;;  %v1330_v10 = vshll.u32 %v1305_v44, 16  ;;  %v1325_v24 = vor.u32 %v1323_v6, %v1322_v5 }
  0xa8   : > { %10370 = vst [vmem:[#allocation7_spill] sm:$0xff] %v8344_v15  ;;  %v8357_v19 = vsel %vm1306_vm0, %v1309_v14, %v1318_v23 }
  0xa9   : > { %v8307_v41 = vpop.permute.xlu0 %1555  ;;  %v8323_v8 = vrot.slane %v1327_v61, 7  ;;  %10372 = vst [vmem:[#allocation9_spill] sm:$0xff] %v8357_v19  ;;  %v8360_v43 = vsel %vm1306_vm0, %v1315_v0, %v1325_v24 }
  0xaa   : > { %v1552_v49 = vpop.permute.xlu1 %1551  ;;  %v1569_v40 = vrot.slane %v8307_v41, 7  ;;  %10373 = vst [vmem:[#allocation10_spill] sm:$0xff] %v8360_v43 }
  0xab   : > { %10368 = vst [vmem:[#allocation6_spill] sm:$0xff] %v8323_v8  ;;  %v1332_v32 = vor.u32 %v1330_v10, %v8323_v8  ;;  %v1567_v13 = vrot.slane %v1552_v49, 7 }
  0xad   : > { %v8309_v48 = vpop.permute.xlu0 %1272  ;;  %v8368_v51 = vsel %vm1306_vm0, %v1322_v5, %v1332_v32  ;;  %v8372_v54 = vsel %vm1565_vm8, %v8344_v15, %v1567_v13  ;;  %v8375_v26 = vsel %vm1565_vm8, %v1567_v13, %v1569_v40  ;;  %vm10401_vm0 = vcmask 130048  }
  0xae   : > { %10364 = vst [vmem:[#allocation2_spill] sm:$0xff] %v8309_v48  ;;  %v8313_v52 = vpop.permute.xlu1 %1267  ;;  %10375 = vst [vmem:[#allocation12_spill] sm:$0xff] %v8368_v51 }
  0xaf   : > { %10366 = vst [vmem:[#allocation4_spill] sm:$0xff] %v8313_v52  ;;  %10376 = vst [vmem:[#allocation13_spill] sm:$0xff] %v8372_v54 }
  0xb0   : > { %10377 = vst [vmem:[#allocation14_spill] sm:$0xff] %v8375_v26 }
  0xb1   : > { %v8311_v50 = vpop.permute.xlu0 %1277 }
  0xb2   : > { %10365 = vst [vmem:[#allocation3_spill] sm:$0xff] %v8311_v50 }
  0xb3   : > { %v1560_v55 = vpop.permute.xlu1 %1559 }
  0xb4   : > { %v8362_v45 = vrot.slane %v1560_v55, 7 }
  0xb5   : > { %v8315_v53 = vpop.permute.xlu0 %1825 }
  0xb6   : > { %10374 = vst [vmem:[#allocation11_spill] sm:$0xff] %v8362_v45  ;;  %v8379_v44 = vsel %vm1565_vm8, %v1569_v40, %v8362_v45 }
  0xb7   : > { %v8319_v57 = vpop.permute.xlu1 %1282  ;;  %10378 = vst [vmem:[#allocation15_spill] sm:$0xff] %v8379_v44 }
  0xb8   : > { %10367 = vst [vmem:[#allocation5_spill] sm:$0xff] %v8319_v57 }
  0xb9   : > { %v8317_v56 = vpop.permute.xlu0 %1833 }
  0xbb   : > { %v8321_v63 = vpop.permute.xlu1 %1829 }
  0xbd   : > { %v1972_v60 = vpop.permute.xlu0 %1971 }
  0xbe   : > { %v1989_v36 = vshrl.u32 %v1972_v60, 16  ;;  %v1992_v17 = vshll.u32 %v1972_v60, 16 }
  0xc0   : > { %v1968_v28 = vpop.permute.xlu1 %1967  ;;  %v1991_v49 = vrot.slane %v1989_v36, 5  ;;  %v1994_v60 = vrot.slane %v1992_v17, 6 }
  0xc1   : > { %v1982_v29 = vshrl.u32 %v1968_v28, 16  ;;  %v1985_v12 = vshll.u32 %v1968_v28, 16 }
  0xc2   : > { %v8330_v1 = vpop.permute.xlu0 %1837  ;;  %v8391_v17 = vor.u32 %v1994_v60, %v1991_v49 }
  0xc3   : > { %v1984_v3 = vrot.slane %v1982_v29, 5  ;;  %v1987_v5 = vrot.slane %v1985_v12, 6 }
  0xc4   : > { %v1976_v27 = vpop.permute.xlu1 %1975 }
  0xc5   : > { %v1997_v55 = vshrl.u32 %v1976_v27, 16  ;;  %v2000_v58 = vshll.u32 %v1976_v27, 16 }
  0xc6   : > { %v8364_v21 = vpop.permute.xlu0 %2164 }
  0xc7   : > { %v1999_v28 = vrot.slane %v1997_v55, 5 }
  0xcb   : > { %v1980_v14 = vpop.permute.xlu0 %1979 }
  0xcc   : > { %v2005_v32 = vshrl.u32 %v1980_v14, 16  ;;  %v2008_v40 = vshll.u32 %v1980_v14, 16 }
  0xce   : > { %v8399_v55 = vrot.slane %v2008_v40, 6 }
  0xdd   : > { %v7452_v7 = vpop.f32.mrf.mxu1 }
  0xde   : > { %v1186_v30 = vadd.f32 %v7452_v7, %v8328_v11 }
  0xdf   : > { %v1177_v25 = vpop.f32.mrf.mxu1 }
  0xe0   : > { %v1178_v42 = vadd.f32 %v8328_v11, %v1177_v25  ;;  %v1210_v46 = vmax.f32 %v1186_v30, 0.0  ;;  %v2002_v30 = vrot.slane %v2000_v58, 6 }
  0xe1   : > { %v7453_v33 = vpop.f32.mrf.mxu1 }
  0xe2   : > { %v1189_v16 = vadd.f32 %v7453_v33, %v8328_v11  ;;  %v1208_v35 = vmax.f32 %v1178_v42, 0.0 }
  0xe3   : > { %v1180_v38 = vpop.f32.mrf.mxu1 }
  0xe4   : > { %v1211_v20 = vmax.f32 %v1189_v16, 0.0  ;;  %v1181_v47 = vadd.f32 %v8328_v11, %v1180_v38  ;;  %v10379_v38 = vmov 0 }
  0xe5   : > { %v10380_v38 = vsel %vm8387_vm9, 4294967295, %v10379_v38 }
  0xe6   : > { %v7456_v18 = vpop.f32.mrf.mxu1  ;;  %v1217_v37 = vpack.c.bf16 %v1211_v20, %v1210_v46  ;;  %v1209_v41 = vmax.f32 %v1181_v47, 0.0  ;;  %10381 = vst [vmem:[#allocation16_spill] sm:$0xff] %v10380_v38  ;;  %v969_v47 = vlaneseq  ;;  %v7094_v38 = vld [vmem:[%s10254_s11] ss:$0 sm:$0xff] }
  0xe7   : > { %v1202_v6 = vadd.f32 %v7456_v18, %v8328_v11 }
  0xe8   : > { %v1193_v59 = vpop.f32.mrf.mxu1  ;;  %v1230_v61 = vshrl.u32 %v1217_v37, 16  ;;  %v1233_v62 = vshll.u32 %v1217_v37, 16  ;;  %v1216_v0 = vpack.c.bf16 %v1209_v41, %v1208_v35  ;;  %v8393_v35 = vor.u32 %v1987_v5, %v1984_v3 }
  0xe9   : > { %v1194_v10 = vadd.f32 %v8328_v11, %v1193_v59  ;;  %v1214_v46 = vmax.f32 %v1202_v6, 0.0  ;;  %v8395_v37 = vor.u32 %v2002_v30, %v1999_v28 }
  0xea   : > { %v7457_v7 = vpop.f32.mrf.mxu1  ;;  %v1232_v22 = vrot.slane %v1230_v61, 6  ;;  %v1235_v23 = vrot.slane %v1233_v62, 7  ;;  %v1222_v24 = vshrl.u32 %v1216_v0, 16  ;;  %v1225_v25 = vshll.u32 %v1216_v0, 16  ;;  %10382 = vst [vmem:[#allocation17_spill] sm:$0xff] %v8393_v35 }
  0xeb   : > { %v1205_v13 = vadd.f32 %v7457_v7, %v8328_v11  ;;  %v1212_v18 = vmax.f32 %v1194_v10, 0.0 }
  0xec   : > { %v1196_v33 = vpop.f32.mrf.mxu1  ;;  %v1224_v42 = vrot.slane %v1222_v24, 6  ;;  %v1227_v16 = vrot.slane %v1225_v25, 7  ;;  %v1236_v29 = vor.u32 %v1235_v23, %v1232_v22 }
  0xed   : > { %v1197_v36 = vadd.f32 %v8328_v11, %v1196_v33  ;;  %v1215_v20 = vmax.f32 %v1205_v13, 0.0  ;;  %v8397_v11 = vrot.slane %v2005_v32, 5 }
  0xee   : > { %v1228_v12 = vor.u32 %v1227_v16, %v1224_v42 }
  0xef   : > { %v1213_v27 = vmax.f32 %v1197_v36, 0.0  ;;  %v1219_v41 = vpack.c.bf16 %v1215_v20, %v1214_v46 }
  0xf0   : > { %v8402_v49 = vsel %vm1220_vm2, %v1228_v12, %v1236_v29  ;;  %v8406_v58 = vsel %vm8387_vm9, 0, %v1228_v12 }
  0xf1   : > { %v1218_v59 = vpack.c.bf16 %v1213_v27, %v1212_v18  ;;  %v1248_v60 = vshrl.u32 %v1219_v41, 16  ;;  %v1251_v61 = vshll.u32 %v1219_v41, 16  ;;  %v1285_v62 = vmul.bf16 %v8313_v52, %v8406_v58 }
  0xf2   : > { %v1286_v0 = vmul.bf16 %v8309_v48, %v8402_v49  ;;  %v1339_v6 = vmul.bf16 %v8351_v39, %v8406_v58  ;;  %v1340_v10 = vmul.bf16 %v8357_v19, %v8402_v49  ;;  %v1692_v22 = vshrl.u32 %v8406_v58, 16 }
  0xf3   : > { %v1239_v3 = vshrl.u32 %v1218_v59, 16  ;;  %v1242_v5 = vshll.u32 %v1218_v59, 16  ;;  %v1250_v7 = vrot.slane %v1248_v60, 6  ;;  %v1253_v14 = vrot.slane %v1251_v61, 7  ;;  %7470 = vmatprep.mubr.msk.bf16.mxu0 %vm1383_vm11, %v1285_v62 }
  0xf4   : > { %v1695_v23 = vshll.u32 %v8406_v58, 16  ;;  %7471 = vmatmul.mubr.msk.bf16.vlgmr.msra.gmra.mxu0 %vm1383_vm11, %v1286_v0  ;;  %v1348_v28 = vshrl.u32 %v1339_v6, 16  ;;  %v1350_v30 = vshll.u32 %v1339_v6, 16  ;;  %v1355_v13 = vshll.u32 %v1340_v10, 16 }
  0xf5   : > { %v1241_v24 = vrot.slane %v1239_v3, 6  ;;  %v1244_v25 = vrot.slane %v1242_v5, 7  ;;  %v1254_v32 = vor.u32 %v1253_v14, %v1250_v7  ;;  %v1359_v33 = vshrl.u32 %v1340_v10, 16  ;;  %7489 = vmatpush3.bf16.msra.mxu0 %v8342_v9 }
  0xf6   : > { %v1694_v40 = vrot.slane %v1692_v22, 1  ;;  %v1352_v16 = vrot.slane %v1350_v30, 1  ;;  %v1697_v36 = vrot.slane %v1695_v23, 2  ;;  %v1700_v46 = vshrl.u32 %v8402_v49, 16  ;;  %7753 = vmatprep.subr.msk.bf16.mxu0 %vm1396_vm6, %v8335_v2 }
  0xf7   : > { %v1245_v42 = vor.u32 %v1244_v25, %v1241_v24  ;;  %v8426_v20 = vsel %vm8387_vm9, %v1254_v32, 0  ;;  %v1357_v12 = vrot.slane %v1355_v13, 1  ;;  %v1703_v18 = vshll.u32 %v8402_v49, 16 }
  0xf8   : > { %v1578_v27 = vmul.bf16 %v8344_v15, %v8406_v58  ;;  %v1353_v59 = vor.u32 %v1352_v16, %v1348_v28  ;;  %v1698_v60 = vor.u32 %v1697_v36, %v1694_v40  ;;  %v1702_v0 = vrot.slane %v1700_v46, 1 }
  0xf9   : > { %v8432_v9 = vsel %vm1220_vm2, %v1236_v29, %v1245_v42  ;;  %v8435_v41 = vsel %vm1220_vm2, %v1245_v42, %v1254_v32  ;;  %v1361_v61 = vor.u32 %v1359_v33, %v1357_v12  ;;  %v1705_v5 = vrot.slane %v1703_v18, 2 }
  0xfa   : > { %v1287_v2 = vmul.bf16 %v8311_v50, %v8432_v9  ;;  %v1288_v62 = vmul.bf16 %v8319_v57, %v8435_v41  ;;  %v1358_v3 = vsel %vm1346_vm12, %v1353_v59, %v1357_v12  ;;  %v1341_v29 = vmul.bf16 %v8360_v43, %v8432_v9 }
  0xfb   : > { %v1342_v6 = vmul.bf16 %v8368_v51, %v8435_v41  ;;  %7460 = vmatprep.mubr.msk.bf16.mxu1 %vm1383_vm11, %v1358_v3  ;;  %v1709_v10 = vshrl.u32 %v8432_v9, 16  ;;  %v1712_v7 = vshll.u32 %v8432_v9, 16  ;;  %v1718_v14 = vshrl.u32 %v8435_v41, 16  ;;  %v8468_v3 = vld [vmem:[%s10363_s25 + $0x10] sm:$0xf] }
  0xfc   : > { %7474 = vmatprep.mubr.msk.bf16.mxu0 %vm1383_vm11, %v1287_v2  ;;  %v1721_v22 = vshll.u32 %v8435_v41, 16  ;;  %v1706_v23 = vor.u32 %v1705_v5, %v1702_v0  ;;  %v1363_v24 = vshll.u32 %v1341_v29, 16  ;;  %v1367_v25 = vshrl.u32 %v1341_v29, 16 }
  0xfd   : > { %7475 = vmatmul.mubr.msk.bf16.gmra.mxu0 %vm1383_vm11, %v1288_v62  ;;  %v1371_v28 = vshll.u32 %v1342_v6, 16  ;;  %v1711_v30 = vrot.slane %v1709_v10, 1  ;;  %v1714_v32 = vrot.slane %v1712_v7, 2  ;;  %v1720_v13 = vrot.slane %v1718_v14, 1 }
  0xfe   : > { %v1723_v33 = vrot.slane %v1721_v22, 2  ;;  %v1707_v40 = vsel %vm1690_vm5, %v1698_v60, %v1706_v23  ;;  %v1365_v42 = vrot.slane %v1363_v24, 1  ;;  %v1343_v36 = vmul.bf16 %v8323_v8, %v8426_v20 }
  0xff   : > { %v1373_v16 = vrot.slane %v1371_v28, 1  ;;  %v8459_v46 = vsel %vm1981_vm3, %v8393_v35, %v8391_v17  ;;  %7490 = vmatprep.mubr.msk.bf16.mxu0 %vm1383_vm11, %v1707_v40  ;;  %v1715_v12 = vor.u32 %v1714_v32, %v1711_v30  ;;  %v1375_v18 = vshrl.u32 %v1342_v6, 16 }
 0x100   : > { %10383 = vst [vmem:[#allocation18_spill] sm:$0xff] %v8459_v46  ;;  %v1579_v59 = vmul.bf16 %v8372_v54, %v8402_v49  ;;  %v1366_v2 = vsel %vm1346_vm12, %v1361_v61, %v1365_v42  ;;  %v1369_v60 = vor.u32 %v1367_v25, %v1365_v42  ;;  %v1724_v62 = vor.u32 %v1723_v33, %v1720_v13 }
 0x101   : > { %v1379_v0 = vshll.u32 %v1343_v36, 16  ;;  %v8473_v5 = vsel %vm1981_vm3, %v8391_v17, %v8395_v37  ;;  %v8477_v29 = vor.u32 %v8399_v55, %v8397_v11  ;;  %7461 = vmatmul.mubr.msk.bf16.vlgmr.msra.gmra.mxu1 %vm1383_vm11, %v1366_v2  ;;  %v1377_v61 = vor.u32 %v1375_v18, %v1373_v16 }
 0x102   : > { %10384 = vst [vmem:[#allocation19_spill] sm:$0xff] %v8473_v5  ;;  %v1591_v6 = vrot.slane %v1578_v27, 1  ;;  %7479 = vmatpush3.bf16.msra.mxu1 %v8339_v31  ;;  %v1374_v10 = vsel %vm1346_vm12, %v1369_v60, %v1373_v16  ;;  %v8482_v7 = vrot.slane %v1579_v59, 1  ;;  %v1727_v14 = vshrl.u32 %v8426_v20, 16 }
 0x103   : > { %10385 = vst [vmem:[#allocation20_spill] sm:$0xff] %v8477_v29  ;;  %v1730_v17 = vshll.u32 %v8426_v20, 16  ;;  %7464 = vmatprep.mubr.msk.bf16.mxu1 %vm1383_vm11, %v1374_v10  ;;  %v1716_v11 = vsel %vm1690_vm5, %v1706_v23, %v1715_v12  ;;  %v2018_v55 = vmul.bf16 %v8393_v35, %v8406_v58  ;;  %v2019_v27 = vmul.bf16 %v8459_v46, %v8402_v49 }
 0x104   : > { %7752 = vmatprep.subr.msk.bf16.mxu1 %vm1396_vm6, %v8468_v3  ;;  %v970_v31 = vshrl.u32 %v969_v47, 7  ;;  %v1725_v22 = vsel %vm1690_vm5, %v1715_v12, %v1724_v62  ;;  %v1381_v24 = vrot.slane %v1379_v0, 1  ;;  %v1729_v25 = vrot.slane %v1727_v14, 1 }
 0x105   : > { %7491 = vmatmul.mubr.msk.bf16.vlgmr.msra.gmra.mxu0 %vm1383_vm11, %v1716_v11  ;;  %v1732_v28 = vrot.slane %v1730_v17, 2  ;;  %v2027_v23 = vshrl.u32 %v2018_v55, 16  ;;  %v2030_v30 = vshll.u32 %v2018_v55, 16  ;;  %v2035_v32 = vshrl.u32 %v2019_v27, 16 }
 0x106   : > { %7494 = vmatprep.mubr.msk.bf16.mxu0 %vm1383_vm11, %v1725_v22  ;;  %v2038_v13 = vshll.u32 %v2019_v27, 16  ;;  %7509 = vmatpush3.bf16.msra.mxu0 %v8349_v34  ;;  %v8502_v33 = vsel %vm1981_vm3, %v8395_v37, %v8477_v29  ;;  %v1382_v47 = vsel %vm1346_vm12, %v1377_v61, %v1381_v24  ;;  %v1593_v40 = vsel %vm1590_vm10, %v1591_v6, %v8482_v7  ;;  %vm10403_vm3 = vmmov %vm10401_vm0 }
 0x107   : > { %10386 = vst [vmem:[#allocation21_spill] sm:$0xff] %v8502_v33  ;;  %v2020_v42 = vmul.bf16 %v8473_v5, %v8432_v9  ;;  %v2029_v16 = vrot.slane %v2027_v23, 2  ;;  %v2032_v36 = vrot.slane %v2030_v30, 3  ;;  %v2037_v12 = vrot.slane %v2035_v32, 2 }
 0x108   : > { %v2040_v18 = vrot.slane %v2038_v13, 3  ;;  %v1733_v59 = vor.u32 %v1732_v28, %v1729_v25  ;;  %v1580_v34 = vmul.bf16 %v8375_v26, %v8432_v9  ;;  %v1581_v37 = vmul.bf16 %v8379_v44, %v8435_v41 }
 0x109   : > { %v2044_v2 = vshrl.u32 %v2020_v42, 16  ;;  %7465 = vmatmul.mubr.msk.bf16.gmra.mxu1 %vm1383_vm11, %v1382_v47  ;;  %v2033_v0 = vor.u32 %v2032_v36, %v2029_v16  ;;  %v2047_v6 = vshll.u32 %v2020_v42, 16  ;;  %v2021_v10 = vmul.bf16 %v8502_v33, %v8435_v41 }
 0x10a   : > { %v2041_v61 = vor.u32 %v2040_v18, %v2037_v12  ;;  %v8519_v14 = vrot.slane %v8315_v53, 6  ;;  %v1844_v17 = vrot.slane %v8321_v63, 6  ;;  %7480 = vmatprep.mubr.msk.bf16.mxu1 %vm1383_vm11, %v1593_v40  ;;  %v1734_v11 = vsel %vm1690_vm5, %v1724_v62, %v1733_v59  ;;  %v967_v63 = vld [vmem:[%s10389_s23] sm:$0x3] }
 0x10b   : > { %v8513_v60 = vpop.f32.mrf.mxu0  ;;  %v8524_v55 = vsub.s32 0, %v970_v31  ;;  %v2046_v22 = vrot.slane %v2044_v2, 2  ;;  %v2049_v24 = vrot.slane %v2047_v6, 3  ;;  %v2053_v25 = vshrl.u32 %v2021_v10, 16 }
 0x10c   : > { %10387 = vst [vmem:[#allocation22_spill] sm:$0xff] %v8519_v14  ;;  %v2056_v28 = vshll.u32 %v2021_v10, 16  ;;  %v2042_v23 = vsel %vm2025_vm13, %v2033_v0, %v2041_v61  ;;  %v1594_v30 = vrot.slane %v1580_v34, 1  ;;  %v2022_v53 = vmul.bf16 %v8477_v29, %v8426_v20 }
 0x10d   : > { %10388 = vst [vmem:[#allocation23_spill] sm:$0xff] %v8524_v55  ;;  %v1058_v27 = vpop.f32.mrf.mxu0  ;;  %7495 = vmatmul.mubr.msk.bf16.gmra.mxu0 %vm1383_vm11, %v1734_v11  ;;  %v1596_v32 = vrot.slane %v1581_v37, 1  ;;  %v2055_v13 = vrot.slane %v2053_v25, 2  ;;  %v8534_v40 = vsub.s32 1, %v970_v31  ;;  %v1846_v42 = vrot.slane %v8317_v56, 6 }
 0x10e   : > { %7510 = vmatprep.mubr.msk.bf16.mxu0 %vm1383_vm11, %v2042_v23  ;;  %v2058_v47 = vrot.slane %v2056_v28, 3  ;;  %v8539_v16 = vsel %vm1261_vm15, %v8519_v14, %v1844_v17  ;;  %v1890_v36 = vsel %vm1396_vm6, %v8468_v3, 0  ;;  %v2050_v18 = vor.u32 %v2049_v24, %v2046_v22  ;;  %v8556_v3 = vld [vmem:[%s10363_s25 + $0x18] sm:$0xf] }
 0x10f   : > { %v1060_v62 = vpop.f32.mrf.mxu0  ;;  %10390 = vst [vmem:[#allocation24_spill] sm:$0xff] %v8534_v40  ;;  %10391 = vst [vmem:[#allocation25_spill] sm:$0xff] %v8539_v16  ;;  %v2062_v59 = vshrl.u32 %v2022_v53, 16  ;;  %v2065_v34 = vshll.u32 %v2022_v53, 16  ;;  %v8544_v2 = vrot.slane %v967_v63, %v8524_v55  ;;  %v8547_v31 = vrot.slane %v8330_v1, 6 }
 0x110   : > { %v1595_v56 = vsel %vm1590_vm10, %v8482_v7, %v1594_v30  ;;  %v2059_v37 = vor.u32 %v2058_v47, %v2055_v13  ;;  %v1582_v0 = vmul.bf16 %v8362_v45, %v8426_v20  ;;  %v1597_v10 = vsel %vm1590_vm10, %v1594_v30, %v1596_v32 }
 0x111   : > { %v1062_v12 = vpop.f32.mrf.mxu0  ;;  %10392 = vst [vmem:[#allocation26_spill] sm:$0xff] %v8547_v31  ;;  %7481 = vmatmul.mubr.msk.bf16.vlgmr.msra.gmra.mxu1 %vm1383_vm11, %v1595_v56  ;;  %v1855_v1 = vmul.bf16 %v8519_v14, %v8406_v58  ;;  %v1856_v7 = vmul.bf16 %v8539_v16, %v8402_v49  ;;  %v8565_v11 = vrot.slane %v967_v63, %v8534_v40  ;;  %v2064_v25 = vrot.slane %v2062_v59, 2 }
 0x112   : > { %7499 = vmatpush3.bf16.msra.mxu1 %v1890_v36  ;;  %7484 = vmatprep.mubr.msk.bf16.mxu1 %vm1383_vm11, %v1597_v10  ;;  %v2051_v24 = vsel %vm2025_vm13, %v2041_v61, %v2050_v18  ;;  %v2067_v28 = vrot.slane %v2065_v34, 3  ;;  %v8573_v23 = vsel %vm1261_vm15, %v1844_v17, %v1846_v42  ;;  %v8577_v30 = vsel %vm1261_vm15, %v1846_v42, %v8547_v31  ;;  %vm10402_vm15 = vmmov %vm10401_vm0 }
 0x113   : > { %v1066_v6 = vpop.f32.mrf.mxu0  ;;  %7754 = vmatprep.subr.msk.bf16.mxu1 %vm1396_vm6, %v8556_v3  ;;  %10393 = vst [vmem:[#allocation27_spill] sm:$0xff] %v8573_v23  ;;  %10394 = vst [vmem:[#allocation28_spill] sm:$0xff] %v8577_v30  ;;  %v2060_v53 = vsel %vm2025_vm13, %v2050_v18, %v2059_v37  ;;  %v1598_v63 = vrot.slane %v1582_v0, 1  ;;  %v1868_v61 = vrot.slane %v1855_v1, 2  ;;  %v1869_v47 = vrot.slane %v1856_v7, 2 }
 0x114   : > { %v1057_v36 = vadd.f32 %v8513_v60, %v8544_v2  ;;  %v1059_v17 = vadd.f32 %v1058_v27, %v8565_v11  ;;  %v1857_v18 = vmul.bf16 %v8573_v23, %v8432_v9  ;;  %v1061_v59 = vadd.f32 %v1060_v62, %v8544_v2  ;;  %v2161_v60 = vpop.permute.xlu1 %2160 }
 0x115   : > { %v1068_v22 = vpop.f32.mrf.mxu0  ;;  %7511 = vmatmul.mubr.msk.bf16.vlgmr.msra.gmra.mxu0 %vm1383_vm11, %v2051_v24  ;;  %v1599_v42 = vsel %vm1590_vm10, %v1596_v32, %v1598_v63  ;;  %v1063_v34 = vadd.f32 %v1062_v12, %v8565_v11  ;;  %v2068_v0 = vor.u32 %v2067_v28, %v2064_v25  ;;  %v1858_v27 = vmul.bf16 %v8577_v30, %v8435_v41 }
 0x116   : > { %7514 = vmatprep.mubr.msk.bf16.mxu0 %vm1383_vm11, %v2060_v53  ;;  %v1095_v10 = vmax.f32 %v1057_v36, 0.0  ;;  %v1096_v1 = vmax.f32 %v1059_v17, 0.0  ;;  %v1097_v32 = vmax.f32 %v1061_v59, 0.0  ;;  %v1067_v24 = vadd.f32 %v1066_v6, %v8544_v2 }
 0x117   : > { %v1070_v13 = vpop.f32.mrf.mxu0  ;;  %v1098_v7 = vmax.f32 %v1063_v34, 0.0  ;;  %v1069_v53 = vadd.f32 %v1068_v22, %v8565_v11  ;;  %v1870_v12 = vsel %vm1867_vm14, %v1868_v61, %v1869_v47  ;;  %v2069_v6 = vsel %vm2025_vm13, %v2059_v37, %v2068_v0 }
 0x118   : > { %1111 = vst [vmem:[%s8588_s27] sm:$0xff] %v1095_v10  ;;  %1113 = vst.msk [vmem:[%s8588_s27 + $0x8] sm:$0xff] %vm1112_vm7, %v1096_v1  ;;  %v1071_v25 = vadd.f32 %v1070_v13, %v8544_v2  ;;  %v1099_v22 = vmax.f32 %v1067_v24, 0.0  ;;  %v2180_v34 = vrot.slane %v8364_v21, 5  ;;  %v1871_v37 = vrot.slane %v1857_v18, 2  ;;  %v2169_v10 = vpop.permute.xlu1 %2168 }
 0x119   : > { %v1072_v56 = vpop.f32.mrf.mxu0  ;;  %7485 = vmatmul.mubr.msk.bf16.gmra.mxu1 %vm1383_vm11, %v1599_v42  ;;  %1114 = vst [vmem:[%s8588_s27 + $0x10] sm:$0xff] %v1097_v32  ;;  %1115 = vst.msk [vmem:[%s8588_s27 + $0x18] sm:$0xff] %vm1112_vm7, %v1098_v7  ;;  %v1100_v61 = vmax.f32 %v1069_v53, 0.0  ;;  %v1873_v1 = vrot.slane %v1858_v27, 2  ;;  %v2226_v18 = vsel %vm1396_vm6, %v8556_v3, 0 }
 0x11a   : > { %v1073_v28 = vadd.f32 %v1072_v56, %v8565_v11  ;;  %7500 = vmatprep.mubr.msk.bf16.mxu1 %vm1383_vm11, %v1870_v12  ;;  %v1101_v17 = vmax.f32 %v1071_v25, 0.0  ;;  %v8614_v56 = vrot.slane %v2161_v60, 5  ;;  %1116 = vst [vmem:[%s8588_s27 + $0x20] sm:$0xff] %v1099_v22  ;;  %v1872_v53 = vsel %vm1867_vm14, %v1869_v47, %v1871_v37 }
 0x11b   : > { %v1076_v62 = vpop.f32.mrf.mxu0  ;;  %1117 = vst.msk [vmem:[%s8588_s27 + $0x28] sm:$0xff] %vm1112_vm7, %v1100_v61  ;;  %v1874_v3 = vsel %vm1867_vm14, %v1871_v37, %v1873_v1  ;;  %v1859_v47 = vmul.bf16 %v8547_v31, %v8426_v20 }
 0x11c   : > { %v1077_v63 = vadd.f32 %v1076_v62, %v8544_v2  ;;  %v1102_v13 = vmax.f32 %v1073_v28, 0.0  ;;  %10395 = vst [vmem:[#allocation29_spill] sm:$0xff] %v8614_v56  ;;  %1118 = vst [vmem:[%s8588_s27 + $0x30] sm:$0xff] %v1101_v17  ;;  %v8633_v27 = vsel %vm2178_vm1, %v8614_v56, %v2180_v34  ;;  %v2191_v62 = vmul.bf16 %v8614_v56, %v8406_v58  ;;  %v2173_v22 = vpop.permute.xlu1 %2172 }
 0x11d   : > { %v1078_v36 = vpop.f32.mrf.mxu0  ;;  %7515 = vmatmul.mubr.msk.bf16.gmra.mxu0 %vm1383_vm11, %v2069_v6  ;;  %10396 = vst [vmem:[#allocation30_spill] sm:$0xff] %v8633_v27  ;;  %v2192_v25 = vmul.bf16 %v8633_v27, %v8402_v49  ;;  %v2182_v6 = vrot.slane %v2169_v10, 5 }
 0x11e   : > { %v1103_v42 = vmax.f32 %v1077_v63, 0.0  ;;  %v1079_v59 = vadd.f32 %v1078_v36, %v8565_v11  ;;  %1119 = vst.msk [vmem:[%s8588_s27 + $0x38] sm:$0xff] %vm1112_vm7, %v1102_v13  ;;  %2414 = vmatprep.mubr.bf16.mxu0 %v10270_v4  ;;  %v8650_v36 = vrot.slane %v2173_v22, 5  ;;  %v2204_v13 = vrot.slane %v2191_v62, 3 }
 0x11f   : > { %v1080_v0 = vpop.f32.mrf.mxu0 }
 0x120   : > { %1120 = vst [vmem:[%s8588_s27 + $0x40] sm:$0xff] %v1103_v42  ;;  %v1104_v32 = vmax.f32 %v1079_v59, 0.0  ;;  %v1081_v21 = vadd.f32 %v1080_v0, %v8544_v2  ;;  %10397 = vst [vmem:[#allocation31_spill] sm:$0xff] %v8650_v36  ;;  %v2205_v42 = vrot.slane %v2192_v25, 3  ;;  %v1875_v0 = vrot.slane %v1859_v47, 2  ;;  %v2345_v25 = vld [vmem:[%s10251_s8] sm:$0xff] }
 0x121   : > { %v1082_v60 = vpop.f32.mrf.mxu0  ;;  %7501 = vmatmul.mubr.msk.bf16.vlgmr.msra.gmra.mxu1 %vm1383_vm11, %v1872_v53 }
 0x122   : > { %1121 = vst.msk [vmem:[%s8588_s27 + $0x48] sm:$0xff] %vm1112_vm7, %v1104_v32  ;;  %v1105_v7 = vmax.f32 %v1081_v21, 0.0  ;;  %v1083_v24 = vadd.f32 %v1082_v60, %v8565_v11  ;;  %7519 = vmatpush3.bf16.msra.mxu1 %v2226_v18  ;;  %7504 = vmatprep.mubr.msk.bf16.mxu1 %vm1383_vm11, %v1874_v3  ;;  %v8655_v32 = vsel %vm2178_vm1, %v2180_v34, %v2182_v6 }
 0x123   : > { %v1086_v12 = vpop.f32.mrf.mxu0  ;;  %10398 = vst [vmem:[#allocation32_spill] sm:$0xff] %v8655_v32  ;;  %v8662_v18 = vsel %vm2178_vm1, %v2182_v6, %v8650_v36  ;;  %vm10404_vm1 = vmmov %vm10401_vm0 }
 0x124   : > { %1122 = vst [vmem:[%s8588_s27 + $0x50] sm:$0xff] %v1105_v7  ;;  %v1106_v28 = vmax.f32 %v1083_v24, 0.0  ;;  %v1087_v63 = vadd.f32 %v1086_v12, %v8544_v2  ;;  %10399 = vst [vmem:[#allocation33_spill] sm:$0xff] %v8662_v18  ;;  %v1876_v7 = vsel %vm1867_vm14, %v1873_v1, %v1875_v0  ;;  %v2206_v24 = vsel %vm2203_vm4, %v2204_v13, %v2205_v42 }
 0x125   : > { %v1088_v58 = vpop.f32.mrf.mxu0  ;;  %v2194_v34 = vmul.bf16 %v8662_v18, %v8435_v41  ;;  %v2195_v12 = vmul.bf16 %v8650_v36, %v8426_v20  ;;  %v7047_v20 = vld [vmem:[%s10251_s8 + $0x18] sm:$0xff] }
 0x126   : > { %1123 = vst.msk [vmem:[%s8588_s27 + $0x58] sm:$0xff] %vm1112_vm7, %v1106_v28  ;;  %v1107_v61 = vmax.f32 %v1087_v63, 0.0  ;;  %v1089_v49 = vadd.f32 %v1088_v58, %v8565_v11  ;;  %v7034_v28 = vcombine.high %v2345_v25, %v2345_v25  ;;  %v7033_v63 = vcombine.low %v2345_v25, %v2345_v25 }
 0x127   : > { %v1090_v17 = vpop.f32.mrf.mxu0  ;;  %v2209_v62 = vrot.slane %v2194_v34, 3  ;;  %v2211_v41 = vrot.slane %v2195_v12, 3  ;;  %v7049_v58 = vcombine.high %v7047_v20, %v7047_v20  ;;  %v7048_v6 = vcombine.low %v7047_v20, %v7047_v20 }
 0x128   : > { %1124 = vst [vmem:[%s8588_s27 + $0x60] sm:$0xff] %v1107_v61  ;;  %v1108_v59 = vmax.f32 %v1089_v49, 0.0  ;;  %v1091_v37 = vadd.f32 %v1090_v17, %v8544_v2  ;;  %v2193_v2 = vmul.bf16 %v8655_v32, %v8432_v9  ;;  %7035 = vmatprep.subr.msk.bf16.mxu1 %vm1396_vm6, %v7034_v28  ;;  %v2471_v47 = vsel %vm1396_vm6, %v7033_v63, 0  ;;  %v7025_v61 = vld [vmem:[%s10251_s8 + $0x8] sm:$0xff] }
 0x129   : > { %v1092_v10 = vpop.f32.mrf.mxu0  ;;  %7505 = vmatmul.mubr.msk.bf16.gmra.mxu1 %vm1383_vm11, %v1876_v7  ;;  %v2212_v3 = vsel %vm2203_vm4, %v2209_v62, %v2211_v41  ;;  %v2668_v22 = vsel %vm1396_vm6, %v7048_v6, 0  ;;  %v7027_v49 = vcombine.high %v7025_v61, %v7025_v61  ;;  %v7026_v17 = vcombine.low %v7025_v61, %v7025_v61 }
 0x12a   : > { %1125 = vst.msk [vmem:[%s8588_s27 + $0x68] sm:$0xff] %vm1112_vm7, %v1108_v59  ;;  %v1109_v21 = vmax.f32 %v1091_v37, 0.0  ;;  %v1093_v60 = vadd.f32 %v1092_v10, %v8565_v11  ;;  %7520 = vmatprep.mubr.msk.bf16.mxu1 %vm1383_vm11, %v2206_v24  ;;  %v2207_v11 = vrot.slane %v2193_v2, 3  ;;  %v8712_v37 = vld [vmem:[%s10251_s8 + $0x10] sm:$0xff] }
 0x12b   : > { %7028 = vmatprep.subr.msk.bf16.mxu0 %vm1396_vm6, %v7027_v49  ;;  %v2377_v13 = vsel %vm1396_vm6, %v7026_v17, 0  ;;  %v7041_v0 = vcombine.high %v8712_v37, %v8712_v37 }
 0x12c   : > { %1126 = vst [vmem:[%s8588_s27 + $0x70] sm:$0xff] %v1109_v21  ;;  %v1110_v53 = vmax.f32 %v1093_v60, 0.0  ;;  %v2208_v1 = vsel %vm2203_vm4, %v2205_v42, %v2207_v11  ;;  %v2210_v9 = vsel %vm2203_vm4, %v2207_v11, %v2209_v62  ;;  %2397 = vmatpush1.bf16.msra.mxu0 %v2377_v13  ;;  %v8704_v42 = vld [vmem:[%s10251_s8 + $0x28] sm:$0xff] }
 0x12d   : > { %v7065_v59 = vcombine.high %v8704_v42, %v8704_v42  ;;  %7042 = vmatprep.subr.msk.bf16.mxu0 %vm1396_vm6, %v7041_v0 }
 0x12e   : > { %1127 = vst.msk [vmem:[%s8588_s27 + $0x78] sm:$0xff] %vm1112_vm7, %v1110_v53 }
 0x131   : > { %7521 = vmatmul.mubr.msk.bf16.vlgmr.msra.gmra.mxu1 %vm1383_vm11, %v2208_v1 }
 0x132   : > { %7524 = vmatprep.mubr.msk.bf16.mxu1 %vm1383_vm11, %v2210_v9  ;;  %2491 = vmatpush1.bf16.msra.mxu1 %v2471_v47 }
 0x133   : > { %7050 = vmatprep.subr.msk.bf16.mxu1 %vm1396_vm6, %v7049_v58 }
 0x139   : > { %7525 = vmatmul.mubr.msk.bf16.gmra.mxu1 %vm1383_vm11, %v2212_v3 }
 0x13a   : > { %2508 = vmatprep.mubr.bf16.mxu1 %v10270_v4 }
 0x141   : > { %2509 = vmatmul.mubr.bf16.vlgmr.msra.gmra.mxu1 %v10270_v4 }
 0x142   : > { %2518 = vmatprep.mubr.bf16.mxu1 %v10270_v4  ;;  %2688 = vmatpush1.bf16.msra.mxu1 %v2668_v22 }
 0x143   : > { %7066 = vmatprep.subr.msk.bf16.mxu1 %vm1396_vm6, %v7065_v59 }
 0x1b4   : > { %v7472_v10 = vpop.f32.mrf.mxu0 }
 0x1b6   : > { %v1514_v21 = vpop.f32.mrf.mxu0 }
 0x1b8   : > { %v7473_v60 = vpop.f32.mrf.mxu0 }
 0x1ba   : > { %v1517_v7 = vpop.f32.mrf.mxu0 }
 0x1bd   : > { %v8717_v2 = vpop.f32.mrf.mxu0 }
 0x1bf   : > { %v1530_v24 = vpop.f32.mrf.mxu0 }
 0x1c1   : > { %v8719_v34 = vpop.f32.mrf.mxu0  ;;  %v7462_v53 = vpop.f32.mrf.mxu1 }
 0x1c2   : > { %v1523_v14 = vadd.f32 %v7472_v10, %v7462_v53 }
 0x1c3   : > { %v1533_v11 = vpop.f32.mrf.mxu0  ;;  %v1434_v62 = vpop.f32.mrf.mxu1 }
 0x1c4   : > { %v1515_v23 = vadd.f32 %v1514_v21, %v1434_v62 }
 0x1c5   : > { %v7492_v1 = vpop.f32.mrf.mxu0  ;;  %v7463_v9 = vpop.f32.mrf.mxu1 }
 0x1c6   : > { %v1526_v16 = vadd.f32 %v7473_v60, %v7463_v9 }
 0x1c7   : > { %v1784_v12 = vpop.f32.mrf.mxu0  ;;  %v1437_v41 = vpop.f32.mrf.mxu1 }
 0x1c8   : > { %v1518_v26 = vadd.f32 %v1517_v7, %v1437_v41 }
 0x1c9   : > { %v8721_v3 = vpop.f32.mrf.mxu1  ;;  %v7493_v25 = vpop.f32.mrf.mxu0 }
 0x1cb   : > { %v1450_v28 = vpop.f32.mrf.mxu1  ;;  %v1787_v63 = vpop.f32.mrf.mxu0 }
 0x1cc   : > { %v1531_v50 = vadd.f32 %v1530_v24, %v1450_v28 }
 0x1cd   : > { %v7467_v47 = vpop.f32.mrf.mxu1  ;;  %v8723_v58 = vpop.f32.mrf.mxu0 }
 0x1cf   : > { %v1453_v20 = vpop.f32.mrf.mxu1  ;;  %v1800_v61 = vpop.f32.mrf.mxu0 }
 0x1d0   : > { %v1534_v7 = vadd.f32 %v1533_v11, %v1453_v20 }
 0x1d1   : > { %v7482_v6 = vpop.f32.mrf.mxu1  ;;  %v8725_v13 = vpop.f32.mrf.mxu0 }
 0x1d2   : > { %v1682_v46 = vadd.f32 %v7482_v6, %v1523_v14 }
 0x1d3   : > { %v1649_v22 = vpop.f32.mrf.mxu1  ;;  %v1803_v4 = vpop.f32.mrf.mxu0 }
 0x1d4   : > { %v1680_v29 = vadd.f32 %v1649_v22, %v1515_v23  ;;  %v1817_v8 = vadd.f32 %v7492_v1, %v1682_v46 }
 0x1d5   : > { %v7483_v49 = vpop.f32.mrf.mxu1  ;;  %v7512_v32 = vpop.f32.mrf.mxu0 }
 0x1d6   : > { %v1683_v5 = vadd.f32 %v7483_v49, %v1526_v16  ;;  %v1815_v51 = vadd.f32 %v1784_v12, %v1680_v29 }
 0x1d7   : > { %v1652_v17 = vpop.f32.mrf.mxu1  ;;  %v2119_v56 = vpop.f32.mrf.mxu0 }
 0x1d8   : > { %v1681_v54 = vadd.f32 %v1652_v17, %v1518_v26  ;;  %v1818_v57 = vadd.f32 %v7493_v25, %v1683_v5 }
 0x1d9   : > { %v8727_v59 = vpop.f32.mrf.mxu1  ;;  %v7513_v33 = vpop.f32.mrf.mxu0 }
 0x1da   : > { %v1816_v60 = vadd.f32 %v1787_v63, %v1681_v54 }
 0x1db   : > { %v1665_v0 = vpop.f32.mrf.mxu1  ;;  %v2122_v15 = vpop.f32.mrf.mxu0 }
 0x1dc   : > { %v1684_v10 = vadd.f32 %v1665_v0, %v1531_v50 }
 0x1dd   : > { %v7487_v36 = vpop.f32.mrf.mxu1  ;;  %v8731_v23 = vpop.f32.mrf.mxu0 }
 0x1de   : > { %v1819_v12 = vadd.f32 %v1800_v61, %v1684_v10 }
 0x1df   : > { %v1668_v18 = vpop.f32.mrf.mxu1  ;;  %v2135_v29 = vpop.f32.mrf.mxu0 }
 0x1e0   : > { %v1685_v26 = vadd.f32 %v1668_v18, %v1534_v7 }
 0x1e1   : > { %v7502_v31 = vpop.f32.mrf.mxu1 }
 0x1e2   : > { %v1959_v53 = vadd.f32 %v7502_v31, %v1817_v8  ;;  %v1820_v8 = vadd.f32 %v1803_v4, %v1685_v26 }
 0x1e3   : > { %v1926_v27 = vpop.f32.mrf.mxu1 }
 0x1e4   : > { %v1957_v19 = vadd.f32 %v1926_v27, %v1815_v51  ;;  %v2152_v5 = vadd.f32 %v7512_v32, %v1959_v53 }
 0x1e5   : > { %v7503_v30 = vpop.f32.mrf.mxu1 }
 0x1e6   : > { %v1960_v62 = vadd.f32 %v7503_v30, %v1818_v57  ;;  %v2150_v14 = vadd.f32 %v2119_v56, %v1957_v19  ;;  %v1542_v57 = vadd.f32 %v8719_v34, %v7467_v47  ;;  %v7024_v19 = vld [vmem:[%s10250_s7] ss:$0 sm:$0xff]  ;;  %v7517_v56 = vpop.f32.mrf.mxu0 }
 0x1e7   : > { %v1929_v45 = vpop.f32.mrf.mxu1 }
 0x1e8   : > { %v1958_v16 = vadd.f32 %v1929_v45, %v1816_v60  ;;  %v2153_v6 = vadd.f32 %v7513_v33, %v1960_v62  ;;  %v1539_v33 = vadd.f32 %v8717_v2, %v8721_v3  ;;  %v1687_v31 = vadd.f32 %v7487_v36, %v1542_v57  ;;  %v2138_v63 = vpop.f32.mrf.mxu0 }
 0x1e9   : > { %v8729_v44 = vpop.f32.mrf.mxu1 }
 0x1ea   : > { %v2151_v27 = vadd.f32 %v2122_v15, %v1958_v16  ;;  %v1822_v47 = vadd.f32 %v8725_v13, %v1687_v31  ;;  %v10400_v16 = vmov 0  }
 0x1eb   : > { %v1942_v35 = vpop.f32.mrf.mxu1 }
 0x1ec   : > { %v1961_v50 = vadd.f32 %v1942_v35, %v1819_v12  ;;  %v1686_v35 = vadd.f32 %v8727_v59, %v1539_v33  ;;  %v7040_v59 = vcombine.low %v8712_v37, %v8712_v37 }
 0x1ed   : > { %v7507_v43 = vpop.f32.mrf.mxu1 }
 0x1ee   : > { %v2154_v25 = vadd.f32 %v2135_v29, %v1961_v50  ;;  %v1821_v3 = vadd.f32 %v8723_v58, %v1686_v35  ;;  %v1964_v49 = vadd.f32 %v7507_v43, %v1822_v47  ;;  %v8749_v58 = vrot.slane %v10400_v16, 4  ;;  %v7846_v35 = vld [vmem:[%s10253_s10] sm:$0xff]  }
 0x1ef   : > { %v1945_v21 = vpop.f32.mrf.mxu1 }
 0x1f0   : > { %v1962_v15 = vadd.f32 %v1945_v21, %v1820_v8  ;;  %v1963_v60 = vadd.f32 %v8729_v44, %v1821_v3  ;;  %v2157_v43 = vadd.f32 %v7517_v56, %v1964_v49  ;;  %v2560_v44 = vsel %vm1396_vm6, %v7040_v59, 0  ;;  %v7869_v3 = vld [vmem:[%s8058_s6 + $0x8] sm:$0xff]   ;;  %v7870_v49 = vld [vmem:[%s8058_s6 + $0x10] sm:$0xff]  }
 0x1f1   : > { %v7522_v9 = vpop.f32.mrf.mxu1 }
 0x1f2   : > { %v2295_v54 = vadd.f32 %v7522_v9, %v2152_v5  ;;  %v2155_v36 = vadd.f32 %v2138_v63, %v1962_v15  ;;  %v7055_v9 = vld [vmem:[%s10251_s8 + $0x20] sm:$0xff]  ;;  %v2156_v29 = vadd.f32 %v8731_v23, %v1963_v60 }
 0x1f3   : > { %v2262_v41 = vpop.f32.mrf.mxu1  ;;  %v7057_v37 = vcombine.high %v7055_v9, %v7055_v9 }
 0x1f4   : > { %v2293_v24 = vadd.f32 %v2262_v41, %v2150_v14  ;;  %v2310_v34 = vadd.f32 %v7024_v19, %v2295_v54 }
 0x1f5   : > { %v7523_v46 = vpop.f32.mrf.mxu1 }
 0x1f6   : > { %v2296_v51 = vadd.f32 %v7523_v46, %v2153_v6  ;;  %v2308_v32 = vadd.f32 %v7024_v19, %v2293_v24  ;;  %v2318_v17 = vmax.f32 %v2310_v34, 0.0  ;;  %v7056_v34 = vcombine.low %v7055_v9, %v7055_v9  ;;  %v8879_v9 = vld [vmem:[%s10255_s12 + $0xc] sm:$0xf] }
 0x1f7   : > { %v2265_v30 = vpop.f32.mrf.mxu1 }
 0x1f8   : > { %v2294_v45 = vadd.f32 %v2265_v30, %v2151_v27  ;;  %v2311_v18 = vadd.f32 %v7024_v19, %v2296_v51  ;;  %v2316_v20 = vmax.f32 %v2308_v32, 0.0 }
 0x1f9   : > { %v7526_v11 = vpop.f32.mrf.mxu1 }
 0x1fa   : > { %v2309_v1 = vadd.f32 %v7024_v19, %v2294_v45  ;;  %v2319_v22 = vmax.f32 %v2311_v18, 0.0  ;;  %v2299_v46 = vadd.f32 %v7526_v11, %v2156_v29  ;;  %v7064_v18 = vcombine.low %v8704_v42, %v8704_v42 }
 0x1fb   : > { %v2278_v4 = vpop.f32.mrf.mxu1 }
 0x1fc   : > { %v2317_v28 = vmax.f32 %v2309_v1, 0.0  ;;  %v2297_v61 = vadd.f32 %v2278_v4, %v2154_v25  ;;  %v2325_v10 = vpack.c.bf16 %v2319_v22, %v2318_v17  ;;  %v2314_v50 = vadd.f32 %v7024_v19, %v2299_v46  ;;  %v7071_v25 = vld [vmem:[%s10251_s8 + $0x30] sm:$0xff]  ;;  %v7871_v17 = vld [vmem:[%s8058_s6 + $0x18] sm:$0xff]  }
 0x1fd   : > { %v7527_v2 = vpop.f32.mrf.mxu1  ;;  %v2878_v15 = vsel %vm1396_vm6, %v7064_v18, 0  ;;  %v2772_v4 = vsel %vm1396_vm6, %v7056_v34, 0  ;;  %v7072_v22 = vcombine.low %v7071_v25, %v7071_v25 }
 0x1fe   : > { %v2324_v21 = vpack.c.bf16 %v2317_v28, %v2316_v20  ;;  %v2312_v53 = vadd.f32 %v7024_v19, %v2297_v61  ;;  %v2334_v6 = vrot.slane %v2325_v10, 4  ;;  %v2300_v5 = vadd.f32 %v7527_v2, %v2157_v43  ;;  %v8872_v10 = vld [vmem:[%s10255_s12 + $0x8] sm:$0xf] }
 0x1ff   : > { %v2281_v0 = vpop.f32.mrf.mxu1  ;;  %v2322_v45 = vmax.f32 %v2314_v50, 0.0  ;;  %v7073_v28 = vcombine.high %v7071_v25, %v7071_v25  ;;  %v2980_v61 = vsel %vm1396_vm6, %v7072_v22, 0 }
 0x200   : > { %v2298_v62 = vadd.f32 %v2281_v0, %v2155_v36  ;;  %v2333_v13 = vrot.slane %v2324_v21, 4  ;;  %v2320_v12 = vmax.f32 %v2312_v53, 0.0  ;;  %v2315_v57 = vadd.f32 %v7024_v19, %v2300_v5  ;;  %v7868_v36 = vld [vmem:[%s8058_s6] sm:$0xff]  }
 0x201   : > { %v3242_v0 = vld [vmem:[%s10255_s12] sm:$0xf]  ;;  %v2510_v60 = vpop.f32.mrf.mxu1 }
 0x202   : > { %v2313_v7 = vadd.f32 %v7024_v19, %v2298_v62  ;;  %v2342_v14 = vsel %vm1396_vm6, 0, %v2333_v13  ;;  %v8760_v27 = vsel %vm1396_vm6, %v2333_v13, %v2334_v6  ;;  %v2323_v30 = vmax.f32 %v2315_v57, 0.0  ;;  %v7100_v62 = vld [vmem:[%s10255_s12 + $0x4] sm:$0xf] }
 0x203   : > { %v2351_v26 = vrot.slane %v2342_v14, 4  ;;  %7036 = vmatmul.mubr.msk.bf16.gmra.mxu1 %vm1383_vm11, %v2342_v14  ;;  %v2353_v23 = vrot.slane %v8760_v27, 4  ;;  %v3343_v21 = vsel %vm1396_vm6, %v3242_v0, 0  ;;  %v3267_v59 = vsel %vm1396_vm6, %v7100_v62, 0  ;;  %v2512_v53 = vpop.f32.mrf.mxu1 }
 0x204   : > { %v2321_v41 = vmax.f32 %v2313_v7, 0.0  ;;  %2528 = vmatprep.mubr.bf16.mxu1 %v10400_v16  ;;  %v2327_v31 = vpack.c.bf16 %v2323_v30, %v2322_v45 }
 0x205   : > { %v2352_v24 = vsel %vm1396_vm6, %v8749_v58, %v2351_v26  ;;  %v2354_v8 = vsel %vm1396_vm6, %v2351_v26, %v2353_v23  ;;  %v2514_v13 = vpop.f32.mrf.mxu1 }
 0x206   : > { %v2326_v51 = vpack.c.bf16 %v2321_v41, %v2320_v12  ;;  %7029 = vmatmul.mubr.msk.bf16.vlgmr.msra.gmra.mxu0 %vm1383_vm11, %v2352_v24  ;;  %v2338_v56 = vrot.slane %v2327_v31, 4 }
 0x207   : > { %2424 = vmatprep.mubr.bf16.mxu0 %v10400_v16  ;;  %2580 = vmatpush1.bf16.msra.mxu0 %v2560_v44  ;;  %v8883_v7 = vpop.f32.mrf.mxu1 }
 0x208   : > { %7058 = vmatprep.subr.msk.bf16.mxu0 %vm1396_vm6, %v7057_v37  ;;  %v2336_v54 = vrot.slane %v2326_v51, 4  ;;  %v2344_v63 = vsel %vm1396_vm6, %v2338_v56, 0 }
 0x209   : > { %v2657_v47 = vrot.slane %v2344_v63, 4 }
 0x20a   : > { %v8771_v33 = vsel %vm1396_vm6, %v2334_v6, %v2336_v54  ;;  %v8782_v11 = vsel %vm1396_vm6, %v2336_v54, %v2338_v56 }
 0x20b   : > { %7037 = vmatmul.mubr.msk.bf16.gmra.mxu1 %vm1383_vm11, %v8760_v27  ;;  %v2355_v19 = vrot.slane %v8771_v33, 4  ;;  %v2357_v1 = vrot.slane %v8782_v11, 4  ;;  %v2868_v2 = vsel %vm1396_vm6, %v2657_v47, %v8749_v58 }
 0x20c   : > { %2538 = vmatprep.mubr.bf16.mxu1 %v10400_v16 }
 0x20d   : > { %v2356_v32 = vsel %vm1396_vm6, %v2353_v23, %v2355_v19  ;;  %v2358_v42 = vsel %vm1396_vm6, %v2355_v19, %v2357_v1  ;;  %v2658_v20 = vsel %vm1396_vm6, %v2357_v1, %v2657_v47 }
 0x20e   : > { %7030 = vmatmul.mubr.msk.bf16.gmra.mxu0 %vm1383_vm11, %v2354_v8 }
 0x20f   : > { %2434 = vmatprep.mubr.bf16.mxu0 %v10400_v16 }
 0x213   : > { %7038 = vmatmul.mubr.msk.bf16.gmra.mxu1 %vm1383_vm11, %v8771_v33 }
 0x214   : > { %2705 = vmatprep.mubr.bf16.mxu1 %v10400_v16 }
 0x216   : > { %7031 = vmatmul.mubr.msk.bf16.gmra.mxu0 %vm1383_vm11, %v2356_v32 }
 0x217   : > { %2444 = vmatprep.mubr.bf16.mxu0 %v10400_v16 }
 0x21b   : > { %7051 = vmatmul.mubr.msk.bf16.vlgmr.msra.gmra.mxu1 %vm1383_vm11, %v2354_v8 }
 0x21c   : > { %2898 = vmatpush1.bf16.msra.mxu1 %v2878_v15  ;;  %2715 = vmatprep.mubr.bf16.mxu1 %v10400_v16 }
 0x21d   : > { %7528 = vmatprep.subr.bf16.mxu1 %v7846_v35 }
 0x21e   : > { %7032 = vmatmul.mubr.msk.bf16.gmra.mxu0 %vm1383_vm11, %v2358_v42 }
 0x21f   : > { %2597 = vmatprep.mubr.bf16.mxu0 %v10400_v16 }
 0x223   : > { %7052 = vmatmul.mubr.msk.bf16.gmra.mxu1 %vm1383_vm11, %v2356_v32 }
 0x224   : > { %2725 = vmatprep.mubr.bf16.mxu1 %v10400_v16 }
 0x226   : > { %7043 = vmatmul.mubr.msk.bf16.vlgmr.msra.gmra.mxu0 %vm1383_vm11, %v2342_v14 }
 0x227   : > { %2607 = vmatprep.mubr.bf16.mxu0 %v10400_v16  ;;  %2792 = vmatpush1.bf16.msra.mxu0 %v2772_v4 }
 0x228   : > { %7074 = vmatprep.subr.msk.bf16.mxu0 %vm1396_vm6, %v7073_v28 }
 0x22b   : > { %7053 = vmatmul.mubr.msk.bf16.gmra.mxu1 %vm1383_vm11, %v2358_v42 }
 0x22c   : > { %2735 = vmatprep.mubr.bf16.mxu1 %v10400_v16 }
 0x22e   : > { %7044 = vmatmul.mubr.msk.bf16.gmra.mxu0 %vm1383_vm11, %v8760_v27 }
 0x22f   : > { %2617 = vmatprep.mubr.bf16.mxu0 %v10400_v16 }
 0x233   : > { %7054 = vmatmul.mubr.msk.bf16.gmra.mxu1 %vm1383_vm11, %v2658_v20 }
 0x234   : > { %2915 = vmatprep.mubr.bf16.mxu1 %v10400_v16 }
 0x236   : > { %7045 = vmatmul.mubr.msk.bf16.gmra.mxu0 %vm1383_vm11, %v8771_v33 }
 0x237   : > { %2627 = vmatprep.mubr.bf16.mxu0 %v10400_v16 }
 0x23b   : > { %7067 = vmatmul.mubr.msk.bf16.vlgmr.msra.gmra.mxu1 %vm1383_vm11, %v2356_v32 }
 0x23c   : > { %7529 = vmatpush3.bf16.msra.mxu1 %v7846_v35  ;;  %2925 = vmatprep.mubr.bf16.mxu1 %v10400_v16 }
 0x23d   : > { %7755 = vmatprep.subr.msk.bf16.mxu1 %vm1396_vm6, %v7100_v62 }
 0x23e   : > { %7046 = vmatmul.mubr.msk.bf16.gmra.mxu0 %vm1383_vm11, %v8782_v11 }
 0x23f   : > { %2809 = vmatprep.mubr.bf16.mxu0 %v10400_v16 }
 0x243   : > { %7068 = vmatmul.mubr.msk.bf16.gmra.mxu1 %vm1383_vm11, %v2358_v42 }
 0x244   : > { %2935 = vmatprep.mubr.bf16.mxu1 %v10400_v16 }
 0x246   : > { %7059 = vmatmul.mubr.msk.bf16.vlgmr.msra.gmra.mxu0 %vm1383_vm11, %v8760_v27 }
 0x247   : > { %2819 = vmatprep.mubr.bf16.mxu0 %v10400_v16  ;;  %3000 = vmatpush1.bf16.msra.mxu0 %v2980_v61 }
 0x248   : > { %7756 = vmatprep.subr.msk.bf16.mxu0 %vm1396_vm6, %v3242_v0 }
 0x24b   : > { %7069 = vmatmul.mubr.msk.bf16.gmra.mxu1 %vm1383_vm11, %v2658_v20 }
 0x24c   : > { %2945 = vmatprep.mubr.bf16.mxu1 %v10400_v16 }
 0x24e   : > { %7060 = vmatmul.mubr.msk.bf16.gmra.mxu0 %vm1383_vm11, %v8771_v33 }
 0x24f   : > { %2829 = vmatprep.mubr.bf16.mxu0 %v10400_v16 }
 0x253   : > { %7070 = vmatmul.mubr.msk.bf16.gmra.mxu1 %vm1383_vm11, %v2868_v2 }
 0x254   : > { %7530 = vmatprep.mubr.msk.bf16.mxu1 %vm10401_vm0, %v7868_v36 }
 0x256   : > { %7061 = vmatmul.mubr.msk.bf16.gmra.mxu0 %vm1383_vm11, %v8782_v11 }
 0x257   : > { %2839 = vmatprep.mubr.bf16.mxu0 %v10400_v16 }
 0x25b   : > { %7531 = vmatmul.mubr.msk.bf16.vlgmr.msra.gmra.mxu1 %vm10402_vm15, %v7869_v3 }
 0x25c   : > { %7534 = vmatprep.mubr.msk.bf16.mxu1 %vm10403_vm3, %v7870_v49  ;;  %7539 = vmatpush3.bf16.msra.mxu1 %v3267_v59 }
 0x25d   : > { %7757 = vmatprep.subr.msk.bf16.mxu1 %vm1396_vm6, %v8872_v10 }
 0x25e   : > { %7062 = vmatmul.mubr.msk.bf16.gmra.mxu0 %vm1383_vm11, %v2344_v63 }
 0x25f   : > { %3017 = vmatprep.mubr.bf16.mxu0 %v10400_v16 }
 0x263   : > { %7535 = vmatmul.mubr.msk.bf16.gmra.mxu1 %vm10404_vm1, %v7871_v17 }
 0x266   : > { %7075 = vmatmul.mubr.msk.bf16.vlgmr.msra.gmra.mxu0 %vm1383_vm11, %v8771_v33 }
 0x267   : > { %3027 = vmatprep.mubr.bf16.mxu0 %v10400_v16  ;;  %7549 = vmatpush3.bf16.msra.mxu0 %v3343_v21 }
 0x268   : > { %7758 = vmatprep.subr.msk.bf16.mxu0 %vm1396_vm6, %v8879_v9 }
 0x26e   : > { %7076 = vmatmul.mubr.msk.bf16.gmra.mxu0 %vm1383_vm11, %v8782_v11 }
 0x26f   : > { %3037 = vmatprep.mubr.bf16.mxu0 %v10400_v16 }
 0x276   : > { %7077 = vmatmul.mubr.msk.bf16.gmra.mxu0 %vm1383_vm11, %v2344_v63 }
 0x277   : > { %3047 = vmatprep.mubr.bf16.mxu0 %v10400_v16 }
 0x27e   : > { %3048 = vmatmul.mubr.bf16.gmra.mxu0 %v10400_v16 }
 0x27f   : > { %7550 = vmatprep.mubr.bf16.mxu0 %v10400_v16 }
 0x2c3   : > { %v2520_v43 = vpop.f32.mrf.mxu1 }
 0x2c5   : > { %v2522_v14 = vpop.f32.mrf.mxu1 }
 0x2c6   : > { %v2416_v41 = vpop.f32.mrf.mxu0 }
 0x2c7   : > { %v2524_v26 = vpop.f32.mrf.mxu1  ;;  %v2511_v36 = vadd.f32 %v2510_v60, %v2416_v41 }
 0x2c8   : > { %v2418_v44 = vpop.f32.mrf.mxu0 }
 0x2c9   : > { %v8885_v37 = vpop.f32.mrf.mxu1  ;;  %v2513_v17 = vadd.f32 %v2512_v53, %v2418_v44 }
 0x2ca   : > { %v2420_v6 = vpop.f32.mrf.mxu0 }
 0x2cb   : > { %v2530_v29 = vpop.f32.mrf.mxu1  ;;  %v2515_v59 = vadd.f32 %v2514_v13, %v2420_v6 }
 0x2cc   : > { %v8887_v12 = vpop.f32.mrf.mxu0 }
 0x2cd   : > { %v2532_v5 = vpop.f32.mrf.mxu1  ;;  %v2517_v48 = vadd.f32 %v8883_v7, %v8887_v12  ;;  %v3074_v12 = vld [vmem:[%s10252_s9] sm:$0x3] }
 0x2ce   : > { %v2426_v24 = vpop.f32.mrf.mxu0 }
 0x2cf   : > { %v2521_v46 = vadd.f32 %v2520_v43, %v2426_v24  ;;  %v2534_v51 = vpop.f32.mrf.mxu1 }
 0x2d0   : > { %v2428_v27 = vpop.f32.mrf.mxu0 }
 0x2d1   : > { %v2523_v57 = vadd.f32 %v2522_v14, %v2428_v27  ;;  %v8889_v23 = vpop.f32.mrf.mxu1 }
 0x2d2   : > { %v2430_v50 = vpop.f32.mrf.mxu0 }
 0x2d3   : > { %v2525_v54 = vadd.f32 %v2524_v26, %v2430_v50  ;;  %v2540_v30 = vpop.f32.mrf.mxu1 }
 0x2d4   : > { %v8891_v8 = vpop.f32.mrf.mxu0 }
 0x2d5   : > { %v2542_v45 = vpop.f32.mrf.mxu1 }
 0x2d6   : > { %v2436_v33 = vpop.f32.mrf.mxu0 }
 0x2d7   : > { %v2531_v31 = vadd.f32 %v2530_v29, %v2436_v33  ;;  %v2544_v19 = vpop.f32.mrf.mxu1 }
 0x2d8   : > { %v2438_v56 = vpop.f32.mrf.mxu0 }
 0x2d9   : > { %v2533_v32 = vadd.f32 %v2532_v5, %v2438_v56  ;;  %v8893_v18 = vpop.f32.mrf.mxu1 }
 0x2da   : > { %v2440_v11 = vpop.f32.mrf.mxu0 }
 0x2db   : > { %v2535_v15 = vadd.f32 %v2534_v51, %v2440_v11  ;;  %v2707_v1 = vpop.f32.mrf.mxu1 }
 0x2dc   : > { %v8895_v35 = vpop.f32.mrf.mxu0 }
 0x2dd   : > { %v2709_v42 = vpop.f32.mrf.mxu1 }
 0x2de   : > { %v2446_v34 = vpop.f32.mrf.mxu0 }
 0x2df   : > { %v2541_v25 = vadd.f32 %v2540_v30, %v2446_v34  ;;  %v2711_v4 = vpop.f32.mrf.mxu1 }
 0x2e0   : > { %v2448_v28 = vpop.f32.mrf.mxu0 }
 0x2e1   : > { %v2543_v63 = vadd.f32 %v2542_v45, %v2448_v28  ;;  %v8897_v47 = vpop.f32.mrf.mxu1 }
 0x2e2   : > { %v2450_v20 = vpop.f32.mrf.mxu0 }
 0x2e3   : > { %v2545_v22 = vadd.f32 %v2544_v19, %v2450_v20  ;;  %v2717_v61 = vpop.f32.mrf.mxu1 }
 0x2e4   : > { %v8899_v2 = vpop.f32.mrf.mxu0 }
 0x2e5   : > { %v2719_v3 = vpop.f32.mrf.mxu1 }
 0x2e6   : > { %v2599_v49 = vpop.f32.mrf.mxu0 }
 0x2e7   : > { %v2638_v0 = vadd.f32 %v2599_v49, %v2511_v36  ;;  %v2721_v21 = vpop.f32.mrf.mxu1 }
 0x2e8   : > { %v2601_v62 = vpop.f32.mrf.mxu0 }
 0x2e9   : > { %v2639_v43 = vadd.f32 %v2601_v62, %v2513_v17  ;;  %v8901_v14 = vpop.f32.mrf.mxu1  ;;  %v8903_v26 = vadd.f32 %v2707_v1, %v2638_v0 }
 0x2ea   : > { %v2603_v29 = vpop.f32.mrf.mxu0 }
 0x2eb   : > { %v2640_v5 = vadd.f32 %v2603_v29, %v2515_v59  ;;  %v2727_v24 = vpop.f32.mrf.mxu1  ;;  %v8905_v51 = vadd.f32 %v2709_v42, %v2639_v43 }
 0x2ec   : > { %v8907_v27 = vpop.f32.mrf.mxu0 }
 0x2ed   : > { %v2729_v60 = vpop.f32.mrf.mxu1  ;;  %v8909_v41 = vadd.f32 %v2711_v4, %v2640_v5 }
 0x2ee   : > { %v2609_v53 = vpop.f32.mrf.mxu0 }
 0x2ef   : > { %v2642_v44 = vadd.f32 %v2609_v53, %v2521_v46  ;;  %v2731_v50 = vpop.f32.mrf.mxu1 }
 0x2f0   : > { %v2611_v30 = vpop.f32.mrf.mxu0 }
 0x2f1   : > { %v2643_v13 = vadd.f32 %v2611_v30, %v2523_v57  ;;  %v8911_v6 = vpop.f32.mrf.mxu1  ;;  %v8913_v45 = vadd.f32 %v2717_v61, %v2642_v44 }
 0x2f2   : > { %v2613_v33 = vpop.f32.mrf.mxu0 }
 0x2f3   : > { %v2644_v19 = vadd.f32 %v2613_v33, %v2525_v54  ;;  %v2737_v56 = vpop.f32.mrf.mxu1  ;;  %v8915_v11 = vadd.f32 %v2719_v3, %v2643_v13 }
 0x2f4   : > { %v8917_v1 = vpop.f32.mrf.mxu0 }
 0x2f5   : > { %v2739_v42 = vpop.f32.mrf.mxu1  ;;  %v8919_v34 = vadd.f32 %v2721_v21, %v2644_v19 }
 0x2f6   : > { %v2619_v4 = vpop.f32.mrf.mxu0 }
 0x2f7   : > { %v2646_v28 = vadd.f32 %v2619_v4, %v2531_v31  ;;  %v2741_v46 = vpop.f32.mrf.mxu1 }
 0x2f8   : > { %v2621_v20 = vpop.f32.mrf.mxu0 }
 0x2f9   : > { %v2647_v36 = vadd.f32 %v2621_v20, %v2533_v32  ;;  %v8921_v57 = vpop.f32.mrf.mxu1  ;;  %v8923_v49 = vadd.f32 %v2727_v24, %v2646_v28 }
 0x2fa   : > { %10405 = vst [vmem:[#allocation34_spill] sm:$0xff] %v8921_v57  ;;  %v2623_v61 = vpop.f32.mrf.mxu0 }
 0x2fb   : > { %v2648_v17 = vadd.f32 %v2623_v61, %v2535_v15  ;;  %v8925_v54 = vpop.f32.mrf.mxu1  ;;  %v8927_v3 = vadd.f32 %v2729_v60, %v2647_v36 }
 0x2fc   : > { %v8929_v0 = vpop.f32.mrf.mxu0 }
 0x2fd   : > { %v8931_v62 = vpop.f32.mrf.mxu1  ;;  %v8933_v21 = vadd.f32 %v2731_v50, %v2648_v17 }
 0x2fe   : > { %v2629_v31 = vpop.f32.mrf.mxu0 }
 0x2ff   : > { %v2650_v59 = vadd.f32 %v2629_v31, %v2541_v25  ;;  %v8935_v43 = vpop.f32.mrf.mxu1 }
 0x300   : > { %v2631_v32 = vpop.f32.mrf.mxu0 }
 0x301   : > { %v2651_v29 = vadd.f32 %v2631_v32, %v2543_v63  ;;  %v8937_v5 = vpop.f32.mrf.mxu1  ;;  %v8939_v24 = vadd.f32 %v2737_v56, %v2650_v59 }
 0x302   : > { %v2633_v15 = vpop.f32.mrf.mxu0 }
 0x303   : > { %10406 = vst [vmem:[#allocation35_spill] sm:$0xff] %v8939_v24  ;;  %v2652_v53 = vadd.f32 %v2633_v15, %v2545_v22  ;;  %v8941_v60 = vpop.f32.mrf.mxu1  ;;  %v8943_v44 = vadd.f32 %v2739_v42, %v2651_v29 }
 0x304   : > { %v8945_v30 = vpop.f32.mrf.mxu0 }
 0x305   : > { %10407 = vst [vmem:[#allocation36_spill] sm:$0xff] %v8943_v44  ;;  %10408 = vst [vmem:[#allocation37_spill] sm:$0xff] %v8945_v30  ;;  %v8947_v50 = vpop.f32.mrf.mxu1  ;;  %v8949_v13 = vadd.f32 %v2741_v46, %v2652_v53 }
 0x306   : > { %v2811_v25 = vpop.f32.mrf.mxu0 }
 0x307   : > { %10409 = vst [vmem:[#allocation38_spill] sm:$0xff] %v8949_v13  ;;  %v8951_v33 = vpop.f32.mrf.mxu1 }
 0x308   : > { %v2813_v63 = vpop.f32.mrf.mxu0 }
 0x309   : > { %v8953_v19 = vpop.f32.mrf.mxu1 }
 0x30a   : > { %v2815_v56 = vpop.f32.mrf.mxu0 }
 0x30b   : > { %v8955_v4 = vpop.f32.mrf.mxu1 }
 0x30c   : > { %v2817_v22 = vpop.f32.mrf.mxu0 }
 0x30d   : > { %v8957_v28 = vpop.f32.mrf.mxu1 }
 0x30e   : > { %v2821_v42 = vpop.f32.mrf.mxu0 }
 0x30f   : > { %v8959_v20 = vpop.f32.mrf.mxu1 }
 0x310   : > { %10410 = vst [vmem:[#allocation39_spill] sm:$0xff] %v8959_v20  ;;  %v2823_v36 = vpop.f32.mrf.mxu0 }
 0x311   : > { %v8961_v61 = vpop.f32.mrf.mxu1 }
 0x312   : > { %10411 = vst [vmem:[#allocation40_spill] sm:$0xff] %v8961_v61  ;;  %v8963_v46 = vpop.f32.mrf.mxu0 }
 0x313   : > { %v8965_v17 = vpop.f32.mrf.mxu1 }
 0x314   : > { %10412 = vst [vmem:[#allocation41_spill] sm:$0xff] %v8965_v17  ;;  %v8967_v31 = vpop.f32.mrf.mxu0 }
 0x315   : > { %v8969_v59 = vpop.f32.mrf.mxu1 }
 0x316   : > { %10413 = vst [vmem:[#allocation42_spill] sm:$0xff] %v8969_v59  ;;  %v8971_v32 = vpop.f32.mrf.mxu0  ;;  %v2641_v59 = vadd.f32 %v8907_v27, %v2517_v48  ;;  %v2850_v48 = vadd.f32 %v2811_v25, %v8903_v26 }
 0x317   : > { %v8973_v29 = vpop.f32.mrf.mxu1 }
 0x318   : > { %10414 = vst [vmem:[#allocation43_spill] sm:$0xff] %v8973_v29  ;;  %v8975_v15 = vpop.f32.mrf.mxu0 }
 0x319   : > { %v8977_v53 = vpop.f32.mrf.mxu1 }
 0x31a   : > { %10415 = vst [vmem:[#allocation44_spill] sm:$0xff] %v8977_v53  ;;  %v8979_v39 = vpop.f32.mrf.mxu0  ;;  %v2527_v53 = vadd.f32 %v8885_v37, %v8891_v8 }
 0x31b   : > { %v7532_v52 = vpop.f32.mrf.mxu1 }
 0x31c   : > { %v8986_v16 = vpop.f32.mrf.mxu0  ;;  %v3193_v29 = vadd.f32 %v7532_v52, %v7094_v38  ;;  %v2645_v20 = vadd.f32 %v8917_v1, %v2527_v53  ;;  %v2749_v52 = vadd.f32 %v8897_v47, %v2641_v59  ;;  %v9009_v1 = vrot.slane %v3074_v12, %v8534_v40 }
 0x31d   : > { %10416 = vst [vmem:[#allocation45_spill] sm:$0xff] %v8986_v16  ;;  %v3184_v17 = vpop.f32.mrf.mxu1  ;;  %v9006_v16 = vrot.slane %v3074_v12, %v8524_v55  ;;  %v3500_v59 = vsel %vm1396_vm6, %v8879_v9, 0 }
 0x31e   : > { %v8989_v57 = vpop.f32.mrf.mxu0  ;;  %v3185_v61 = vadd.f32 %v7094_v38, %v3184_v17  ;;  %v3217_v24 = vmax.f32 %v3193_v29, 0.0 }
 0x31f   : > { %10417 = vst [vmem:[#allocation46_spill] sm:$0xff] %v8989_v57  ;;  %v7533_v13 = vpop.f32.mrf.mxu1  ;;  %v2851_v57 = vadd.f32 %v2813_v63, %v8905_v51 }
 0x320   : > { %v3196_v44 = vadd.f32 %v7533_v13, %v7094_v38  ;;  %v8993_v7 = vpop.f32.mrf.mxu0  ;;  %v2852_v13 = vadd.f32 %v2815_v56, %v8909_v41  ;;  %v3215_v26 = vmax.f32 %v3185_v61, 0.0  ;;  %v2854_v41 = vadd.f32 %v2821_v42, %v8913_v45 }
 0x321   : > { %10418 = vst [vmem:[#allocation47_spill] sm:$0xff] %v8993_v7  ;;  %v3187_v27 = vpop.f32.mrf.mxu1  ;;  %v2853_v7 = vadd.f32 %v2817_v22, %v2749_v52  ;;  %v2956_v22 = vadd.f32 %v8925_v54, %v2850_v48  ;;  %v2753_v61 = vadd.f32 %v8901_v14, %v2645_v20  ;;  %v2957_v12 = vadd.f32 %v8931_v62, %v2851_v57 }
 0x322   : > { %v3218_v37 = vmax.f32 %v3196_v44, 0.0  ;;  %v3188_v8 = vadd.f32 %v7094_v38, %v3187_v27  ;;  %v9002_v17 = vpop.f32.mrf.mxu0  ;;  %v9017_v44 = vsel %vm1396_vm6, %v8872_v10, 0  ;;  %v2855_v10 = vadd.f32 %v2823_v36, %v8915_v11 }
 0x323   : > { %v7536_v30 = vpop.f32.mrf.mxu1  ;;  %v2959_v54 = vadd.f32 %v8937_v5, %v2853_v7  ;;  %v2960_v57 = vadd.f32 %v8941_v60, %v2854_v41  ;;  %v9042_v7 = vld [vmem:[%s10255_s12 + $0x14] sm:$0xf] }
 0x324   : > { %v9011_v47 = vpack.c.bf16 %v3218_v37, %v3217_v24  ;;  %v3216_v25 = vmax.f32 %v3188_v8, 0.0  ;;  %v9013_v51 = vpop.f32.mrf.mxu0  ;;  %v3209_v63 = vadd.f32 %v7536_v30, %v7094_v38  ;;  %v2537_v24 = vadd.f32 %v8889_v23, %v8895_v35 }
 0x325   : > { %v3200_v56 = vpop.f32.mrf.mxu1  ;;  %v2958_v30 = vadd.f32 %v8935_v43, %v2852_v13 }
 0x326   : > { %v3223_v29 = vpack.c.bf16 %v3216_v25, %v3215_v26  ;;  %v3019_v53 = vpop.f32.mrf.mxu0  ;;  %v3232_v42 = vrot.slane %v9011_v47, 4  ;;  %v3201_v48 = vadd.f32 %v7094_v38, %v3200_v56  ;;  %v3221_v35 = vmax.f32 %v3209_v63, 0.0 }
 0x327   : > { %v3058_v52 = vadd.f32 %v3019_v53, %v2956_v22  ;;  %v7537_v45 = vpop.f32.mrf.mxu1  ;;  %v2856_v56 = vadd.f32 %v8963_v46, %v8919_v34 }
 0x328   : > { %v3231_v9 = vrot.slane %v3223_v29, 4  ;;  %v3212_v27 = vadd.f32 %v7537_v45, %v7094_v38  ;;  %v3021_v23 = vpop.f32.mrf.mxu0 }
 0x329   : > { %v3086_v14 = vadd.f32 %v9006_v16, %v3058_v52  ;;  %v3059_v20 = vadd.f32 %v3021_v23, %v2957_v12  ;;  %v3203_v37 = vpop.f32.mrf.mxu1  ;;  %v2857_v12 = vadd.f32 %v8967_v31, %v2753_v61  ;;  %v9071_v31 = vld [vmem:[%s10255_s12 + $0x10] sm:$0xf]  ;;  %v2649_v61 = vadd.f32 %v8929_v0, %v2537_v24 }
 0x32a   : > { %v9034_v11 = vsel %vm1396_vm6, 0, %v3231_v9  ;;  %v3222_v62 = vmax.f32 %v3212_v27, 0.0  ;;  %v3204_v43 = vadd.f32 %v7094_v38, %v3203_v37  ;;  %v3023_v36 = vpop.f32.mrf.mxu0  ;;  %v9037_v5 = vsel %vm1396_vm6, %v3231_v9, %v3232_v42 }
 0x32b   : > { %v3102_v8 = vmax.f32 %v3086_v14, 0.0  ;;  %v3087_v13 = vadd.f32 %v9009_v1, %v3059_v20  ;;  %v3060_v26 = vadd.f32 %v3023_v36, %v2958_v30  ;;  %7551 = vmatmul.mubr.msk.bf16.vlgmr.msra.gmra.mxu0 %vm1383_vm11, %v9034_v11  ;;  %v3248_v60 = vrot.slane %v9037_v5, 4 }
 0x32c   : > { %v3219_v38 = vmax.f32 %v3201_v48, 0.0  ;;  %v9048_v47 = vpack.c.bf16 %v3222_v62, %v3221_v35  ;;  %v3220_v25 = vmax.f32 %v3204_v43, 0.0  ;;  %v3025_v41 = vpop.f32.mrf.mxu0  ;;  %7554 = vmatprep.mubr.msk.bf16.mxu0 %vm1383_vm11, %v9037_v5  ;;  %v3246_v63 = vrot.slane %v9034_v11, 4  ;;  %7569 = vmatpush3.bf16.msra.mxu0 %v3500_v59 }
 0x32d   : > { %7078 = vst [vmem:[%s8588_s27 + $0x80] sm:$0xff] %v3102_v8  ;;  %v3103_v22 = vmax.f32 %v3087_v13, 0.0  ;;  %v3088_v29 = vadd.f32 %v9006_v16, %v3060_v26  ;;  %v3061_v53 = vadd.f32 %v3025_v41, %v2959_v54  ;;  %7760 = vmatprep.subr.msk.bf16.mxu0 %vm1396_vm6, %v9042_v7  ;;  %v2961_v54 = vadd.f32 %v8947_v50, %v2855_v10 }
 0x32e   : > { %v3225_v52 = vpack.c.bf16 %v3220_v25, %v3219_v38  ;;  %v3029_v45 = vpop.f32.mrf.mxu0  ;;  %v3247_v30 = vsel %vm1396_vm6, %v8749_v58, %v3246_v63  ;;  %v3249_v59 = vsel %vm1396_vm6, %v3246_v63, %v3248_v60  ;;  %v2858_v48 = vadd.f32 %v8971_v32, %v8923_v49  ;;  %v10419_v38 = vld [vmem:[#allocation45_spill] sm:$0xff] }
 0x32f   : > { %7079 = vst.msk [vmem:[%s8588_s27 + $0x88] sm:$0xff] %vm1112_vm7, %v3103_v22  ;;  %v3104_v34 = vmax.f32 %v3088_v29, 0.0  ;;  %v3089_v46 = vadd.f32 %v9009_v1, %v3061_v53  ;;  %v3062_v9 = vadd.f32 %v3029_v45, %v2960_v57  ;;  %7540 = vmatprep.mubr.msk.bf16.mxu1 %vm1383_vm11, %v3247_v30  ;;  %v3236_v27 = vrot.slane %v9048_v47, 4  ;;  %v10422_v22 = vld [vmem:[#allocation46_spill] sm:$0xff]  ;;  %v10423_v30 = vld [vmem:[#allocation39_spill] sm:$0xff] }
 0x330   : > { %v3234_v23 = vrot.slane %v3225_v52, 4  ;;  %7541 = vmatmul.mubr.msk.bf16.vlgmr.msra.gmra.mxu1 %vm1383_vm11, %v3249_v59  ;;  %v3031_v35 = vpop.f32.mrf.mxu0  ;;  %v2962_v20 = vadd.f32 %v8951_v33, %v2856_v56  ;;  %v2859_v0 = vadd.f32 %v8975_v15, %v8927_v3  ;;  %v2963_v37 = vadd.f32 %v8953_v19, %v2857_v12  ;;  %v10421_v56 = vld [vmem:[#allocation35_spill] sm:$0xff] }
 0x331   : > { %7080 = vst [vmem:[%s8588_s27 + $0x90] sm:$0xff] %v3104_v34  ;;  %v3105_v14 = vmax.f32 %v3089_v46, 0.0  ;;  %v3090_v50 = vadd.f32 %v9006_v16, %v3062_v9  ;;  %7559 = vmatpush3.bf16.msra.mxu1 %v9017_v44  ;;  %v3063_v10 = vadd.f32 %v3031_v35, %v2961_v54  ;;  %v2757_v57 = vadd.f32 %v8911_v6, %v2649_v61  ;;  %v10424_v34 = vld [vmem:[#allocation36_spill] sm:$0xff]  ;;  %v10425_v46 = vld [vmem:[#allocation47_spill] sm:$0xff] }
 0x332   : > { %v9087_v49 = vsel %vm1396_vm6, %v3234_v23, %v3236_v27  ;;  %v3033_v32 = vpop.f32.mrf.mxu0  ;;  %v9090_v24 = vsel %vm1396_vm6, %v3232_v42, %v3234_v23  ;;  %7759 = vmatprep.subr.msk.bf16.mxu1 %vm1396_vm6, %v9071_v31  ;;  %v2860_v42 = vadd.f32 %v8979_v39, %v8933_v21  ;;  %v2964_v62 = vadd.f32 %v8955_v4, %v2858_v48  ;;  %v10426_v23 = vld [vmem:[#allocation40_spill] sm:$0xff] }
 0x333   : > { %7081 = vst.msk [vmem:[%s8588_s27 + $0x98] sm:$0xff] %vm1112_vm7, %v3105_v14  ;;  %v3106_v33 = vmax.f32 %v3090_v50, 0.0  ;;  %v3091_v3 = vadd.f32 %v9009_v1, %v3063_v10  ;;  %v3064_v15 = vadd.f32 %v3033_v32, %v2962_v20  ;;  %7555 = vmatmul.mubr.msk.bf16.gmra.mxu0 %vm1383_vm11, %v9090_v24  ;;  %v3250_v44 = vrot.slane %v9090_v24, 4  ;;  %v10427_v14 = vld [vmem:[#allocation38_spill] sm:$0xff] }
 0x334   : > { %v3035_v19 = vpop.f32.mrf.mxu0  ;;  %7570 = vmatprep.mubr.msk.bf16.mxu0 %vm1383_vm11, %v3249_v59  ;;  %v3252_v43 = vrot.slane %v9087_v49, 4  ;;  %v2547_v39 = vadd.f32 %v8893_v18, %v8899_v2  ;;  %v2965_v4 = vadd.f32 %v8957_v28, %v2859_v0  ;;  %v2861_v25 = vadd.f32 %v10419_v38, %v2757_v57  ;;  %v10420_v2 = vld [vmem:[#allocation37_spill] sm:$0xff]  ;;  %v10428_v50 = vld [vmem:[#allocation34_spill] sm:$0xff] }
 0x335   : > { %7082 = vst [vmem:[%s8588_s27 + $0xa0] sm:$0xff] %v3106_v33  ;;  %v3107_v36 = vmax.f32 %v3091_v3, 0.0  ;;  %v3092_v8 = vadd.f32 %v9006_v16, %v3064_v15  ;;  %v3065_v13 = vadd.f32 %v3035_v19, %v2963_v37  ;;  %v9110_v26 = vsel %vm1396_vm6, %v3248_v60, %v3250_v44  ;;  %v10429_v0 = vld [vmem:[#allocation41_spill] sm:$0xff] }
 0x336   : > { %v3039_v6 = vpop.f32.mrf.mxu0  ;;  %7544 = vmatprep.mubr.msk.bf16.mxu1 %vm1383_vm11, %v9110_v26  ;;  %v9119_v21 = vsel %vm1396_vm6, %v3250_v44, %v3252_v43  ;;  %v2653_v63 = vadd.f32 %v10420_v2, %v2547_v39  ;;  %v2862_v29 = vadd.f32 %v10422_v22, %v10421_v56  ;;  %v3662_v28 = vsel %vm1396_vm6, %v9042_v7, 0  ;;  %v10432_v2 = vld [vmem:[#allocation44_spill] sm:$0xff] }
 0x337   : > { %7083 = vst.msk [vmem:[%s8588_s27 + $0xa8] sm:$0xff] %vm1112_vm7, %v3107_v36  ;;  %v3108_v60 = vmax.f32 %v3092_v8, 0.0  ;;  %v3093_v41 = vadd.f32 %v9009_v1, %v3065_v13  ;;  %v3066_v18 = vadd.f32 %v3039_v6, %v2964_v62  ;;  %v2966_v59 = vadd.f32 %v10423_v30, %v2860_v42  ;;  %v10430_v42 = vld [vmem:[#allocation42_spill] sm:$0xff]  ;;  %v7128_v36 = vld [vmem:[%s10255_s12 + $0x18] sm:$0xf]  ;;  %v10431_v6 = vld [vmem:[#allocation43_spill] sm:$0xff] }
 0x338   : > { %7545 = vmatmul.mubr.msk.bf16.gmra.mxu1 %vm1383_vm11, %v9119_v21  ;;  %v3041_v53 = vpop.f32.mrf.mxu0  ;;  %v2863_v9 = vadd.f32 %v10425_v46, %v10424_v34  ;;  %v2967_v35 = vadd.f32 %v10426_v23, %v2861_v25  ;;  %v2761_v10 = vadd.f32 %v10428_v50, %v2653_v63  ;;  %v2968_v32 = vadd.f32 %v10429_v0, %v2862_v29 }
 0x339   : > { %7084 = vst [vmem:[%s8588_s27 + $0xb0] sm:$0xff] %v3108_v60  ;;  %v3109_v12 = vmax.f32 %v3093_v41, 0.0  ;;  %v3094_v52 = vadd.f32 %v9006_v16, %v3066_v18  ;;  %v3067_v45 = vadd.f32 %v3041_v53, %v2965_v4  ;;  %7560 = vmatprep.mubr.msk.bf16.mxu1 %vm1383_vm11, %v9034_v11  ;;  %v2864_v11 = vadd.f32 %v9002_v17, %v10427_v14 }
 0x33a   : > { %v3043_v54 = vpop.f32.mrf.mxu0  ;;  %v3241_v37 = vsel %vm1396_vm6, %v3236_v27, 0  ;;  %v3580_v44 = vsel %vm1396_vm6, %v9071_v31, 0  ;;  %v2969_v57 = vadd.f32 %v10430_v42, %v2863_v9  ;;  %v2865_v19 = vadd.f32 %v9013_v51, %v2761_v10 }
 0x33b   : > { %7085 = vst.msk [vmem:[%s8588_s27 + $0xb8] sm:$0xff] %vm1112_vm7, %v3109_v12  ;;  %v3110_v61 = vmax.f32 %v3094_v52, 0.0  ;;  %v3095_v7 = vadd.f32 %v9009_v1, %v3067_v45  ;;  %v3068_v48 = vadd.f32 %v3043_v54, %v2966_v59  ;;  %7571 = vmatmul.mubr.msk.bf16.vlgmr.msra.gmra.mxu0 %vm1383_vm11, %v9110_v26  ;;  %v3494_v8 = vrot.slane %v3241_v37, 4  ;;  %v9235_v45 = vld [vmem:[%s10257_s14 + $0xc] sm:$0xf] }
 0x33c   : > { %v3045_v20 = vpop.f32.mrf.mxu0  ;;  %7574 = vmatprep.mubr.msk.bf16.mxu0 %vm1383_vm11, %v9119_v21  ;;  %7589 = vmatpush3.bf16.msra.mxu0 %v3662_v28  ;;  %v2970_v4 = vadd.f32 %v10431_v6, %v2864_v11  ;;  %v2971_v63 = vadd.f32 %v10432_v2, %v2865_v19 }
 0x33d   : > { %7086 = vst [vmem:[%s8588_s27 + $0xc0] sm:$0xff] %v3110_v61  ;;  %v3111_v33 = vmax.f32 %v3095_v7, 0.0  ;;  %v3096_v3 = vadd.f32 %v9006_v16, %v3068_v48  ;;  %v3069_v15 = vadd.f32 %v3045_v20, %v2967_v35  ;;  %v3495_v25 = vsel %vm1396_vm6, %v3252_v43, %v3494_v8 }
 0x33e   : > { %v3049_v17 = vpop.f32.mrf.mxu0 }
 0x33f   : > { %7087 = vst.msk [vmem:[%s8588_s27 + $0xc8] sm:$0xff] %vm1112_vm7, %v3111_v33  ;;  %v3112_v62 = vmax.f32 %v3096_v3, 0.0  ;;  %v3097_v47 = vadd.f32 %v9009_v1, %v3069_v15  ;;  %v3070_v27 = vadd.f32 %v3049_v17, %v2968_v32 }
 0x340   : > { %7561 = vmatmul.mubr.msk.bf16.vlgmr.msra.gmra.mxu1 %vm1383_vm11, %v9037_v5  ;;  %v3051_v31 = vpop.f32.mrf.mxu0 }
 0x341   : > { %7088 = vst [vmem:[%s8588_s27 + $0xd0] sm:$0xff] %v3112_v62  ;;  %v3113_v13 = vmax.f32 %v3097_v47, 0.0  ;;  %v3098_v51 = vadd.f32 %v9006_v16, %v3070_v27  ;;  %7579 = vmatpush3.bf16.msra.mxu1 %v3580_v44  ;;  %v3071_v39 = vadd.f32 %v3051_v31, %v2969_v57  ;;  %7564 = vmatprep.mubr.msk.bf16.mxu1 %vm1383_vm11, %v9090_v24 }
 0x342   : > { %v3053_v38 = vpop.f32.mrf.mxu0  ;;  %7761 = vmatprep.subr.msk.bf16.mxu1 %vm1396_vm6, %v7128_v36 }
 0x343   : > { %7089 = vst.msk [vmem:[%s8588_s27 + $0xd8] sm:$0xff] %vm1112_vm7, %v3113_v13  ;;  %v3114_v60 = vmax.f32 %v3098_v51, 0.0  ;;  %v3099_v41 = vadd.f32 %v9009_v1, %v3071_v39  ;;  %v3072_v18 = vadd.f32 %v3053_v38, %v2970_v4  ;;  %7575 = vmatmul.mubr.msk.bf16.gmra.mxu0 %vm1383_vm11, %v3495_v25 }
 0x344   : > { %v3055_v56 = vpop.f32.mrf.mxu0  ;;  %7590 = vmatprep.mubr.msk.bf16.mxu0 %vm1383_vm11, %v9110_v26  ;;  %v7133_v26 = vld [vmem:[%s10257_s14 + $0x4] sm:$0xf] }
 0x345   : > { %7090 = vst [vmem:[%s8588_s27 + $0xe0] sm:$0xff] %v3114_v60  ;;  %v3115_v43 = vmax.f32 %v3099_v41, 0.0  ;;  %v3100_v22 = vadd.f32 %v9006_v16, %v3072_v18  ;;  %v3073_v29 = vadd.f32 %v3055_v56, %v2971_v63  ;;  %v3740_v16 = vsel %vm1396_vm6, %v7128_v36, 0  ;;  %7762 = vmatprep.subr.msk.bf16.mxu0 %vm1396_vm6, %v7133_v26 }
 0x346   : > { %v3945_v52 = vsel %vm1396_vm6, %v7133_v26, 0 }
 0x347   : > { %7091 = vst.msk [vmem:[%s8588_s27 + $0xe8] sm:$0xff] %vm1112_vm7, %v3115_v43  ;;  %v3116_v53 = vmax.f32 %v3100_v22, 0.0  ;;  %v3101_v28 = vadd.f32 %v9009_v1, %v3073_v29  ;;  %v3657_v1 = vsel %vm1396_vm6, %v3494_v8, %v8749_v58 }
 0x348   : > { %7565 = vmatmul.mubr.msk.bf16.gmra.mxu1 %vm1383_vm11, %v9087_v49 }
 0x349   : > { %7092 = vst [vmem:[%s8588_s27 + $0xf0] sm:$0xff] %v3116_v53  ;;  %v3117_v12 = vmax.f32 %v3101_v28, 0.0  ;;  %7580 = vmatprep.mubr.msk.bf16.mxu1 %vm1383_vm11, %v9037_v5  ;;  %v10433_v5 = vmov 0  }
 0x34b   : > { %7093 = vst.msk [vmem:[%s8588_s27 + $0xf8] sm:$0xff] %vm1112_vm7, %v3117_v12  ;;  %7591 = vmatmul.mubr.msk.bf16.vlgmr.msra.gmra.mxu0 %vm1383_vm11, %v9119_v21  ;;  %v3888_v21 = vld [vmem:[%s10257_s14] sm:$0xf] }
 0x34c   : > { %7594 = vmatprep.mubr.msk.bf16.mxu0 %vm1383_vm11, %v3495_v25  ;;  %7609 = vmatpush3.bf16.msra.mxu0 %v3945_v52 }
 0x350   : > { %7581 = vmatmul.mubr.msk.bf16.vlgmr.msra.gmra.mxu1 %vm1383_vm11, %v9090_v24 }
 0x351   : > { %7599 = vmatpush3.bf16.msra.mxu1 %v3740_v16  ;;  %7584 = vmatprep.mubr.msk.bf16.mxu1 %vm1383_vm11, %v9087_v49 }
 0x352   : > { %7763 = vmatprep.subr.msk.bf16.mxu1 %vm1396_vm6, %v3888_v21 }
 0x353   : > { %7595 = vmatmul.mubr.msk.bf16.gmra.mxu0 %vm1383_vm11, %v3657_v1 }
 0x358   : > { %7585 = vmatmul.mubr.msk.bf16.gmra.mxu1 %vm1383_vm11, %v3241_v37 }
 0x359   : > { %7600 = vmatprep.mubr.msk.bf16.mxu1 %vm1383_vm11, %v9090_v24  ;;  %v9228_v24 = vld [vmem:[%s10257_s14 + $0x8] sm:$0xf] }
 0x35a   : > { %7764 = vmatprep.subr.msk.bf16.mxu0 %vm1396_vm6, %v9228_v24 }
 0x360   : > { %7601 = vmatmul.mubr.msk.bf16.vlgmr.msra.gmra.mxu1 %vm1383_vm11, %v9087_v49  ;;  %v4025_v49 = vsel %vm1396_vm6, %v3888_v21, 0 }
 0x361   : > { %7604 = vmatprep.mubr.msk.bf16.mxu1 %vm1383_vm11, %v3241_v37  ;;  %7619 = vmatpush3.bf16.msra.mxu1 %v4025_v49 }
 0x362   : > { %7765 = vmatprep.subr.msk.bf16.mxu1 %vm1396_vm6, %v9235_v45 }
 0x368   : > { %7605 = vmatmul.mubr.bf16.gmra.mxu1 %v10433_v5 }
 0x3eb   : > { %v7552_v30 = vpop.f32.mrf.mxu0 }
 0x3ed   : > { %v3379_v59 = vpop.f32.mrf.mxu0 }
 0x3ef   : > { %v7553_v34 = vpop.f32.mrf.mxu0 }
 0x3f0   : > { %v7542_v46 = vpop.f32.mrf.mxu1 }
 0x3f1   : > { %v3382_v9 = vpop.f32.mrf.mxu0  ;;  %v3388_v39 = vadd.f32 %v7552_v30, %v7542_v46 }
 0x3f2   : > { %v3303_v54 = vpop.f32.mrf.mxu1 }
 0x3f3   : > { %v7556_v61 = vpop.f32.mrf.mxu0  ;;  %v3380_v4 = vadd.f32 %v3379_v59, %v3303_v54 }
 0x3f4   : > { %v7543_v7 = vpop.f32.mrf.mxu1 }
 0x3f5   : > { %v3395_v48 = vpop.f32.mrf.mxu0  ;;  %v3391_v41 = vadd.f32 %v7553_v34, %v7543_v7 }
 0x3f6   : > { %v3306_v23 = vpop.f32.mrf.mxu1 }
 0x3f7   : > { %v7557_v35 = vpop.f32.mrf.mxu0  ;;  %v3383_v63 = vadd.f32 %v3382_v9, %v3306_v23 }
 0x3f8   : > { %v7546_v14 = vpop.f32.mrf.mxu1 }
 0x3f9   : > { %v3398_v11 = vpop.f32.mrf.mxu0  ;;  %v3404_v16 = vadd.f32 %v7556_v61, %v7546_v14  ;;  %v7132_v14 = vld [vmem:[%s10256_s13] ss:$0 sm:$0xff] }
 0x3fa   : > { %v3319_v50 = vpop.f32.mrf.mxu1 }
 0x3fb   : > { %v7572_v10 = vpop.f32.mrf.mxu0  ;;  %v3396_v49 = vadd.f32 %v3395_v48, %v3319_v50 }
 0x3fc   : > { %v7547_v20 = vpop.f32.mrf.mxu1 }
 0x3fd   : > { %v3536_v0 = vpop.f32.mrf.mxu0  ;;  %v3407_v7 = vadd.f32 %v7557_v35, %v7547_v20 }
 0x3fe   : > { %v3322_v32 = vpop.f32.mrf.mxu1 }
 0x3ff   : > { %v7573_v37 = vpop.f32.mrf.mxu0 }
 0x400   : > { %v7562_v33 = vpop.f32.mrf.mxu1 }
 0x401   : > { %v3539_v3 = vpop.f32.mrf.mxu0  ;;  %v3485_v38 = vadd.f32 %v7562_v33, %v3388_v39 }
 0x402   : > { %v3452_v15 = vpop.f32.mrf.mxu1 }
 0x403   : > { %v7576_v17 = vpop.f32.mrf.mxu0  ;;  %v3483_v18 = vadd.f32 %v3452_v15, %v3380_v4  ;;  %v3569_v43 = vadd.f32 %v7572_v10, %v3485_v38 }
 0x404   : > { %v7563_v44 = vpop.f32.mrf.mxu1 }
 0x405   : > { %v3552_v42 = vpop.f32.mrf.mxu0  ;;  %v3486_v56 = vadd.f32 %v7563_v44, %v3391_v41  ;;  %v3567_v12 = vadd.f32 %v3536_v0, %v3483_v18 }
 0x406   : > { %v3455_v57 = vpop.f32.mrf.mxu1 }
 0x407   : > { %v7577_v62 = vpop.f32.mrf.mxu0  ;;  %v3484_v53 = vadd.f32 %v3455_v57, %v3383_v63  ;;  %v3570_v52 = vadd.f32 %v7573_v37, %v3486_v56  ;;  %v3399_v57 = vadd.f32 %v3398_v11, %v3322_v32 }
 0x408   : > { %v7566_v19 = vpop.f32.mrf.mxu1 }
 0x409   : > { %v3555_v36 = vpop.f32.mrf.mxu0  ;;  %v3489_v30 = vadd.f32 %v7566_v19, %v3404_v16  ;;  %v3568_v34 = vadd.f32 %v3539_v3, %v3484_v53 }
 0x40a   : > { %v3468_v47 = vpop.f32.mrf.mxu1 }
 0x40b   : > { %v7592_v13 = vpop.f32.mrf.mxu0  ;;  %v3487_v9 = vadd.f32 %v3468_v47, %v3396_v49  ;;  %v3573_v61 = vadd.f32 %v7576_v17, %v3489_v30 }
 0x40c   : > { %v7567_v27 = vpop.f32.mrf.mxu1 }
 0x40d   : > { %v3698_v25 = vpop.f32.mrf.mxu0  ;;  %v3490_v0 = vadd.f32 %v7567_v27, %v3407_v7 }
 0x40e   : > { %v3471_v8 = vpop.f32.mrf.mxu1 }
 0x40f   : > { %v7593_v22 = vpop.f32.mrf.mxu0  ;;  %v3488_v19 = vadd.f32 %v3471_v8, %v3399_v57 }
 0x410   : > { %v7582_v31 = vpop.f32.mrf.mxu1 }
 0x411   : > { %v3649_v28 = vadd.f32 %v7582_v31, %v3569_v43  ;;  %v3701_v21 = vpop.f32.mrf.mxu0  ;;  %v3571_v31 = vadd.f32 %v3552_v42, %v3487_v9  ;;  %v3572_v38 = vadd.f32 %v3555_v36, %v3488_v19 }
 0x412   : > { %v3616_v51 = vpop.f32.mrf.mxu1 }
 0x413   : > { %v3647_v26 = vadd.f32 %v3616_v51, %v3567_v12  ;;  %v3731_v54 = vadd.f32 %v7592_v13, %v3649_v28  ;;  %v7596_v10 = vpop.f32.mrf.mxu0 }
 0x414   : > { %v7583_v6 = vpop.f32.mrf.mxu1 }
 0x415   : > { %v3650_v46 = vadd.f32 %v7583_v6, %v3570_v52  ;;  %v3729_v44 = vadd.f32 %v3698_v25, %v3647_v26  ;;  %v3714_v20 = vpop.f32.mrf.mxu0  ;;  %v3574_v6 = vadd.f32 %v7577_v62, %v3490_v0 }
 0x416   : > { %v3619_v60 = vpop.f32.mrf.mxu1 }
 0x417   : > { %v3648_v33 = vadd.f32 %v3619_v60, %v3568_v34  ;;  %v3732_v37 = vadd.f32 %v7593_v22, %v3650_v46  ;;  %v7597_v41 = vpop.f32.mrf.mxu0 }
 0x418   : > { %v7586_v2 = vpop.f32.mrf.mxu1 }
 0x419   : > { %v3653_v3 = vadd.f32 %v7586_v2, %v3573_v61  ;;  %v3730_v51 = vadd.f32 %v3701_v21, %v3648_v33  ;;  %v3717_v16 = vpop.f32.mrf.mxu0 }
 0x41a   : > { %v3632_v29 = vpop.f32.mrf.mxu1 }
 0x41b   : > { %v3651_v39 = vadd.f32 %v3632_v29, %v3571_v31  ;;  %v3735_v25 = vadd.f32 %v7596_v10, %v3653_v3  ;;  %v10469_v3 = vld [vmem:[#allocation22_spill] sm:$0xff] }
 0x41c   : > { %v7587_v1 = vpop.f32.mrf.mxu1 }
 0x41d   : > { %v3654_v4 = vadd.f32 %v7587_v1, %v3574_v6  ;;  %v3733_v56 = vadd.f32 %v3714_v20, %v3651_v39  ;;  %v10436_v39 = vld [vmem:[#allocation2_spill] sm:$0xff] }
 0x41e   : > { %v3635_v59 = vpop.f32.mrf.mxu1 }
 0x41f   : > { %v3652_v42 = vadd.f32 %v3635_v59, %v3572_v38  ;;  %v3736_v28 = vadd.f32 %v7597_v41, %v3654_v4  ;;  %v9264_v41 = vld [vmem:[%s10257_s14 + $0x14] sm:$0xf] }
 0x420   : > { %v7602_v23 = vpop.f32.mrf.mxu1 }
 0x421   : > { %v3809_v15 = vadd.f32 %v7602_v23, %v3731_v54  ;;  %v3734_v49 = vadd.f32 %v3717_v16, %v3652_v42 }
 0x422   : > { %v3776_v48 = vpop.f32.mrf.mxu1 }
 0x423   : > { %v3807_v50 = vadd.f32 %v3776_v48, %v3729_v44  ;;  %v3824_v47 = vadd.f32 %v7132_v14, %v3809_v15 }
 0x424   : > { %v7603_v35 = vpop.f32.mrf.mxu1 }
 0x425   : > { %v3810_v13 = vadd.f32 %v7603_v35, %v3732_v37  ;;  %v3822_v32 = vadd.f32 %v7132_v14, %v3807_v50  ;;  %v3832_v18 = vmax.f32 %v3824_v47, 0.0  ;;  %v4260_v35 = vsel %vm1396_vm6, %v9235_v45, 0 }
 0x426   : > { %v3779_v11 = vpop.f32.mrf.mxu1 }
 0x427   : > { %v3825_v17 = vadd.f32 %v7132_v14, %v3810_v13  ;;  %v3808_v27 = vadd.f32 %v3779_v11, %v3730_v51  ;;  %v3830_v22 = vmax.f32 %v3822_v32, 0.0  ;;  %v10435_v51 = vld [vmem:[#allocation4_spill] sm:$0xff] }
 0x428   : > { %v7606_v60 = vpop.f32.mrf.mxu1  ;;  %v10437_v11 = vld [vmem:[#allocation8_spill] sm:$0xff] }
 0x429   : > { %v3833_v8 = vmax.f32 %v3825_v17, 0.0  ;;  %v3823_v2 = vadd.f32 %v7132_v14, %v3808_v27  ;;  %v3813_v63 = vadd.f32 %v7606_v60, %v3735_v25  ;;  %v10438_v17 = vld [vmem:[#allocation9_spill] sm:$0xff] }
 0x42a   : > { %v3792_v43 = vpop.f32.mrf.mxu1 }
 0x42b   : > { %v3839_v53 = vpack.c.bf16 %v3833_v8, %v3832_v18  ;;  %v3831_v29 = vmax.f32 %v3823_v2, 0.0  ;;  %v3811_v62 = vadd.f32 %v3792_v43, %v3733_v56  ;;  %v3828_v21 = vadd.f32 %v7132_v14, %v3813_v63 }
 0x42c   : > { %v7607_v12 = vpop.f32.mrf.mxu1 }
 0x42d   : > { %v3851_v26 = vshrl.u32 %v3839_v53, 16  ;;  %v3854_v1 = vshll.u32 %v3839_v53, 16  ;;  %v3838_v36 = vpack.c.bf16 %v3831_v29, %v3830_v22  ;;  %v3814_v52 = vadd.f32 %v7607_v12, %v3736_v28 }
 0x42e   : > { %v3795_v30 = vpop.f32.mrf.mxu1  ;;  %v3826_v7 = vadd.f32 %v7132_v14, %v3811_v62  ;;  %v3836_v15 = vmax.f32 %v3828_v21, 0.0 }
 0x42f   : > { %v3853_v46 = vrot.slane %v3851_v26, 6  ;;  %v3856_v34 = vrot.slane %v3854_v1, 7  ;;  %v3843_v59 = vshrl.u32 %v3838_v36, 16  ;;  %v3846_v54 = vshll.u32 %v3838_v36, 16 }
 0x430   : > { %v3829_v9 = vadd.f32 %v7132_v14, %v3814_v52  ;;  %v3812_v23 = vadd.f32 %v3795_v30, %v3734_v49  ;;  %v3834_v48 = vmax.f32 %v3826_v7, 0.0 }
 0x431   : > { %v3845_v10 = vrot.slane %v3843_v59, 6  ;;  %v3848_v33 = vrot.slane %v3846_v54, 7  ;;  %v3857_v0 = vor.u32 %v3856_v34, %v3853_v46  ;;  %v10439_v46 = vld [vmem:[#allocation6_spill] sm:$0xff]  ;;  %v10440_v54 = vld [vmem:[#allocation3_spill] sm:$0xff] }
 0x432   : > { %v3837_v44 = vmax.f32 %v3829_v9, 0.0  ;;  %v3827_v57 = vadd.f32 %v7132_v14, %v3812_v23  ;;  %v10441_v9 = vld [vmem:[#allocation5_spill] sm:$0xff] }
 0x433   : > { %v3849_v61 = vor.u32 %v3848_v33, %v3845_v10 }
 0x434   : > { %v3841_v50 = vpack.c.bf16 %v3837_v44, %v3836_v15  ;;  %v3835_v37 = vmax.f32 %v3827_v57, 0.0  ;;  %v10442_v15 = vld [vmem:[#allocation10_spill] sm:$0xff]  ;;  %v10443_v57 = vld [vmem:[#allocation12_spill] sm:$0xff] }
 0x435   : > { %v9243_v19 = vsel %vm1220_vm2, %v3849_v61, %v3857_v0  ;;  %v9247_v31 = vsel %vm8387_vm9, 0, %v3849_v61 }
 0x436   : > { %v3869_v20 = vshrl.u32 %v3841_v50, 16  ;;  %v3872_v47 = vshll.u32 %v3841_v50, 16  ;;  %v3840_v13 = vpack.c.bf16 %v3835_v37, %v3834_v48  ;;  %v3884_v14 = vmul.bf16 %v9247_v31, %v10435_v51 }
 0x437   : > { %v3885_v6 = vmul.bf16 %v9243_v19, %v10436_v39  ;;  %v3889_v32 = vmul.bf16 %v9247_v31, %v10437_v11  ;;  %v3890_v27 = vmul.bf16 %v9243_v19, %v10438_v17  ;;  %v4204_v4 = vshrl.u32 %v9247_v31, 16 }
 0x438   : > { %v3871_v38 = vrot.slane %v3869_v20, 6  ;;  %v3874_v25 = vrot.slane %v3872_v47, 7  ;;  %v3860_v45 = vshrl.u32 %v3840_v13, 16  ;;  %v3863_v60 = vshll.u32 %v3840_v13, 16  ;;  %7620 = vmatprep.mubr.msk.bf16.mxu1 %vm1383_vm11, %v3884_v14 }
 0x439   : > { %7621 = vmatmul.mubr.msk.bf16.vlgmr.msra.gmra.mxu1 %vm1383_vm11, %v3885_v6  ;;  %v3899_v18 = vshll.u32 %v3889_v32, 16  ;;  %v3904_v8 = vshll.u32 %v3890_v27, 16  ;;  %v3897_v56 = vshrl.u32 %v3889_v32, 16  ;;  %v4206_v22 = vrot.slane %v4204_v4, 1 }
 0x43a   : > { %v3875_v2 = vor.u32 %v3874_v25, %v3871_v38  ;;  %v3862_v42 = vrot.slane %v3860_v45, 6  ;;  %v3865_v63 = vrot.slane %v3863_v60, 7  ;;  %7639 = vmatpush3.bf16.msra.mxu1 %v4260_v35  ;;  %v4207_v53 = vshll.u32 %v9247_v31, 16 }
 0x43b   : > { %v3901_v43 = vrot.slane %v3899_v18, 1  ;;  %v4212_v29 = vshrl.u32 %v9243_v19, 16  ;;  %7767 = vmatprep.subr.msk.bf16.mxu1 %vm1396_vm6, %v9264_v41  ;;  %v3908_v12 = vshrl.u32 %v3890_v27, 16  ;;  %v4215_v16 = vshll.u32 %v9243_v19, 16 }
 0x43c   : > { %v9273_v62 = vsel %vm8387_vm9, %v3875_v2, 0  ;;  %v3866_v28 = vor.u32 %v3865_v63, %v3862_v42  ;;  %v3906_v1 = vrot.slane %v3904_v8, 1  ;;  %v4209_v36 = vrot.slane %v4207_v53, 2 }
 0x43d   : > { %v3902_v26 = vor.u32 %v3901_v43, %v3897_v56  ;;  %v4214_v21 = vrot.slane %v4212_v29, 1  ;;  %v4217_v30 = vrot.slane %v4215_v16, 2  ;;  %v3893_v34 = vmul.bf16 %v9273_v62, %v10439_v46  ;;  %v7152_v43 = vld [vmem:[%s10257_s14 + $0x10] sm:$0xf]  ;;  %v10445_v29 = vld [vmem:[#allocation13_spill] sm:$0xff] }
 0x43e   : > { %v9277_v52 = vsel %vm1220_vm2, %v3857_v0, %v3866_v28  ;;  %v9280_v49 = vsel %vm1220_vm2, %v3866_v28, %v3875_v2  ;;  %v4210_v10 = vor.u32 %v4209_v36, %v4206_v22  ;;  %v3910_v35 = vor.u32 %v3908_v12, %v3906_v1  ;;  %v10444_v22 = vld [vmem:[#allocation7_spill] sm:$0xff]  ;;  %v10446_v36 = vld [vmem:[#allocation17_spill] sm:$0xff] }
 0x43f   : > { %v3907_v59 = vsel %vm1346_vm12, %v3902_v26, %v3906_v1  ;;  %v3886_v7 = vmul.bf16 %v9277_v52, %v10440_v54  ;;  %v3887_v23 = vmul.bf16 %v9280_v49, %v10441_v9  ;;  %v4218_v33 = vor.u32 %v4217_v30, %v4214_v21 }
 0x440   : > { %7610 = vmatprep.mubr.msk.bf16.mxu0 %vm1383_vm11, %v3907_v59  ;;  %v3891_v44 = vmul.bf16 %v9277_v52, %v10442_v15  ;;  %v3892_v0 = vmul.bf16 %v9280_v49, %v10443_v57  ;;  %v4221_v61 = vshrl.u32 %v9277_v52, 16  ;;  %v4224_v48 = vshll.u32 %v9277_v52, 16 }
 0x441   : > { %7624 = vmatprep.mubr.msk.bf16.mxu1 %vm1383_vm11, %v3886_v7  ;;  %v4230_v50 = vshrl.u32 %v9280_v49, 16  ;;  %v4233_v37 = vshll.u32 %v9280_v49, 16  ;;  %v4219_v20 = vsel %vm1690_vm5, %v4210_v10, %v4218_v33  ;;  %v3928_v27 = vshll.u32 %v3893_v34, 16  ;;  %v10447_v7 = vld [vmem:[#allocation18_spill] sm:$0xff] }
 0x442   : > { %7625 = vmatmul.mubr.msk.bf16.gmra.mxu1 %vm1383_vm11, %v3887_v23  ;;  %v3912_v47 = vshll.u32 %v3891_v44, 16  ;;  %v3920_v13 = vshll.u32 %v3892_v0, 16  ;;  %v4223_v14 = vrot.slane %v4221_v61, 1  ;;  %v4226_v6 = vrot.slane %v4224_v48, 2 }
 0x443   : > { %7640 = vmatprep.mubr.msk.bf16.mxu1 %vm1383_vm11, %v4219_v20  ;;  %v4232_v32 = vrot.slane %v4230_v50, 1  ;;  %v3916_v38 = vshrl.u32 %v3891_v44, 16  ;;  %v4235_v45 = vrot.slane %v4233_v37, 2  ;;  %v4126_v60 = vsel %vm1396_vm6, %v9228_v24, 0 }
 0x444   : > { %v3914_v4 = vrot.slane %v3912_v47, 1  ;;  %v3922_v25 = vrot.slane %v3920_v13, 1  ;;  %v4227_v18 = vor.u32 %v4226_v6, %v4223_v14  ;;  %v4239_v8 = vshrl.u32 %v9273_v62, 16  ;;  %v10449_v6 = vld [vmem:[#allocation14_spill] sm:$0xff] }
 0x445   : > { %v3924_v63 = vshrl.u32 %v3892_v0, 16  ;;  %v4236_v56 = vor.u32 %v4235_v45, %v4232_v32  ;;  %v4092_v53 = vmul.bf16 %v9247_v31, %v10444_v22  ;;  %v4093_v24 = vmul.bf16 %v9243_v19, %v10445_v29  ;;  %v10448_v0 = vld [vmem:[#allocation19_spill] sm:$0xff] }
 0x446   : > { %v3915_v2 = vsel %vm1346_vm12, %v3910_v35, %v3914_v4  ;;  %v3918_v42 = vor.u32 %v3916_v38, %v3914_v4  ;;  %v4242_v28 = vshll.u32 %v9273_v62, 16  ;;  %v4508_v12 = vsel %vm1396_vm6, %v9264_v41, 0 }
 0x447   : > { %7611 = vmatmul.mubr.msk.bf16.vlgmr.msra.gmra.mxu0 %vm1383_vm11, %v3915_v2  ;;  %v3926_v26 = vor.u32 %v3924_v63, %v3922_v25  ;;  %v3930_v1 = vrot.slane %v3928_v27, 1  ;;  %v4444_v21 = vmul.bf16 %v9247_v31, %v10446_v36  ;;  %v4228_v30 = vsel %vm1690_vm5, %v4218_v33, %v4227_v18  ;;  %v10451_v2 = vld [vmem:[#allocation21_spill] sm:$0xff] }
 0x448   : > { %7629 = vmatpush3.bf16.msra.mxu0 %v4126_v60  ;;  %v3923_v16 = vsel %vm1346_vm12, %v3918_v42, %v3922_v25  ;;  %v4237_v34 = vsel %vm1690_vm5, %v4227_v18, %v4236_v56  ;;  %v4241_v59 = vrot.slane %v4239_v8, 1  ;;  %v4445_v23 = vmul.bf16 %v9243_v19, %v10447_v7  ;;  %v10450_v25 = vld [vmem:[#allocation15_spill] sm:$0xff] }
 0x449   : > { %7614 = vmatprep.mubr.msk.bf16.mxu0 %vm1383_vm11, %v3923_v16  ;;  %7766 = vmatprep.subr.msk.bf16.mxu0 %vm1396_vm6, %v7152_v43  ;;  %v4244_v41 = vrot.slane %v4242_v28, 2  ;;  %v4452_v10 = vshrl.u32 %v4444_v21, 16  ;;  %v4455_v44 = vshll.u32 %v4444_v21, 16  ;;  %v4446_v61 = vmul.bf16 %v9277_v52, %v10448_v0 }
 0x44a   : > { %7641 = vmatmul.mubr.msk.bf16.vlgmr.msra.gmra.mxu1 %vm1383_vm11, %v4228_v30  ;;  %v4104_v48 = vrot.slane %v4092_v53, 1  ;;  %v4105_v33 = vrot.slane %v4093_v24, 1  ;;  %v4460_v50 = vshrl.u32 %v4445_v23, 16  ;;  %v4463_v37 = vshll.u32 %v4445_v23, 16 }
 0x44b   : > { %7644 = vmatprep.mubr.msk.bf16.mxu1 %vm1383_vm11, %v4237_v34  ;;  %7659 = vmatpush3.bf16.msra.mxu1 %v4508_v12  ;;  %v3931_v35 = vsel %vm1346_vm12, %v3926_v26, %v3930_v1  ;;  %v4454_v20 = vrot.slane %v4452_v10, 2  ;;  %v4457_v47 = vrot.slane %v4455_v44, 3  ;;  %v4094_v32 = vmul.bf16 %v9277_v52, %v10449_v6  ;;  %v10452_v34 = vld [vmem:[#allocation20_spill] sm:$0xff] }
 0x44c   : > { %v4462_v13 = vrot.slane %v4460_v50, 2  ;;  %v4465_v14 = vrot.slane %v4463_v37, 3  ;;  %v4469_v27 = vshrl.u32 %v4446_v61, 16  ;;  %v4245_v4 = vor.u32 %v4244_v41, %v4241_v59  ;;  %v10454_v37 = vld [vmem:[#allocation25_spill] sm:$0xff] }
 0x44d   : > { %v4458_v38 = vor.u32 %v4457_v47, %v4454_v20  ;;  %v4095_v45 = vmul.bf16 %v9280_v49, %v10450_v25  ;;  %v4472_v60 = vshll.u32 %v4446_v61, 16  ;;  %v4106_v18 = vsel %vm1590_vm10, %v4104_v48, %v4105_v33  ;;  %v7162_v61 = vld [vmem:[%s10257_s14 + $0x18] sm:$0xf]  ;;  %v10453_v48 = vld [vmem:[#allocation22_spill] sm:$0xff] }
 0x44e   : > { %v4466_v8 = vor.u32 %v4465_v14, %v4462_v13  ;;  %v4447_v42 = vmul.bf16 %v9280_v49, %v10451_v2  ;;  %v4246_v63 = vsel %vm1690_vm5, %v4236_v56, %v4245_v4  ;;  %v4471_v53 = vrot.slane %v4469_v27, 2 }
 0x44f   : > { %7615 = vmatmul.mubr.msk.bf16.gmra.mxu0 %vm1383_vm11, %v3931_v35  ;;  %v4474_v24 = vrot.slane %v4472_v60, 3  ;;  %v4107_v26 = vrot.slane %v4094_v32, 1  ;;  %v4109_v1 = vrot.slane %v4095_v45, 1  ;;  %v4448_v59 = vmul.bf16 %v9273_v62, %v10452_v34 }
 0x450   : > { %7630 = vmatprep.mubr.msk.bf16.mxu0 %vm1383_vm11, %v4106_v18  ;;  %v4478_v28 = vshrl.u32 %v4447_v42, 16  ;;  %v4481_v12 = vshll.u32 %v4447_v42, 16  ;;  %v4467_v16 = vsel %vm2025_vm13, %v4458_v38, %v4466_v8  ;;  %v4369_v23 = vsel %vm1396_vm6, %v7152_v43, 0  ;;  %v10456_v18 = vld [vmem:[#allocation27_spill] sm:$0xff] }
 0x451   : > { %v4475_v56 = vor.u32 %v4474_v24, %v4471_v53  ;;  %v4108_v41 = vsel %vm1590_vm10, %v4105_v33, %v4107_v26  ;;  %v4110_v10 = vsel %vm1590_vm10, %v4107_v26, %v4109_v1  ;;  %v4335_v50 = vmul.bf16 %v9247_v31, %v10453_v48  ;;  %v10455_v33 = vld [vmem:[#allocation11_spill] sm:$0xff]  ;;  %v10457_v53 = vld [vmem:[#allocation28_spill] sm:$0xff] }
 0x452   : > { %7645 = vmatmul.mubr.msk.bf16.gmra.mxu1 %vm1383_vm11, %v4246_v63  ;;  %v4480_v21 = vrot.slane %v4478_v28, 2  ;;  %v4483_v30 = vrot.slane %v4481_v12, 3  ;;  %v4336_v35 = vmul.bf16 %v9243_v19, %v10454_v37  ;;  %v4487_v20 = vshrl.u32 %v4448_v59, 16 }
 0x453   : > { %7660 = vmatprep.mubr.msk.bf16.mxu1 %vm1383_vm11, %v4467_v16  ;;  %v4490_v43 = vshll.u32 %v4448_v59, 16  ;;  %v4096_v47 = vmul.bf16 %v9273_v62, %v10455_v33  ;;  %v4476_v13 = vsel %vm2025_vm13, %v4466_v8, %v4475_v56  ;;  %v4347_v32 = vrot.slane %v4335_v50, 2 }
 0x454   : > { %v4484_v44 = vor.u32 %v4483_v30, %v4480_v21  ;;  %v4348_v27 = vrot.slane %v4336_v35, 2  ;;  %v4489_v4 = vrot.slane %v4487_v20, 2  ;;  %v4337_v42 = vmul.bf16 %v9277_v52, %v10456_v18  ;;  %v10458_v30 = vld [vmem:[#allocation29_spill] sm:$0xff]  ;;  %v10461_v20 = vld [vmem:[#allocation32_spill] sm:$0xff] }
 0x455   : > { %v4492_v38 = vrot.slane %v4490_v43, 3  ;;  %v4111_v45 = vrot.slane %v4096_v47, 1  ;;  %v4338_v24 = vmul.bf16 %v9280_v49, %v10457_v53  ;;  %v4617_v26 = vsel %vm1396_vm6, %v7162_v61, 0  ;;  %v10462_v47 = vld [vmem:[#allocation33_spill] sm:$0xff] }
 0x456   : > { %v4485_v14 = vsel %vm2025_vm13, %v4475_v56, %v4484_v44  ;;  %v4349_v8 = vsel %vm1867_vm14, %v4347_v32, %v4348_v27  ;;  %v4350_v12 = vrot.slane %v4337_v42, 2  ;;  %v4583_v59 = vmul.bf16 %v9247_v31, %v10458_v30  ;;  %v9414_v42 = vld [vmem:[%s10259_s16 + $0x8] sm:$0xf] }
 0x457   : > { %7631 = vmatmul.mubr.msk.bf16.vlgmr.msra.gmra.mxu0 %vm1383_vm11, %v4108_v41  ;;  %v4112_v60 = vsel %vm1590_vm10, %v4109_v1, %v4111_v45  ;;  %v4493_v63 = vor.u32 %v4492_v38, %v4489_v4  ;;  %v4352_v16 = vrot.slane %v4338_v24, 2  ;;  %v10460_v41 = vld [vmem:[#allocation26_spill] sm:$0xff]  ;;  %v4585_v43 = vmul.bf16 %v9277_v52, %v10461_v20  ;;  %v10463_v52 = vld [vmem:[#allocation31_spill] sm:$0xff] }
 0x458   : > { %7649 = vmatpush3.bf16.msra.mxu0 %v4369_v23  ;;  %7634 = vmatprep.mubr.msk.bf16.mxu0 %vm1383_vm11, %v4110_v10  ;;  %v4351_v1 = vsel %vm1867_vm14, %v4348_v27, %v4350_v12  ;;  %v10459_v23 = vld [vmem:[#allocation30_spill] sm:$0xff]  ;;  %v4339_v10 = vmul.bf16 %v9273_v62, %v10460_v41  ;;  %v4587_v4 = vmul.bf16 %v9273_v62, %v10463_v52 }
 0x459   : > { %7768 = vmatprep.subr.msk.bf16.mxu0 %vm1396_vm6, %v7162_v61  ;;  %v4494_v28 = vsel %vm2025_vm13, %v4484_v44, %v4493_v63  ;;  %v4353_v21 = vsel %vm1867_vm14, %v4350_v12, %v4352_v16  ;;  %v4584_v56 = vmul.bf16 %v9243_v19, %v10459_v23  ;;  %v4595_v44 = vrot.slane %v4583_v59, 3  ;;  %v4734_v62 = vld [vmem:[%s10259_s16] sm:$0xf]  ;;  %v9423_v63 = vld [vmem:[%s10259_s16 + $0xc] sm:$0xf] }
 0x45a   : > { %7661 = vmatmul.mubr.msk.bf16.vlgmr.msra.gmra.mxu1 %vm1383_vm11, %v4476_v13  ;;  %v4354_v50 = vrot.slane %v4339_v10, 2  ;;  %v4586_v19 = vmul.bf16 %v9280_v49, %v10462_v47  ;;  %v4598_v13 = vrot.slane %v4585_v43, 3  ;;  %v4602_v38 = vrot.slane %v4587_v4, 3  ;;  %v7168_v49 = vld [vmem:[%s10259_s16 + $0x4] sm:$0xf] }
 0x45b   : > { %7664 = vmatprep.mubr.msk.bf16.mxu1 %vm1383_vm11, %v4485_v14  ;;  %v4596_v61 = vrot.slane %v4584_v56, 3  ;;  %7769 = vmatprep.subr.msk.bf16.mxu1 %vm1396_vm6, %v7168_v49 }
 0x45c   : > { %v4355_v35 = vsel %vm1867_vm14, %v4352_v16, %v4354_v50  ;;  %v4600_v14 = vrot.slane %v4586_v19, 3 }
 0x45d   : > { %v4597_v31 = vsel %vm2203_vm4, %v4595_v44, %v4596_v61  ;;  %v4599_v32 = vsel %vm2203_vm4, %v4596_v61, %v4598_v13 }
 0x45e   : > { %v4601_v27 = vsel %vm2203_vm4, %v4598_v13, %v4600_v14  ;;  %v4603_v45 = vsel %vm2203_vm4, %v4600_v14, %v4602_v38 }
 0x45f   : > { %7635 = vmatmul.mubr.msk.bf16.gmra.mxu0 %vm1383_vm11, %v4112_v60  ;;  %v4759_v60 = vsel %vm1396_vm6, %v7168_v49, 0 }
 0x460   : > { %7650 = vmatprep.mubr.msk.bf16.mxu0 %vm1383_vm11, %v4349_v8  ;;  %7679 = vmatpush3.bf16.msra.mxu1 %v4759_v60  ;;  %v4835_v8 = vsel %vm1396_vm6, %v4734_v62, 0 }
 0x461   : > { %7771 = vmatprep.subr.msk.bf16.mxu1 %vm1396_vm6, %v9414_v42 }
 0x462   : > { %7665 = vmatmul.mubr.msk.bf16.gmra.mxu1 %vm1383_vm11, %v4494_v28 }
 0x467   : > { %7651 = vmatmul.mubr.msk.bf16.vlgmr.msra.gmra.mxu0 %vm1383_vm11, %v4351_v1 }
 0x468   : > { %7669 = vmatpush3.bf16.msra.mxu0 %v4617_v26  ;;  %7654 = vmatprep.mubr.msk.bf16.mxu0 %vm1383_vm11, %v4353_v21 }
 0x469   : > { %7770 = vmatprep.subr.msk.bf16.mxu0 %vm1396_vm6, %v4734_v62 }
 0x46f   : > { %7655 = vmatmul.mubr.msk.bf16.gmra.mxu0 %vm1383_vm11, %v4355_v35 }
 0x470   : > { %7670 = vmatprep.mubr.msk.bf16.mxu0 %vm1383_vm11, %v4597_v31 }
 0x477   : > { %7671 = vmatmul.mubr.msk.bf16.vlgmr.msra.gmra.mxu0 %vm1383_vm11, %v4599_v32 }
 0x478   : > { %7674 = vmatprep.mubr.msk.bf16.mxu0 %vm1383_vm11, %v4601_v27  ;;  %7689 = vmatpush3.bf16.msra.mxu0 %v4835_v8 }
 0x479   : > { %7772 = vmatprep.subr.msk.bf16.mxu0 %vm1396_vm6, %v9423_v63 }
 0x47f   : > { %7675 = vmatmul.mubr.msk.bf16.gmra.mxu0 %vm1383_vm11, %v4603_v45 }
 0x480   : > { %7690 = vmatprep.mubr.bf16.mxu0 %v10433_v5 }
 0x4f9   : > { %v7622_v24 = vpop.f32.mrf.mxu1 }
 0x4fb   : > { %v4061_v28 = vpop.f32.mrf.mxu1 }
 0x4fd   : > { %v7623_v12 = vpop.f32.mrf.mxu1 }
 0x4ff   : > { %v4064_v16 = vpop.f32.mrf.mxu1 }
 0x502   : > { %v7626_v26 = vpop.f32.mrf.mxu1 }
 0x504   : > { %v4077_v1 = vpop.f32.mrf.mxu1 }
 0x506   : > { %v7627_v21 = vpop.f32.mrf.mxu1 }
 0x507   : > { %v7612_v59 = vpop.f32.mrf.mxu0 }
 0x508   : > { %v4080_v56 = vpop.f32.mrf.mxu1  ;;  %v4070_v36 = vadd.f32 %v7622_v24, %v7612_v59 }
 0x509   : > { %v3981_v10 = vpop.f32.mrf.mxu0 }
 0x50a   : > { %v7642_v44 = vpop.f32.mrf.mxu1  ;;  %v4062_v52 = vadd.f32 %v4061_v28, %v3981_v10 }
 0x50b   : > { %v7613_v61 = vpop.f32.mrf.mxu0 }
 0x50c   : > { %v4296_v50 = vpop.f32.mrf.mxu1  ;;  %v4073_v23 = vadd.f32 %v7623_v12, %v7613_v61 }
 0x50d   : > { %v3984_v35 = vpop.f32.mrf.mxu0 }
 0x50e   : > { %v7643_v31 = vpop.f32.mrf.mxu1  ;;  %v4065_v41 = vadd.f32 %v4064_v16, %v3984_v35 }
 0x50f   : > { %v7616_v43 = vpop.f32.mrf.mxu0 }
 0x510   : > { %v4299_v13 = vpop.f32.mrf.mxu1  ;;  %v4086_v54 = vadd.f32 %v7626_v26, %v7616_v43 }
 0x511   : > { %v3997_v19 = vpop.f32.mrf.mxu0 }
 0x512   : > { %v7646_v27 = vpop.f32.mrf.mxu1  ;;  %v4078_v57 = vadd.f32 %v4077_v1, %v3997_v19 }
 0x513   : > { %v7617_v14 = vpop.f32.mrf.mxu0 }
 0x514   : > { %v4312_v45 = vpop.f32.mrf.mxu1 }
 0x515   : > { %v4000_v32 = vpop.f32.mrf.mxu0 }
 0x516   : > { %v7647_v62 = vpop.f32.mrf.mxu1 }
 0x517   : > { %v7632_v4 = vpop.f32.mrf.mxu0 }
 0x518   : > { %v4315_v55 = vpop.f32.mrf.mxu1  ;;  %v4195_v47 = vadd.f32 %v7632_v4, %v4070_v36  ;;  %v4089_v4 = vadd.f32 %v7627_v21, %v7617_v14 }
 0x519   : > { %v4162_v38 = vpop.f32.mrf.mxu0 }
 0x51a   : > { %v7662_v33 = vpop.f32.mrf.mxu1  ;;  %v4193_v29 = vadd.f32 %v4162_v38, %v4062_v52  ;;  %v4329_v18 = vadd.f32 %v7642_v44, %v4195_v47  ;;  %v4081_v47 = vadd.f32 %v4080_v56, %v4000_v32 }
 0x51b   : > { %v7633_v49 = vpop.f32.mrf.mxu0 }
 0x51c   : > { %v4544_v25 = vpop.f32.mrf.mxu1  ;;  %v4196_v53 = vadd.f32 %v7633_v49, %v4073_v23  ;;  %v4327_v46 = vadd.f32 %v4296_v50, %v4193_v29 }
 0x51d   : > { %v4165_v60 = vpop.f32.mrf.mxu0 }
 0x51e   : > { %v7663_v30 = vpop.f32.mrf.mxu1  ;;  %v4194_v37 = vadd.f32 %v4165_v60, %v4065_v41  ;;  %v4330_v39 = vadd.f32 %v7643_v31, %v4196_v53 }
 0x51f   : > { %v7636_v8 = vpop.f32.mrf.mxu0 }
 0x520   : > { %v4547_v15 = vpop.f32.mrf.mxu1  ;;  %v4199_v28 = vadd.f32 %v7636_v8, %v4086_v54  ;;  %v4328_v52 = vadd.f32 %v4299_v13, %v4194_v37 }
 0x521   : > { %v4178_v40 = vpop.f32.mrf.mxu0 }
 0x522   : > { %v4197_v36 = vadd.f32 %v4178_v40, %v4078_v57  ;;  %v7666_v16 = vpop.f32.mrf.mxu1 }
 0x523   : > { %v7637_v34 = vpop.f32.mrf.mxu0 }
 0x524   : > { %v4200_v29 = vadd.f32 %v7637_v34, %v4089_v4  ;;  %v4331_v26 = vadd.f32 %v4312_v45, %v4197_v36  ;;  %v4992_v4 = vsel %vm1396_vm6, %v9423_v63, 0 }
 0x525   : > { %v4181_v2 = vpop.f32.mrf.mxu0 }
 0x526   : > { %v4198_v40 = vadd.f32 %v4181_v2, %v4081_v47  ;;  %v4334_v1 = vadd.f32 %v7647_v62, %v4200_v29 }
 0x527   : > { %v7652_v0 = vpop.f32.mrf.mxu0 }
 0x528   : > { %v4438_v48 = vadd.f32 %v7652_v0, %v4329_v18  ;;  %v4333_v18 = vadd.f32 %v7646_v27, %v4199_v28  ;;  %v4332_v34 = vadd.f32 %v4315_v55, %v4198_v40 }
 0x529   : > { %v4405_v7 = vpop.f32.mrf.mxu0 }
 0x52a   : > { %v4436_v59 = vadd.f32 %v4405_v7, %v4327_v46  ;;  %v4577_v61 = vadd.f32 %v7662_v33, %v4438_v48  ;;  %v7167_v46 = vld [vmem:[%s10258_s15] ss:$0 sm:$0xff]  ;;  %v4560_v7 = vpop.f32.mrf.mxu1 }
 0x52b   : > { %v7653_v6 = vpop.f32.mrf.mxu0 }
 0x52c   : > { %v4439_v12 = vadd.f32 %v7653_v6, %v4330_v39  ;;  %v4575_v0 = vadd.f32 %v4544_v25, %v4436_v59  ;;  %v7667_v35 = vpop.f32.mrf.mxu1 }
 0x52d   : > { %v4408_v20 = vpop.f32.mrf.mxu0 }
 0x52e   : > { %v4437_v44 = vadd.f32 %v4408_v20, %v4328_v52  ;;  %v4578_v39 = vadd.f32 %v7663_v30, %v4439_v12  ;;  %v4563_v49 = vpop.f32.mrf.mxu1 }
 0x52f   : > { %v7656_v22 = vpop.f32.mrf.mxu0 }
 0x530   : > { %v4442_v6 = vadd.f32 %v7656_v22, %v4333_v18  ;;  %v4576_v20 = vadd.f32 %v4547_v15, %v4437_v44  ;;  %v7191_v44 = vld [vmem:[%s10259_s16 + $0x14] sm:$0xf] }
 0x531   : > { %v4421_v9 = vpop.f32.mrf.mxu0 }
 0x532   : > { %v4440_v48 = vadd.f32 %v4421_v9, %v4331_v26  ;;  %v4581_v31 = vadd.f32 %v7666_v16, %v4442_v6 }
 0x533   : > { %v7657_v24 = vpop.f32.mrf.mxu0 }
 0x534   : > { %v4443_v43 = vadd.f32 %v7657_v24, %v4334_v1  ;;  %v4579_v2 = vadd.f32 %v4560_v7, %v4440_v48  ;;  %v7186_v7 = vld [vmem:[%s10259_s16 + $0x10] sm:$0xf] }
 0x535   : > { %v4424_v10 = vpop.f32.mrf.mxu0 }
 0x536   : > { %v4441_v13 = vadd.f32 %v4424_v10, %v4332_v34  ;;  %v4582_v55 = vadd.f32 %v7667_v35, %v4443_v43 }
 0x537   : > { %v7672_v23 = vpop.f32.mrf.mxu0 }
 0x538   : > { %v4686_v41 = vadd.f32 %v7672_v23, %v4577_v61  ;;  %v4580_v8 = vadd.f32 %v4563_v49, %v4441_v13 }
 0x539   : > { %v4653_v54 = vpop.f32.mrf.mxu0 }
 0x53a   : > { %v4684_v57 = vadd.f32 %v4653_v54, %v4575_v0  ;;  %v4701_v33 = vadd.f32 %v7167_v46, %v4686_v41 }
 0x53b   : > { %v7673_v37 = vpop.f32.mrf.mxu0 }
 0x53c   : > { %v4687_v53 = vadd.f32 %v7673_v37, %v4578_v39  ;;  %v4699_v21 = vadd.f32 %v7167_v46, %v4684_v57  ;;  %v4709_v30 = vmax.f32 %v4701_v33, 0.0  ;;  %v4908_v57 = vsel %vm1396_vm6, %v9414_v42, 0 }
 0x53d   : > { %v4656_v25 = vpop.f32.mrf.mxu0 }
 0x53e   : > { %v4702_v56 = vadd.f32 %v7167_v46, %v4687_v53  ;;  %v4685_v50 = vadd.f32 %v4656_v25, %v4576_v20  ;;  %v4707_v27 = vmax.f32 %v4699_v21, 0.0  ;;  %v5154_v25 = vsel %vm1396_vm6, %v7191_v44, 0 }
 0x53f   : > { %v7676_v19 = vpop.f32.mrf.mxu0  ;;  %v5072_v21 = vsel %vm1396_vm6, %v7186_v7, 0 }
 0x540   : > { %v4710_v14 = vmax.f32 %v4702_v56, 0.0  ;;  %v4700_v22 = vadd.f32 %v7167_v46, %v4685_v50  ;;  %v4690_v9 = vadd.f32 %v7676_v19, %v4581_v31  ;;  %v7196_v56 = vld [vmem:[%s10259_s16 + $0x18] sm:$0xf] }
 0x541   : > { %v4669_v32 = vpop.f32.mrf.mxu0  ;;  %v5232_v43 = vsel %vm1396_vm6, %v7196_v56, 0 }
 0x542   : > { %v4716_v38 = vpack.c.bf16 %v4710_v14, %v4709_v30  ;;  %v4708_v15 = vmax.f32 %v4700_v22, 0.0  ;;  %v4688_v45 = vadd.f32 %v4669_v32, %v4579_v2  ;;  %v4705_v59 = vadd.f32 %v7167_v46, %v4690_v9  ;;  %v7201_v30 = vld [vmem:[%s10261_s18 + $0x8] sm:$0xff]  ;;  %v9502_v14 = vld [vmem:[%s10261_s18 + $0x18] sm:$0xff] }
 0x543   : > { %v7677_v60 = vpop.f32.mrf.mxu0  ;;  %v7203_v22 = vcombine.high %v7201_v30, %v7201_v30  ;;  %v7202_v9 = vcombine.low %v7201_v30, %v7201_v30  ;;  %v7226_v32 = vcombine.high %v9502_v14, %v9502_v14 }
 0x544   : > { %v4715_v62 = vpack.c.bf16 %v4708_v15, %v4707_v27  ;;  %v4691_v24 = vadd.f32 %v7677_v60, %v4582_v55  ;;  %v4724_v36 = vrot.slane %v4716_v38, 4  ;;  %v4703_v10 = vadd.f32 %v7167_v46, %v4688_v45  ;;  %v9509_v27 = vld [vmem:[%s10261_s18 + $0x10] sm:$0xff] }
 0x545   : > { %v4672_v28 = vpop.f32.mrf.mxu0  ;;  %v4713_v41 = vmax.f32 %v4705_v59, 0.0  ;;  %v5442_v38 = vsel %vm1396_vm6, %v7202_v9, 0  ;;  %v7218_v15 = vcombine.high %v9509_v27, %v9509_v27 }
 0x546   : > { %v4723_v12 = vrot.slane %v4715_v62, 4  ;;  %v4689_v52 = vadd.f32 %v4672_v28, %v4580_v8  ;;  %v4706_v61 = vadd.f32 %v7167_v46, %v4691_v24  ;;  %v4711_v26 = vmax.f32 %v4703_v10, 0.0 }
 0x548   : > { %v4731_v16 = vsel %vm1396_vm6, 0, %v4723_v12  ;;  %v4704_v23 = vadd.f32 %v7167_v46, %v4689_v52  ;;  %v4725_v47 = vsel %vm1396_vm6, %v4723_v12, %v4724_v36  ;;  %v4714_v0 = vmax.f32 %v4706_v61, 0.0 }
 0x549   : > { %7691 = vmatmul.mubr.msk.bf16.vlgmr.msra.gmra.mxu0 %vm1383_vm11, %v4731_v16  ;;  %v4740_v29 = vrot.slane %v4725_v47, 4  ;;  %v4738_v18 = vrot.slane %v4731_v16, 4 }
 0x54a   : > { %v4712_v54 = vmax.f32 %v4704_v23, 0.0  ;;  %7694 = vmatprep.mubr.msk.bf16.mxu0 %vm1383_vm11, %v4725_v47  ;;  %7709 = vmatpush3.bf16.msra.mxu0 %v4992_v4  ;;  %v4718_v63 = vpack.c.bf16 %v4714_v0, %v4713_v41 }
 0x54b   : > { %v4739_v46 = vsel %vm1396_vm6, %v8749_v58, %v4738_v18  ;;  %v4741_v40 = vsel %vm1396_vm6, %v4738_v18, %v4740_v29  ;;  %7774 = vmatprep.subr.msk.bf16.mxu0 %vm1396_vm6, %v7191_v44 }
 0x54c   : > { %v4717_v39 = vpack.c.bf16 %v4712_v54, %v4711_v26  ;;  %7680 = vmatprep.mubr.msk.bf16.mxu1 %vm1383_vm11, %v4739_v46  ;;  %v4728_v6 = vrot.slane %v4718_v63, 4 }
 0x54d   : > { %7681 = vmatmul.mubr.msk.bf16.vlgmr.msra.gmra.mxu1 %vm1383_vm11, %v4741_v40 }
 0x54e   : > { %v4726_v48 = vrot.slane %v4717_v39, 4  ;;  %7699 = vmatpush3.bf16.msra.mxu1 %v4908_v57  ;;  %v4733_v34 = vsel %vm1396_vm6, %v4728_v6, 0 }
 0x54f   : > { %7773 = vmatprep.subr.msk.bf16.mxu1 %vm1396_vm6, %v7186_v7  ;;  %v4986_v50 = vrot.slane %v4733_v34, 4 }
 0x550   : > { %v4729_v37 = vsel %vm1396_vm6, %v4726_v48, %v4728_v6  ;;  %v4727_v42 = vsel %vm1396_vm6, %v4724_v36, %v4726_v48 }
 0x551   : > { %7695 = vmatmul.mubr.msk.bf16.gmra.mxu0 %vm1383_vm11, %v4727_v42  ;;  %v4742_v33 = vrot.slane %v4727_v42, 4  ;;  %v4744_v53 = vrot.slane %v4729_v37, 4  ;;  %v5149_v31 = vsel %vm1396_vm6, %v4986_v50, %v8749_v58  ;;  %v5380_v58 = vld [vmem:[%s10261_s18] sm:$0xff] }
 0x552   : > { %7710 = vmatprep.mubr.msk.bf16.mxu0 %vm1383_vm11, %v4741_v40  ;;  %v7210_v19 = vcombine.high %v5380_v58, %v5380_v58  ;;  %v7209_v2 = vcombine.low %v5380_v58, %v5380_v58 }
 0x553   : > { %v4743_v20 = vsel %vm1396_vm6, %v4740_v29, %v4742_v33  ;;  %v4745_v1 = vsel %vm1396_vm6, %v4742_v33, %v4744_v53  ;;  %v4987_v35 = vsel %vm1396_vm6, %v4744_v53, %v4986_v50 }
 0x554   : > { %7684 = vmatprep.mubr.msk.bf16.mxu1 %vm1383_vm11, %v4743_v20  ;;  %v5538_v13 = vsel %vm1396_vm6, %v7209_v2, 0 }
 0x555   : > { %7685 = vmatmul.mubr.msk.bf16.gmra.mxu1 %vm1383_vm11, %v4745_v1 }
 0x556   : > { %7700 = vmatprep.mubr.msk.bf16.mxu1 %vm1383_vm11, %v4731_v16 }
 0x559   : > { %7711 = vmatmul.mubr.msk.bf16.vlgmr.msra.gmra.mxu0 %vm1383_vm11, %v4743_v20 }
 0x55a   : > { %7714 = vmatprep.mubr.msk.bf16.mxu0 %vm1383_vm11, %v4745_v1  ;;  %7729 = vmatpush3.bf16.msra.mxu0 %v5154_v25 }
 0x55b   : > { %7204 = vmatprep.subr.msk.bf16.mxu0 %vm1396_vm6, %v7203_v22 }
 0x55d   : > { %7701 = vmatmul.mubr.msk.bf16.vlgmr.msra.gmra.mxu1 %vm1383_vm11, %v4725_v47 }
 0x55e   : > { %7719 = vmatpush3.bf16.msra.mxu1 %v5072_v21  ;;  %7704 = vmatprep.mubr.msk.bf16.mxu1 %vm1383_vm11, %v4727_v42 }
 0x55f   : > { %7775 = vmatprep.subr.msk.bf16.mxu1 %vm1396_vm6, %v7196_v56 }
 0x561   : > { %7715 = vmatmul.mubr.msk.bf16.gmra.mxu0 %vm1383_vm11, %v4987_v35 }
 0x562   : > { %7730 = vmatprep.mubr.msk.bf16.mxu0 %vm1383_vm11, %v4743_v20 }
 0x565   : > { %7705 = vmatmul.mubr.msk.bf16.gmra.mxu1 %vm1383_vm11, %v4729_v37 }
 0x566   : > { %7720 = vmatprep.mubr.msk.bf16.mxu1 %vm1383_vm11, %v4725_v47 }
 0x569   : > { %7731 = vmatmul.mubr.msk.bf16.vlgmr.msra.gmra.mxu0 %vm1383_vm11, %v4745_v1 }
 0x56a   : > { %7734 = vmatprep.mubr.msk.bf16.mxu0 %vm1383_vm11, %v4987_v35  ;;  %5462 = vmatpush1.bf16.msra.mxu0 %v5442_v38 }
 0x56b   : > { %7219 = vmatprep.subr.msk.bf16.mxu0 %vm1396_vm6, %v7218_v15 }
 0x56d   : > { %7721 = vmatmul.mubr.msk.bf16.vlgmr.msra.gmra.mxu1 %vm1383_vm11, %v4727_v42 }
 0x56e   : > { %7739 = vmatpush3.bf16.msra.mxu1 %v5232_v43  ;;  %7724 = vmatprep.mubr.msk.bf16.mxu1 %vm1383_vm11, %v4729_v37 }
 0x56f   : > { %7211 = vmatprep.subr.msk.bf16.mxu1 %vm1396_vm6, %v7210_v19 }
 0x571   : > { %7735 = vmatmul.mubr.msk.bf16.gmra.mxu0 %vm1383_vm11, %v5149_v31 }
 0x572   : > { %5479 = vmatprep.mubr.bf16.mxu0 %v10433_v5 }
 0x575   : > { %7725 = vmatmul.mubr.msk.bf16.gmra.mxu1 %vm1383_vm11, %v4733_v34 }
 0x576   : > { %7740 = vmatprep.mubr.msk.bf16.mxu1 %vm1383_vm11, %v4727_v42 }
 0x57d   : > { %7741 = vmatmul.mubr.msk.bf16.vlgmr.msra.gmra.mxu1 %vm1383_vm11, %v4729_v37 }
 0x57e   : > { %7744 = vmatprep.mubr.msk.bf16.mxu1 %vm1383_vm11, %v4733_v34  ;;  %5558 = vmatpush1.bf16.msra.mxu1 %v5538_v13 }
 0x57f   : > { %7227 = vmatprep.subr.msk.bf16.mxu1 %vm1396_vm6, %v7226_v32 }
 0x585   : > { %7745 = vmatmul.mubr.bf16.gmra.mxu1 %v10433_v5 }
 0x586   : > { %5575 = vmatprep.mubr.bf16.mxu1 %v10433_v5 }
 0x609   : > { %v7692_v45 = vpop.f32.mrf.mxu0 }
 0x60b   : > { %v4871_v49 = vpop.f32.mrf.mxu0 }
 0x60d   : > { %v7682_v55 = vpop.f32.mrf.mxu1  ;;  %v7693_v60 = vpop.f32.mrf.mxu0 }
 0x60e   : > { %v4880_v33 = vadd.f32 %v7692_v45, %v7682_v55 }
 0x60f   : > { %v4795_v62 = vpop.f32.mrf.mxu1  ;;  %v4874_v8 = vpop.f32.mrf.mxu0 }
 0x610   : > { %v4872_v20 = vadd.f32 %v4871_v49, %v4795_v62 }
 0x611   : > { %v7683_v59 = vpop.f32.mrf.mxu1  ;;  %v7696_v24 = vpop.f32.mrf.mxu0 }
 0x612   : > { %v4883_v21 = vadd.f32 %v7693_v60, %v7683_v59 }
 0x613   : > { %v4798_v28 = vpop.f32.mrf.mxu1  ;;  %v4887_v36 = vpop.f32.mrf.mxu0 }
 0x614   : > { %v4875_v35 = vadd.f32 %v4874_v8, %v4798_v28 }
 0x615   : > { %v7686_v12 = vpop.f32.mrf.mxu1  ;;  %v7697_v10 = vpop.f32.mrf.mxu0 }
 0x616   : > { %v4896_v22 = vadd.f32 %v7696_v24, %v7686_v12  ;;  %v7200_v12 = vld [vmem:[%s10260_s17] ss:$0 sm:$0xff] }
 0x617   : > { %v4811_v52 = vpop.f32.mrf.mxu1  ;;  %v4890_v61 = vpop.f32.mrf.mxu0 }
 0x618   : > { %v4888_v45 = vadd.f32 %v4887_v36, %v4811_v52 }
 0x619   : > { %v7687_v4 = vpop.f32.mrf.mxu1  ;;  %v7712_v16 = vpop.f32.mrf.mxu0 }
 0x61b   : > { %v4814_v23 = vpop.f32.mrf.mxu1  ;;  %v5028_v47 = vpop.f32.mrf.mxu0 }
 0x61d   : > { %v7702_v44 = vpop.f32.mrf.mxu1  ;;  %v7713_v41 = vpop.f32.mrf.mxu0 }
 0x61e   : > { %v4977_v1 = vadd.f32 %v7702_v44, %v4880_v33  ;;  %v4899_v44 = vadd.f32 %v7697_v10, %v7687_v4 }
 0x61f   : > { %v4944_v0 = vpop.f32.mrf.mxu1  ;;  %v5031_v29 = vpop.f32.mrf.mxu0 }
 0x620   : > { %v4975_v56 = vadd.f32 %v4944_v0, %v4872_v20  ;;  %v5061_v31 = vadd.f32 %v7712_v16, %v4977_v1 }
 0x621   : > { %v7703_v18 = vpop.f32.mrf.mxu1  ;;  %v7716_v26 = vpop.f32.mrf.mxu0 }
 0x622   : > { %v4978_v43 = vadd.f32 %v7703_v18, %v4883_v21  ;;  %v5059_v30 = vadd.f32 %v5028_v47, %v4975_v56 }
 0x623   : > { %v4947_v54 = vpop.f32.mrf.mxu1  ;;  %v5044_v63 = vpop.f32.mrf.mxu0 }
 0x624   : > { %v4976_v2 = vadd.f32 %v4947_v54, %v4875_v35  ;;  %v5062_v15 = vadd.f32 %v7713_v41, %v4978_v43 }
 0x625   : > { %v7706_v46 = vpop.f32.mrf.mxu1  ;;  %v7717_v40 = vpop.f32.mrf.mxu0 }
 0x626   : > { %v4981_v49 = vadd.f32 %v7706_v46, %v4896_v22  ;;  %v5060_v60 = vadd.f32 %v5031_v29, %v4976_v2 }
 0x627   : > { %v4960_v57 = vpop.f32.mrf.mxu1  ;;  %v5047_v7 = vpop.f32.mrf.mxu0 }
 0x628   : > { %v4979_v8 = vadd.f32 %v4960_v57, %v4888_v45  ;;  %v5065_v24 = vadd.f32 %v7716_v26, %v4981_v49 }
 0x629   : > { %v7707_v39 = vpop.f32.mrf.mxu1  ;;  %v7732_v37 = vpop.f32.mrf.mxu0 }
 0x62a   : > { %v4982_v47 = vadd.f32 %v7707_v39, %v4899_v44 }
 0x62b   : > { %v4963_v6 = vpop.f32.mrf.mxu1  ;;  %v5190_v25 = vpop.f32.mrf.mxu0 }
 0x62c   : > { %v5066_v20 = vadd.f32 %v7717_v40, %v4982_v47 }
 0x62d   : > { %v7722_v48 = vpop.f32.mrf.mxu1  ;;  %v7733_v58 = vpop.f32.mrf.mxu0 }
 0x62e   : > { %v5141_v13 = vadd.f32 %v7722_v48, %v5061_v31  ;;  %v4891_v48 = vadd.f32 %v4890_v61, %v4814_v23 }
 0x62f   : > { %v5108_v42 = vpop.f32.mrf.mxu1  ;;  %v5193_v38 = vpop.f32.mrf.mxu0 }
 0x630   : > { %v5139_v32 = vadd.f32 %v5108_v42, %v5059_v30  ;;  %v5223_v59 = vadd.f32 %v7732_v37, %v5141_v13  ;;  %v4980_v46 = vadd.f32 %v4963_v6, %v4891_v48  ;;  %v5063_v37 = vadd.f32 %v5044_v63, %v4979_v8 }
 0x631   : > { %v7723_v53 = vpop.f32.mrf.mxu1  ;;  %v7736_v16 = vpop.f32.mrf.mxu0 }
 0x632   : > { %v5142_v62 = vadd.f32 %v7723_v53, %v5062_v15  ;;  %v5221_v54 = vadd.f32 %v5190_v25, %v5139_v32  ;;  %v5064_v25 = vadd.f32 %v5047_v7, %v4980_v46 }
 0x633   : > { %v5111_v34 = vpop.f32.mrf.mxu1  ;;  %v5206_v4 = vpop.f32.mrf.mxu0 }
 0x634   : > { %v5140_v0 = vadd.f32 %v5111_v34, %v5060_v60  ;;  %v5224_v41 = vadd.f32 %v7733_v58, %v5142_v62 }
 0x635   : > { %v7726_v50 = vpop.f32.mrf.mxu1  ;;  %v7737_v56 = vpop.f32.mrf.mxu0 }
 0x636   : > { %v5145_v29 = vadd.f32 %v7726_v50, %v5065_v24  ;;  %v5222_v33 = vadd.f32 %v5193_v38, %v5140_v0  ;;  %v7225_v24 = vcombine.low %v9502_v14, %v9502_v14 }
 0x637   : > { %v5124_v19 = vpop.f32.mrf.mxu1  ;;  %v5209_v32 = vpop.f32.mrf.mxu0 }
 0x638   : > { %v5143_v53 = vadd.f32 %v5124_v19, %v5063_v37  ;;  %v5227_v34 = vadd.f32 %v7736_v16, %v5145_v29 }
 0x639   : > { %v7727_v9 = vpop.f32.mrf.mxu1 }
 0x63a   : > { %v5146_v1 = vadd.f32 %v7727_v9, %v5066_v20  ;;  %v5225_v31 = vadd.f32 %v5206_v4, %v5143_v53 }
 0x63b   : > { %v5127_v55 = vpop.f32.mrf.mxu1 }
 0x63c   : > { %v5144_v63 = vadd.f32 %v5127_v55, %v5064_v25  ;;  %v5228_v30 = vadd.f32 %v7737_v56, %v5146_v1 }
 0x63d   : > { %v7742_v28 = vpop.f32.mrf.mxu1 }
 0x63e   : > { %v5301_v18 = vadd.f32 %v7742_v28, %v5223_v59  ;;  %v5226_v49 = vadd.f32 %v5209_v32, %v5144_v63 }
 0x63f   : > { %v5268_v36 = vpop.f32.mrf.mxu1 }
 0x640   : > { %v5299_v52 = vadd.f32 %v5268_v36, %v5221_v54  ;;  %v5316_v57 = vadd.f32 %v7200_v12, %v5301_v18 }
 0x641   : > { %v7743_v10 = vpop.f32.mrf.mxu1 }
 0x642   : > { %v5302_v42 = vadd.f32 %v7743_v10, %v5224_v41  ;;  %v5314_v23 = vadd.f32 %v7200_v12, %v5299_v52  ;;  %v5324_v35 = vmax.f32 %v5316_v57, 0.0  ;;  %v9525_v41 = vld [vmem:[%s10261_s18 + $0x28] sm:$0xff]  ;;  %v5813_v57 = vsel %vm1396_vm6, %v7225_v24, 0 }
 0x643   : > { %v5271_v61 = vpop.f32.mrf.mxu1 }
 0x644   : > { %v5317_v26 = vadd.f32 %v7200_v12, %v5302_v42  ;;  %v5300_v39 = vadd.f32 %v5271_v61, %v5222_v33  ;;  %v5322_v2 = vmax.f32 %v5314_v23, 0.0  ;;  %v7242_v42 = vcombine.high %v9525_v41, %v9525_v41 }
 0x645   : > { %v7746_v21 = vpop.f32.mrf.mxu1 }
 0x646   : > { %v5325_v6 = vmax.f32 %v5317_v26, 0.0  ;;  %v5315_v50 = vadd.f32 %v7200_v12, %v5300_v39  ;;  %v5305_v43 = vadd.f32 %v7746_v21, %v5227_v34  ;;  %v7217_v34 = vcombine.low %v9509_v27, %v9509_v27  ;;  %v9551_v21 = vld [vmem:[%s10261_s18 + $0x20] sm:$0xff] }
 0x647   : > { %v5284_v58 = vpop.f32.mrf.mxu1 }
 0x648   : > { %v5331_v13 = vpack.c.bf16 %v5325_v6, %v5324_v35  ;;  %v5323_v19 = vmax.f32 %v5315_v50, 0.0  ;;  %v5303_v40 = vadd.f32 %v5284_v58, %v5225_v31  ;;  %v5320_v15 = vadd.f32 %v7200_v12, %v5305_v43  ;;  %v10464_v31 = vld [vmem:[#allocation2_spill] sm:$0xff] }
 0x649   : > { %v7747_v22 = vpop.f32.mrf.mxu1  ;;  %v5655_v58 = vsel %vm1396_vm6, %v7217_v34, 0 }
 0x64a   : > { %v5343_v38 = vshrl.u32 %v5331_v13, 16  ;;  %v5346_v9 = vshll.u32 %v5331_v13, 16  ;;  %v5330_v7 = vpack.c.bf16 %v5323_v19, %v5322_v2  ;;  %v5306_v45 = vadd.f32 %v7747_v22, %v5228_v30  ;;  %v10465_v19 = vld [vmem:[#allocation10_spill] sm:$0xff] }
 0x64b   : > { %v5287_v62 = vpop.f32.mrf.mxu1  ;;  %v5318_v8 = vadd.f32 %v7200_v12, %v5303_v40  ;;  %v5328_v54 = vmax.f32 %v5320_v15, 0.0  ;;  %v7234_v2 = vcombine.high %v9551_v21, %v9551_v21  ;;  %v10466_v15 = vld [vmem:[#allocation12_spill] sm:$0xff] }
 0x64c   : > { %v5345_v60 = vrot.slane %v5343_v38, 6  ;;  %v5348_v59 = vrot.slane %v5346_v9, 7  ;;  %v5335_v55 = vshrl.u32 %v5330_v7, 16  ;;  %v5338_v44 = vshll.u32 %v5330_v7, 16 }
 0x64d   : > { %v5321_v28 = vadd.f32 %v7200_v12, %v5306_v45  ;;  %v5304_v16 = vadd.f32 %v5287_v62, %v5226_v49  ;;  %v5326_v46 = vmax.f32 %v5318_v8, 0.0  ;;  %v10467_v49 = vld [vmem:[#allocation3_spill] sm:$0xff] }
 0x64e   : > { %v5337_v0 = vrot.slane %v5335_v55, 6  ;;  %v5340_v18 = vrot.slane %v5338_v44, 7  ;;  %v5349_v36 = vor.u32 %v5348_v59, %v5345_v60 }
 0x64f   : > { %v5329_v48 = vmax.f32 %v5321_v28, 0.0  ;;  %v5319_v47 = vadd.f32 %v7200_v12, %v5304_v16 }
 0x650   : > { %v5341_v52 = vor.u32 %v5340_v18, %v5337_v0 }
 0x651   : > { %v5333_v29 = vpack.c.bf16 %v5329_v48, %v5328_v54  ;;  %v5327_v37 = vmax.f32 %v5319_v47, 0.0  ;;  %v10468_v54 = vld [vmem:[#allocation6_spill] sm:$0xff] }
 0x652   : > { %v9528_v10 = vsel %vm1220_vm2, %v5341_v52, %v5349_v36  ;;  %v9532_v4 = vsel %vm8387_vm9, 0, %v5341_v52 }
 0x653   : > { %v5332_v12 = vpack.c.bf16 %v5327_v37, %v5326_v46  ;;  %v5376_v14 = vmul.bf16 %v9532_v4, %v10435_v51  ;;  %v5381_v33 = vmul.bf16 %v9532_v4, %v10437_v11  ;;  %v5382_v53 = vmul.bf16 %v9528_v10, %v10438_v17  ;;  %v10470_v37 = vld [vmem:[#allocation25_spill] sm:$0xff] }
 0x654   : > { %v5361_v20 = vshrl.u32 %v5333_v29, 16  ;;  %v5364_v61 = vshll.u32 %v5333_v29, 16  ;;  %v5377_v27 = vmul.bf16 %v9528_v10, %v10464_v31  ;;  %v5752_v59 = vshrl.u32 %v9532_v4, 16  ;;  %v10474_v31 = vld [vmem:[#allocation26_spill] sm:$0xff] }
 0x655   : > { %v5352_v23 = vshrl.u32 %v5332_v12, 16  ;;  %v5355_v26 = vshll.u32 %v5332_v12, 16  ;;  %7212 = vmatmul.mubr.msk.bf16.vlgmr.msra.gmra.mxu1 %vm1383_vm11, %v5376_v14  ;;  %v5391_v39 = vshll.u32 %v5381_v33, 16  ;;  %v5396_v51 = vshll.u32 %v5382_v53, 16  ;;  %v10471_v14 = vld [vmem:[#allocation5_spill] sm:$0xff] }
 0x656   : > { %5833 = vmatpush1.bf16.msra.mxu1 %v5813_v57  ;;  %5585 = vmatprep.mubr.bf16.mxu1 %v10433_v5  ;;  %v5389_v11 = vshrl.u32 %v5381_v33, 16  ;;  %v5363_v56 = vrot.slane %v5361_v20, 6  ;;  %v5366_v35 = vrot.slane %v5364_v61, 7  ;;  %v5400_v38 = vshrl.u32 %v5382_v53, 16  ;;  %v10472_v20 = vld [vmem:[#allocation27_spill] sm:$0xff] }
 0x657   : > { %v5354_v1 = vrot.slane %v5352_v23, 6  ;;  %v5357_v25 = vrot.slane %v5355_v26, 7  ;;  %7243 = vmatprep.subr.msk.bf16.mxu1 %vm1396_vm6, %v7242_v42  ;;  %v5393_v17 = vrot.slane %v5391_v39, 1  ;;  %v5398_v63 = vrot.slane %v5396_v51, 1 }
 0x658   : > { %v5367_v30 = vor.u32 %v5366_v35, %v5363_v56  ;;  %v5755_v55 = vshll.u32 %v9532_v4, 16  ;;  %v5760_v44 = vshrl.u32 %v9528_v10, 16  ;;  %v5763_v0 = vshll.u32 %v9528_v10, 16 }
 0x659   : > { %v5358_v6 = vor.u32 %v5357_v25, %v5354_v1  ;;  %v5394_v50 = vor.u32 %v5393_v17, %v5389_v11  ;;  %v5402_v7 = vor.u32 %v5400_v38, %v5398_v63  ;;  %v5754_v47 = vrot.slane %v5752_v59, 1  ;;  %v10473_v11 = vld [vmem:[#allocation28_spill] sm:$0xff] }
 0x65a   : > { %v9584_v8 = vsel %vm8387_vm9, %v5367_v30, 0  ;;  %v5757_v24 = vrot.slane %v5755_v55, 2  ;;  %v5765_v46 = vrot.slane %v5763_v0, 2  ;;  %v5907_v29 = vmul.bf16 %v9532_v4, %v10469_v3  ;;  %vm10492_vm9 = vmmov %vm10401_vm0 }
 0x65b   : > { %v9554_v43 = vsel %vm1220_vm2, %v5349_v36, %v5358_v6  ;;  %v5399_v13 = vsel %vm1346_vm12, %v5394_v50, %v5398_v63  ;;  %v9568_v32 = vsel %vm1220_vm2, %v5358_v6, %v5367_v30  ;;  %v5385_v48 = vmul.bf16 %v9584_v8, %v10468_v54  ;;  %vm10491_vm2 = vmmov %vm10401_vm0 }
 0x65c   : > { %v5383_v40 = vmul.bf16 %v9554_v43, %v10465_v19  ;;  %7205 = vmatmul.mubr.msk.bf16.vlgmr.msra.gmra.mxu0 %vm1383_vm11, %v5399_v13  ;;  %v5384_v45 = vmul.bf16 %v9568_v32, %v10466_v15  ;;  %v5378_v62 = vmul.bf16 %v9554_v43, %v10467_v49  ;;  %v5762_v36 = vrot.slane %v5760_v44, 1  ;;  %v10475_v13 = vld [vmem:[#allocation7_spill] sm:$0xff] }
 0x65d   : > { %7213 = vmatmul.mubr.msk.bf16.gmra.mxu1 %vm1383_vm11, %v5377_v27  ;;  %5675 = vmatpush1.bf16.msra.mxu0 %v5655_v58  ;;  %v5908_v12 = vmul.bf16 %v9528_v10, %v10470_v37  ;;  %v5379_v57 = vmul.bf16 %v9568_v32, %v10471_v14  ;;  %v5919_v33 = vrot.slane %v5907_v29, 2  ;;  %v5909_v61 = vmul.bf16 %v9554_v43, %v10472_v20 }
 0x65e   : > { %5489 = vmatprep.mubr.bf16.mxu0 %v10433_v5  ;;  %v5404_v22 = vshll.u32 %v5383_v40, 16  ;;  %5595 = vmatprep.mubr.bf16.mxu1 %v10433_v5  ;;  %v5408_v28 = vshrl.u32 %v5383_v40, 16  ;;  %v5412_v16 = vshll.u32 %v5384_v45, 16  ;;  %v5420_v23 = vshll.u32 %v5385_v48, 16  ;;  %v10476_v40 = vld [vmem:[#allocation29_spill] sm:$0xff] }
 0x65f   : > { %7235 = vmatprep.subr.msk.bf16.mxu0 %vm1396_vm6, %v7234_v2  ;;  %v5920_v53 = vrot.slane %v5908_v12, 2  ;;  %v5758_v26 = vor.u32 %v5757_v24, %v5754_v47  ;;  %v7241_v39 = vcombine.low %v9525_v41, %v9525_v41  ;;  %v5416_v51 = vshrl.u32 %v5384_v45, 16  ;;  %v10478_v45 = vld [vmem:[#allocation30_spill] sm:$0xff]  ;;  %v10480_v48 = vld [vmem:[#allocation33_spill] sm:$0xff]  ;;  %v10481_v24 = vld [vmem:[#allocation31_spill] sm:$0xff] }
 0x660   : > { %v5406_v9 = vrot.slane %v5404_v22, 1  ;;  %v5414_v52 = vrot.slane %v5412_v16, 1  ;;  %v5766_v1 = vor.u32 %v5765_v46, %v5762_v36  ;;  %v5922_v34 = vrot.slane %v5909_v61, 2  ;;  %v10477_v22 = vld [vmem:[#allocation13_spill] sm:$0xff]  ;;  %v10479_v16 = vld [vmem:[#allocation32_spill] sm:$0xff]  ;;  %v10482_v61 = vld [vmem:[#allocation14_spill] sm:$0xff] }
 0x661   : > { %v9607_v25 = vsel %vm1867_vm14, %v5919_v33, %v5920_v53  ;;  %v5910_v17 = vmul.bf16 %v9568_v32, %v10473_v11  ;;  %v5769_v35 = vshrl.u32 %v9554_v43, 16  ;;  %v5772_v6 = vshll.u32 %v9554_v43, 16 }
 0x662   : > { %v5407_v60 = vsel %vm1346_vm12, %v5402_v7, %v5406_v9  ;;  %v5410_v18 = vor.u32 %v5408_v28, %v5406_v9  ;;  %v5418_v56 = vor.u32 %v5416_v51, %v5414_v52  ;;  %v9614_v41 = vsel %vm1867_vm14, %v5920_v53, %v5922_v34  ;;  %v7865_v9 = vld [vmem:[%s10263_s20 + $0x4] ss:$8 sps:$4 sm:$0xff]  }
 0x663   : > { %v6109_v50 = vsel %vm1396_vm6, %v7241_v39, 0  ;;  %v5924_v63 = vrot.slane %v5910_v17, 2  ;;  %v5911_v27 = vmul.bf16 %v9584_v8, %v10474_v31  ;;  %v5422_v58 = vrot.slane %v5420_v23, 1 }
 0x664   : > { %7206 = vmatmul.mubr.msk.bf16.gmra.mxu0 %vm1383_vm11, %v5407_v60  ;;  %v5415_v42 = vsel %vm1346_vm12, %v5410_v18, %v5414_v52  ;;  %v5767_v2 = vsel %vm1690_vm5, %v5758_v26, %v5766_v1  ;;  %v5616_v19 = vmul.bf16 %v9532_v4, %v10475_v13  ;;  %v6203_v30 = vmul.bf16 %v9532_v4, %v10476_v40 }
 0x665   : > { %7214 = vmatmul.mubr.msk.bf16.gmra.mxu1 %vm1383_vm11, %v5378_v62  ;;  %5499 = vmatprep.mubr.bf16.mxu0 %v10433_v5  ;;  %v5617_v38 = vmul.bf16 %v9528_v10, %v10477_v22  ;;  %v9630_v7 = vsel %vm1867_vm14, %v5922_v34, %v5924_v63  ;;  %v5926_v15 = vrot.slane %v5911_v27, 2  ;;  %v6204_v49 = vmul.bf16 %v9528_v10, %v10478_v45 }
 0x666   : > { %5605 = vmatprep.mubr.bf16.mxu1 %v10433_v5  ;;  %v5423_v62 = vsel %vm1346_vm12, %v5418_v56, %v5422_v58  ;;  %v5771_v60 = vrot.slane %v5769_v35, 1  ;;  %v5774_v59 = vrot.slane %v5772_v6, 2  ;;  %v6215_v55 = vrot.slane %v6203_v30, 3  ;;  %vm10493_vm12 = vmmov %vm10401_vm0 }
 0x667   : > { %v9638_v44 = vsel %vm1867_vm14, %v5924_v63, %v5926_v15  ;;  %v6216_v28 = vrot.slane %v6204_v49, 3  ;;  %v6205_v0 = vmul.bf16 %v9554_v43, %v10479_v16  ;;  %v5628_v18 = vrot.slane %v5616_v19, 1  ;;  %v10484_v63 = vld [vmem:[#allocation17_spill] sm:$0xff]  ;;  %v10487_v16 = vld [vmem:[#allocation11_spill] sm:$0xff] }
 0x668   : > { %v7233_v54 = vcombine.low %v9551_v21, %v9551_v21  ;;  %v6206_v47 = vmul.bf16 %v9568_v32, %v10480_v48  ;;  %v6207_v36 = vmul.bf16 %v9584_v8, %v10481_v24  ;;  %v5629_v52 = vrot.slane %v5617_v38, 1  ;;  %v9658_v21 = vld [vmem:[%s10261_s18 + $0x30] sm:$0xff] }
 0x669   : > { %v5778_v46 = vshrl.u32 %v9568_v32, 16  ;;  %v9652_v3 = vsel %vm2203_vm4, %v6215_v55, %v6216_v28  ;;  %v6218_v29 = vrot.slane %v6205_v0, 3  ;;  %v5775_v37 = vor.u32 %v5774_v59, %v5771_v60  ;;  %v10486_v55 = vld [vmem:[#allocation19_spill] sm:$0xff] }
 0x66a   : > { %v5781_v12 = vshll.u32 %v9568_v32, 16  ;;  %v6220_v14 = vrot.slane %v6206_v47, 3  ;;  %v5946_v20 = vsel %vm1396_vm6, %v7233_v54, 0  ;;  %v5618_v23 = vmul.bf16 %v9554_v43, %v10482_v61 }
 0x66b   : > { %v7250_v26 = vcombine.high %v9658_v21, %v9658_v21  ;;  %v5630_v39 = vsel %vm1590_vm10, %v5628_v18, %v5629_v52  ;;  %v5776_v51 = vsel %vm1690_vm5, %v5766_v1, %v5775_v37  ;;  %v5780_v34 = vrot.slane %v5778_v46, 1  ;;  %v10483_v1 = vld [vmem:[#allocation15_spill] sm:$0xff] }
 0x66c   : > { %7207 = vmatmul.mubr.msk.bf16.gmra.mxu0 %vm1383_vm11, %v5415_v42  ;;  %v9661_v42 = vsel %vm2203_vm4, %v6216_v28, %v6218_v29  ;;  %v9664_v33 = vsel %vm2203_vm4, %v6218_v29, %v6220_v14  ;;  %v5783_v11 = vrot.slane %v5781_v12, 2  ;;  %v5631_v17 = vrot.slane %v5618_v23, 1 }
 0x66d   : > { %7215 = vmatmul.mubr.msk.bf16.gmra.mxu1 %vm1383_vm11, %v5379_v57  ;;  %5509 = vmatprep.mubr.bf16.mxu0 %v10433_v5  ;;  %v6222_v57 = vrot.slane %v6207_v36, 3  ;;  %v5787_v35 = vshrl.u32 %v9584_v8, 16  ;;  %v5790_v6 = vshll.u32 %v9584_v8, 16  ;;  %v6040_v31 = vmul.bf16 %v9532_v4, %v10484_v63 }
 0x66e   : > { %5850 = vmatprep.mubr.bf16.mxu1 %v10433_v5  ;;  %v5784_v56 = vor.u32 %v5783_v11, %v5780_v34  ;;  %v5632_v27 = vsel %vm1590_vm10, %v5629_v52, %v5631_v17  ;;  %v6042_v28 = vmul.bf16 %v9554_v43, %v10486_v55  ;;  %v5620_v0 = vmul.bf16 %v9584_v8, %v10487_v16  ;;  %v7863_v43 = vld [vmem:[%s10263_s20] ss:$8 sps:$4 sm:$0xff]  }
 0x66f   : > { %v9667_v53 = vsel %vm2203_vm4, %v6220_v14, %v6222_v57  ;;  %v5789_v19 = vrot.slane %v5787_v35, 1  ;;  %v5792_v40 = vrot.slane %v5790_v6, 2  ;;  %v6048_v22 = vshrl.u32 %v6040_v31, 16 }
 0x670   : > { %v5785_v58 = vsel %vm1690_vm5, %v5775_v37, %v5784_v56  ;;  %v6051_v4 = vshll.u32 %v6040_v31, 16  ;;  %v6065_v48 = vshrl.u32 %v6042_v28, 16  ;;  %v6068_v47 = vshll.u32 %v6042_v28, 16  ;;  %v10488_v37 = vld [vmem:[#allocation21_spill] sm:$0xff] }
 0x671   : > { %v5793_v15 = vor.u32 %v5792_v40, %v5789_v19  ;;  %v6050_v49 = vrot.slane %v6048_v22, 2  ;;  %v5635_v24 = vrot.slane %v5620_v0, 1  ;;  %v6043_v12 = vmul.bf16 %v9568_v32, %v10488_v37 }
 0x672   : > { %v6067_v46 = vrot.slane %v6065_v48, 2  ;;  %v6070_v29 = vrot.slane %v6068_v47, 3  ;;  %v7249_v14 = vcombine.low %v9658_v21, %v9658_v21 }
 0x673   : > { %v6077_v61 = vshll.u32 %v6043_v12, 16 }
 0x674   : > { %7208 = vmatmul.mubr.msk.bf16.gmra.mxu0 %vm1383_vm11, %v5423_v62  ;;  %v6053_v62 = vrot.slane %v6051_v4, 3  ;;  %v6071_v57 = vor.u32 %v6070_v29, %v6067_v46  ;;  %v6242_v23 = vsel %vm1396_vm6, %v7249_v14, 0 }
 0x675   : > { %7228 = vmatmul.mubr.msk.bf16.vlgmr.msra.gmra.mxu1 %vm1383_vm11, %v5767_v2  ;;  %5692 = vmatprep.mubr.bf16.mxu0 %v10433_v5  ;;  %v10485_v2 = vld [vmem:[#allocation18_spill] sm:$0xff] }
 0x676   : > { %6129 = vmatpush1.bf16.msra.mxu1 %v6109_v50  ;;  %5860 = vmatprep.mubr.bf16.mxu1 %v10433_v5  ;;  %v5619_v50 = vmul.bf16 %v9568_v32, %v10483_v1  ;;  %v6041_v13 = vmul.bf16 %v9528_v10, %v10485_v2  ;;  %v5794_v10 = vsel %vm1690_vm5, %v5784_v56, %v5793_v15 }
 0x677   : > { %6423 = vmatprep.subr.bf16.mxu1 %v7865_v9  ;;  %v6054_v18 = vor.u32 %v6053_v62, %v6050_v49 }
 0x678   : > { %v5633_v30 = vrot.slane %v5619_v50, 1  ;;  %v6056_v38 = vshrl.u32 %v6041_v13, 16  ;;  %v6059_v9 = vshll.u32 %v6041_v13, 16 }
 0x67a   : > { %v5634_v45 = vsel %vm1590_vm10, %v5631_v17, %v5633_v30  ;;  %v6058_v60 = vrot.slane %v6056_v38, 2  ;;  %v6061_v59 = vrot.slane %v6059_v9, 3  ;;  %v5636_v36 = vsel %vm1590_vm10, %v5633_v30, %v5635_v24 }
 0x67c   : > { %7220 = vmatmul.mubr.msk.bf16.vlgmr.msra.gmra.mxu0 %vm1383_vm11, %v5630_v39  ;;  %v6062_v54 = vor.u32 %v6061_v59, %v6058_v60  ;;  %v6079_v39 = vrot.slane %v6077_v61, 3 }
 0x67d   : > { %7229 = vmatmul.mubr.msk.bf16.gmra.mxu1 %vm1383_vm11, %v5776_v51  ;;  %5966 = vmatpush1.bf16.msra.mxu0 %v5946_v20  ;;  %v6074_v20 = vshrl.u32 %v6043_v12, 16  ;;  %v10489_v51 = vld [vmem:[#allocation20_spill] sm:$0xff] }
 0x67e   : > { %5702 = vmatprep.mubr.bf16.mxu0 %v10433_v5  ;;  %5870 = vmatprep.mubr.bf16.mxu1 %v10433_v5  ;;  %v6063_v52 = vsel %vm2025_vm13, %v6054_v18, %v6062_v54  ;;  %v6044_v21 = vmul.bf16 %v9584_v8, %v10489_v51 }
 0x67f   : > { %7251 = vmatprep.subr.msk.bf16.mxu0 %vm1396_vm6, %v7250_v26  ;;  %v6072_v26 = vsel %vm2025_vm13, %v6062_v54, %v6071_v57  ;;  %v6076_v32 = vrot.slane %v6074_v20, 2  ;;  %vm10490_vm6 = vmmov %vm10401_vm0 }
 0x680   : > { %v6083_v11 = vshrl.u32 %v6044_v21, 16  ;;  %v6086_v17 = vshll.u32 %v6044_v21, 16 }
 0x681   : > { %v6080_v34 = vor.u32 %v6079_v39, %v6076_v32 }
 0x682   : > { %v6088_v8 = vrot.slane %v6086_v17, 3 }
 0x683   : > { %v6081_v56 = vsel %vm2025_vm13, %v6071_v57, %v6080_v34 }
 0x684   : > { %7221 = vmatmul.mubr.msk.bf16.gmra.mxu0 %vm1383_vm11, %v5632_v27 }
 0x685   : > { %7230 = vmatmul.mubr.msk.bf16.gmra.mxu1 %vm1383_vm11, %v5785_v58  ;;  %5712 = vmatprep.mubr.bf16.mxu0 %v10433_v5 }
 0x686   : > { %5880 = vmatprep.mubr.bf16.mxu1 %v10433_v5 }
 0x68c   : > { %7222 = vmatmul.mubr.msk.bf16.gmra.mxu0 %vm1383_vm11, %v5634_v45 }
 0x68d   : > { %7231 = vmatmul.mubr.msk.bf16.gmra.mxu1 %vm1383_vm11, %v5794_v10  ;;  %5722 = vmatprep.mubr.bf16.mxu0 %v10433_v5 }
 0x68e   : > { %6146 = vmatprep.mubr.bf16.mxu1 %v10433_v5 }
 0x694   : > { %7223 = vmatmul.mubr.msk.bf16.gmra.mxu0 %vm1383_vm11, %v5636_v36 }
 0x695   : > { %7244 = vmatmul.mubr.msk.bf16.vlgmr.msra.gmra.mxu1 %vm1383_vm11, %v6063_v52  ;;  %5983 = vmatprep.mubr.bf16.mxu0 %v10433_v5 }
 0x696   : > { %6424 = vmatpush1.bf16.msra.mxu1 %v7863_v43  ;;  %6156 = vmatprep.mubr.bf16.mxu1 %v10433_v5 }
 0x69c   : > { %7236 = vmatmul.mubr.msk.bf16.vlgmr.msra.gmra.mxu0 %vm1383_vm11, %v9607_v25  ;;  %v6085_v25 = vrot.slane %v6083_v11, 2 }
 0x69d   : > { %7245 = vmatmul.mubr.msk.bf16.gmra.mxu1 %vm1383_vm11, %v6072_v26  ;;  %6262 = vmatpush1.bf16.msra.mxu0 %v6242_v23 }
 0x69e   : > { %5993 = vmatprep.mubr.bf16.mxu0 %v10433_v5  ;;  %6166 = vmatprep.mubr.bf16.mxu1 %v10433_v5  ;;  %v6089_v35 = vor.u32 %v6088_v8, %v6085_v25 }
 0x6a0   : > { %v6090_v6 = vsel %vm2025_vm13, %v6080_v34, %v6089_v35 }
 0x6a4   : > { %7237 = vmatmul.mubr.msk.bf16.gmra.mxu0 %vm1383_vm11, %v9614_v41  ;;  %v7872_v41 = vld [vmem:[%s8058_s6] sm:$0xff]  }
 0x6a5   : > { %7246 = vmatmul.mubr.msk.bf16.gmra.mxu1 %vm1383_vm11, %v6081_v56  ;;  %6003 = vmatprep.mubr.bf16.mxu0 %v10433_v5 }
 0x6a6   : > { %6176 = vmatprep.mubr.bf16.mxu1 %v10433_v5 }
 0x6ac   : > { %7238 = vmatmul.mubr.msk.bf16.gmra.mxu0 %vm1383_vm11, %v9630_v7  ;;  %v7873_v7 = vld [vmem:[%s8058_s6 + $0x8] sm:$0xff]  }
 0x6ad   : > { %7247 = vmatmul.mubr.msk.bf16.gmra.mxu1 %vm1383_vm11, %v6090_v6  ;;  %6013 = vmatprep.mubr.bf16.mxu0 %v10433_v5 }
 0x6ae   : > { %6441 = vmatprep.mubr.bf16.mxu1 %v10433_v5 }
 0x6b4   : > { %7239 = vmatmul.mubr.msk.bf16.gmra.mxu0 %vm1383_vm11, %v9638_v44  ;;  %v7874_v44 = vld [vmem:[%s8058_s6 + $0x10] sm:$0xff]  }
 0x6b5   : > { %7274 = vmatmul.mubr.msk.bf16.vlgmr.msra.gmra.mxu1 %vm10490_vm6, %v7872_v41  ;;  %6279 = vmatprep.mubr.bf16.mxu0 %v10433_v5 }
 0x6b6   : > { %6451 = vmatprep.mubr.bf16.mxu1 %v10433_v5 }
 0x6bc   : > { %7252 = vmatmul.mubr.msk.bf16.vlgmr.msra.gmra.mxu0 %vm1383_vm11, %v9652_v3  ;;  %v7875_v3 = vld [vmem:[%s8058_s6 + $0x18] sm:$0xff]  }
 0x6bd   : > { %7275 = vmatmul.mubr.msk.bf16.gmra.mxu1 %vm10491_vm2, %v7873_v7  ;;  %6289 = vmatprep.mubr.bf16.mxu0 %v10433_v5 }
 0x6be   : > { %6461 = vmatprep.mubr.bf16.mxu1 %v10433_v5 }
 0x6c4   : > { %7253 = vmatmul.mubr.msk.bf16.gmra.mxu0 %vm1383_vm11, %v9661_v42 }
 0x6c5   : > { %7276 = vmatmul.mubr.msk.bf16.gmra.mxu1 %vm10492_vm9, %v7874_v44  ;;  %6299 = vmatprep.mubr.bf16.mxu0 %v10433_v5 }
 0x6c6   : > { %6471 = vmatprep.mubr.bf16.mxu1 %v10433_v5 }
 0x6cc   : > { %7254 = vmatmul.mubr.msk.bf16.gmra.mxu0 %vm1383_vm11, %v9664_v33 }
 0x6cd   : > { %7277 = vmatmul.mubr.msk.bf16.gmra.mxu1 %vm10493_vm12, %v7875_v3  ;;  %6309 = vmatprep.mubr.bf16.mxu0 %v10433_v5 }
 0x6d4   : > { %7255 = vmatmul.mubr.msk.bf16.gmra.mxu0 %vm1383_vm11, %v9667_v53 }
 0x715   : > { %v5577_v1 = vpop.f32.mrf.mxu1 }
 0x717   : > { %v5579_v42 = vpop.f32.mrf.mxu1 }
 0x719   : > { %v5581_v50 = vpop.f32.mrf.mxu1 }
 0x71b   : > { %v5583_v63 = vpop.f32.mrf.mxu1 }
 0x71c   : > { %v5481_v31 = vpop.f32.mrf.mxu0 }
 0x71d   : > { %v5587_v27 = vpop.f32.mrf.mxu1  ;;  %v5578_v58 = vadd.f32 %v5577_v1, %v5481_v31 }
 0x71e   : > { %v5483_v2 = vpop.f32.mrf.mxu0 }
 0x71f   : > { %v5589_v13 = vpop.f32.mrf.mxu1  ;;  %v5580_v19 = vadd.f32 %v5579_v42, %v5483_v2 }
 0x720   : > { %v5485_v40 = vpop.f32.mrf.mxu0 }
 0x721   : > { %v5591_v33 = vpop.f32.mrf.mxu1  ;;  %v5582_v30 = vadd.f32 %v5581_v50, %v5485_v40 }
 0x722   : > { %v5487_v22 = vpop.f32.mrf.mxu0 }
 0x723   : > { %v5593_v4 = vpop.f32.mrf.mxu1  ;;  %v5584_v38 = vadd.f32 %v5583_v63, %v5487_v22 }
 0x724   : > { %v5491_v5 = vpop.f32.mrf.mxu0 }
 0x725   : > { %v5597_v9 = vpop.f32.mrf.mxu1  ;;  %v5588_v15 = vadd.f32 %v5587_v27, %v5491_v5 }
 0x726   : > { %v5493_v53 = vpop.f32.mrf.mxu0 }
 0x727   : > { %v5599_v45 = vpop.f32.mrf.mxu1  ;;  %v5590_v10 = vadd.f32 %v5589_v13, %v5493_v53 }
 0x728   : > { %v5495_v49 = vpop.f32.mrf.mxu0 }
 0x729   : > { %v5601_v62 = vpop.f32.mrf.mxu1  ;;  %v5592_v60 = vadd.f32 %v5591_v33, %v5495_v49 }
 0x72a   : > { %v5497_v59 = vpop.f32.mrf.mxu0 }
 0x72b   : > { %v5603_v55 = vpop.f32.mrf.mxu1  ;;  %v5594_v28 = vadd.f32 %v5593_v4, %v5497_v59 }
 0x72c   : > { %v5501_v16 = vpop.f32.mrf.mxu0 }
 0x72d   : > { %v5607_v0 = vpop.f32.mrf.mxu1  ;;  %v5598_v18 = vadd.f32 %v5597_v9, %v5501_v16 }
 0x72e   : > { %v5503_v54 = vpop.f32.mrf.mxu0 }
 0x72f   : > { %v5609_v48 = vpop.f32.mrf.mxu1  ;;  %v5600_v47 = vadd.f32 %v5599_v45, %v5503_v54 }
 0x730   : > { %v5505_v24 = vpop.f32.mrf.mxu0 }
 0x731   : > { %v5611_v43 = vpop.f32.mrf.mxu1  ;;  %v5602_v36 = vadd.f32 %v5601_v62, %v5505_v24 }
 0x732   : > { %v5507_v52 = vpop.f32.mrf.mxu0 }
 0x733   : > { %v5613_v46 = vpop.f32.mrf.mxu1  ;;  %v5604_v29 = vadd.f32 %v5603_v55, %v5507_v52 }
 0x734   : > { %v5511_v37 = vpop.f32.mrf.mxu0 }
 0x735   : > { %v5852_v12 = vpop.f32.mrf.mxu1  ;;  %v5608_v14 = vadd.f32 %v5607_v0, %v5511_v37 }
 0x736   : > { %v5513_v57 = vpop.f32.mrf.mxu0 }
 0x737   : > { %v5854_v20 = vpop.f32.mrf.mxu1  ;;  %v5610_v61 = vadd.f32 %v5609_v48, %v5513_v57 }
 0x738   : > { %v5515_v23 = vpop.f32.mrf.mxu0 }
 0x739   : > { %v5856_v26 = vpop.f32.mrf.mxu1  ;;  %v5612_v32 = vadd.f32 %v5611_v43, %v5515_v23 }
 0x73a   : > { %v5517_v39 = vpop.f32.mrf.mxu0 }
 0x73b   : > { %v5858_v51 = vpop.f32.mrf.mxu1  ;;  %v5614_v21 = vadd.f32 %v5613_v46, %v5517_v39 }
 0x73c   : > { %v5694_v34 = vpop.f32.mrf.mxu0 }
 0x73d   : > { %v5862_v11 = vpop.f32.mrf.mxu1  ;;  %v5733_v17 = vadd.f32 %v5694_v34, %v5578_v58 }
 0x73e   : > { %v5696_v56 = vpop.f32.mrf.mxu0 }
 0x73f   : > { %v5864_v25 = vpop.f32.mrf.mxu1  ;;  %v5734_v8 = vadd.f32 %v5696_v56, %v5580_v19  ;;  %v9764_v35 = vadd.f32 %v5852_v12, %v5733_v17 }
 0x740   : > { %v5698_v6 = vpop.f32.mrf.mxu0 }
 0x741   : > { %v5866_v41 = vpop.f32.mrf.mxu1  ;;  %v5735_v7 = vadd.f32 %v5698_v6, %v5582_v30  ;;  %v9766_v44 = vadd.f32 %v5854_v20, %v5734_v8 }
 0x742   : > { %v5700_v3 = vpop.f32.mrf.mxu0 }
 0x743   : > { %v5868_v1 = vpop.f32.mrf.mxu1  ;;  %v5736_v42 = vadd.f32 %v5700_v3, %v5584_v38  ;;  %v9768_v50 = vadd.f32 %v5856_v26, %v5735_v7 }
 0x744   : > { %v5704_v63 = vpop.f32.mrf.mxu0 }
 0x745   : > { %v5872_v31 = vpop.f32.mrf.mxu1  ;;  %v5737_v27 = vadd.f32 %v5704_v63, %v5588_v15  ;;  %v9770_v2 = vadd.f32 %v5858_v51, %v5736_v42 }
 0x746   : > { %v5706_v58 = vpop.f32.mrf.mxu0 }
 0x747   : > { %v5874_v13 = vpop.f32.mrf.mxu1  ;;  %v5738_v19 = vadd.f32 %v5706_v58, %v5590_v10  ;;  %v9772_v40 = vadd.f32 %v5862_v11, %v5737_v27 }
 0x748   : > { %v5708_v33 = vpop.f32.mrf.mxu0 }
 0x749   : > { %v5876_v22 = vpop.f32.mrf.mxu1  ;;  %v5739_v30 = vadd.f32 %v5708_v33, %v5592_v60  ;;  %v9774_v4 = vadd.f32 %v5864_v25, %v5738_v19  ;;  %v9804_v25 = vpop.permute.xlu0 %7789 }
 0x74a   : > { %v5710_v5 = vpop.f32.mrf.mxu0 }
 0x74b   : > { %v5878_v9 = vpop.f32.mrf.mxu1  ;;  %v5740_v38 = vadd.f32 %v5710_v5, %v5594_v28  ;;  %v9776_v53 = vadd.f32 %v5866_v41, %v5739_v30  ;;  %v9810_v41 = vpop.permute.xlu1 %7794 }
 0x74c   : > { %v5714_v45 = vpop.f32.mrf.mxu0 }
 0x74d   : > { %v5882_v49 = vpop.f32.mrf.mxu1  ;;  %v5741_v15 = vadd.f32 %v5714_v45, %v5598_v18  ;;  %v9778_v62 = vadd.f32 %v5868_v1, %v5740_v38 }
 0x74e   : > { %v5716_v59 = vpop.f32.mrf.mxu0 }
 0x74f   : > { %v5884_v55 = vpop.f32.mrf.mxu1  ;;  %v5742_v10 = vadd.f32 %v5716_v59, %v5600_v47  ;;  %v9780_v16 = vadd.f32 %v5872_v31, %v5741_v15  ;;  %v9820_v31 = vpop.permute.xlu1 %7804 }
 0x750   : > { %v5718_v0 = vpop.f32.mrf.mxu0  ;;  %10495 = vst [vmem:[#allocation37_spill] sm:$0xff] %v9820_v31 }
 0x751   : > { %v5886_v54 = vpop.f32.mrf.mxu1  ;;  %v5743_v60 = vadd.f32 %v5718_v0, %v5602_v36  ;;  %v9782_v48 = vadd.f32 %v5874_v13, %v5742_v10  ;;  %v10498_v0 = vld [vmem:[#allocation24_spill] sm:$0xff] }
 0x752   : > { %v5720_v24 = vpop.f32.mrf.mxu0 }
 0x753   : > { %v5888_v43 = vpop.f32.mrf.mxu1  ;;  %v5744_v28 = vadd.f32 %v5720_v24, %v5604_v29  ;;  %v9784_v52 = vadd.f32 %v5876_v22, %v5743_v60  ;;  %v9828_v5 = vpop.permute.xlu1 %7814 }
 0x754   : > { %v5724_v46 = vpop.f32.mrf.mxu0 }
 0x755   : > { %v9786_v37 = vpop.f32.mrf.mxu1  ;;  %v5745_v18 = vadd.f32 %v5724_v46, %v5608_v14  ;;  %v9788_v12 = vadd.f32 %v5878_v9, %v5744_v28  ;;  %v6849_v9 = vld [vmem:[%s10264_s21] sm:$0x3] }
 0x756   : > { %v5726_v57 = vpop.f32.mrf.mxu0 }
 0x757   : > { %v9790_v47 = vpop.f32.mrf.mxu1  ;;  %v5746_v20 = vadd.f32 %v5726_v57, %v5610_v61  ;;  %v9792_v23 = vadd.f32 %v5882_v49, %v5745_v18 }
 0x758   : > { %v5728_v36 = vpop.f32.mrf.mxu0 }
 0x759   : > { %v9794_v26 = vpop.f32.mrf.mxu1  ;;  %v5747_v39 = vadd.f32 %v5728_v36, %v5612_v32  ;;  %v9796_v51 = vadd.f32 %v5884_v55, %v5746_v20  ;;  %v10497_v55 = vld [vmem:[#allocation23_spill] sm:$0xff] }
 0x75a   : > { %v5730_v29 = vpop.f32.mrf.mxu0  ;;  %v9836_v10 = vrot.slane %v6849_v9, %v10497_v55 }
 0x75b   : > { %v9798_v34 = vpop.f32.mrf.mxu1  ;;  %v5748_v11 = vadd.f32 %v5730_v29, %v5614_v21  ;;  %v9800_v17 = vadd.f32 %v5886_v54, %v5747_v39  ;;  %v9816_v21 = vpop.permute.xlu0 %7799  ;;  %v9839_v54 = vrot.slane %v6849_v9, %v10498_v0 }
 0x75c   : > { %v5985_v14 = vpop.f32.mrf.mxu0  ;;  %10494 = vst [vmem:[#allocation45_spill] sm:$0xff] %v9816_v21  ;;  %v9849_v29 = vpop.permute.xlu1 %7824 }
 0x75d   : > { %v9802_v56 = vpop.f32.mrf.mxu1  ;;  %v9806_v61 = vadd.f32 %v5888_v43, %v5748_v11  ;;  %10499 = vst [vmem:[#allocation46_spill] sm:$0xff] %v9839_v54  ;;  %v6336_v11 = vld [vmem:[%s10262_s19] sm:$0x3]  ;;  %v6024_v39 = vadd.f32 %v5985_v14, %v9764_v35  ;;  %v7816_v54 = vunpack.i.l.bf16 %v9828_v5 }
 0x75e   : > { %v5987_v8 = vpop.f32.mrf.mxu0  ;;  %v9868_v57 = vrot.slane %v6336_v11, %v10497_v55  ;;  %v9873_v35 = vrot.slane %v6336_v11, %v10498_v0 }
 0x75f   : > { %v9808_v6 = vpop.f32.mrf.mxu1  ;;  %v9826_v33 = vpop.permute.xlu0 %7809  ;;  %v6025_v24 = vadd.f32 %v5987_v8, %v9766_v44 }
 0x760   : > { %v5989_v32 = vpop.f32.mrf.mxu0 }
 0x761   : > { %v9812_v7 = vpop.f32.mrf.mxu1 }
 0x762   : > { %v5991_v3 = vpop.f32.mrf.mxu0 }
 0x763   : > { %v9814_v1 = vpop.f32.mrf.mxu1  ;;  %v9833_v59 = vpop.permute.xlu0 %7819 }
 0x764   : > { %v5995_v42 = vpop.f32.mrf.mxu0  ;;  %10496 = vst [vmem:[#allocation35_spill] sm:$0xff] %v9833_v59  ;;  %v6026_v59 = vadd.f32 %v5989_v32, %v9768_v50  ;;  %v6187_v50 = vadd.f32 %v9786_v37, %v6024_v39 }
 0x765   : > { %v9818_v63 = vpop.f32.mrf.mxu1  ;;  %v6028_v14 = vadd.f32 %v5995_v42, %v9772_v40 }
 0x766   : > { %v5997_v27 = vpop.f32.mrf.mxu0 }
 0x767   : > { %v9822_v58 = vpop.f32.mrf.mxu1  ;;  %v6029_v8 = vadd.f32 %v5997_v27, %v9774_v4 }
 0x768   : > { %v5999_v13 = vpop.f32.mrf.mxu0 }
 0x769   : > { %v9824_v19 = vpop.f32.mrf.mxu1 }
 0x76a   : > { %v6001_v22 = vpop.f32.mrf.mxu0 }
 0x76b   : > { %v6174_v30 = vpop.f32.mrf.mxu1 }
 0x76c   : > { %v6005_v38 = vpop.f32.mrf.mxu0 }
 0x76d   : > { %v6178_v45 = vpop.f32.mrf.mxu1 }
 0x76e   : > { %v6007_v49 = vpop.f32.mrf.mxu0 }
 0x76f   : > { %v6180_v15 = vpop.f32.mrf.mxu1  ;;  %v6033_v40 = vadd.f32 %v6007_v49, %v9782_v48 }
 0x770   : > { %v6009_v46 = vpop.f32.mrf.mxu0 }
 0x771   : > { %v6182_v18 = vpop.f32.mrf.mxu1  ;;  %v6034_v4 = vadd.f32 %v6009_v46, %v9784_v52 }
 0x772   : > { %v6011_v60 = vpop.f32.mrf.mxu0 }
 0x773   : > { %v9858_v20 = vpop.f32.mrf.mxu1  ;;  %v6035_v21 = vadd.f32 %v6011_v60, %v9788_v12  ;;  %v6027_v12 = vadd.f32 %v5991_v3, %v9770_v2  ;;  %v6030_v60 = vadd.f32 %v5999_v13, %v9776_v53  ;;  %v6032_v2 = vadd.f32 %v6005_v38, %v9780_v16 }
 0x774   : > { %v6015_v28 = vpop.f32.mrf.mxu0  ;;  %v9899_v16 = vadd.f32 %v9808_v6, %v6029_v8  ;;  %v9917_v6 = vadd.f32 %v9824_v19, %v6034_v4 }
 0x775   : > { %v6443_v31 = vpop.f32.mrf.mxu1  ;;  %v6036_v36 = vadd.f32 %v6015_v28, %v9792_v23  ;;  %v9875_v44 = vadd.f32 %v6174_v30, %v6035_v21  ;;  %v6188_v23 = vadd.f32 %v9790_v47, %v6025_v24  ;;  %v6031_v21 = vadd.f32 %v6001_v22, %v9778_v62 }
 0x776   : > { %v6017_v9 = vpop.f32.mrf.mxu0  ;;  %v6190_v30 = vadd.f32 %v9798_v34, %v6027_v12  ;;  %v9896_v62 = vadd.f32 %v9802_v56, %v6028_v14  ;;  %v9902_v48 = vadd.f32 %v9812_v7, %v6030_v60  ;;  %v9911_v34 = vadd.f32 %v9818_v63, %v6032_v2 }
 0x777   : > { %v6445_v55 = vpop.f32.mrf.mxu1  ;;  %v6037_v43 = vadd.f32 %v6017_v9, %v9796_v51  ;;  %v9884_v32 = vadd.f32 %v6178_v45, %v6036_v36  ;;  %v6189_v51 = vadd.f32 %v9794_v26, %v6026_v59  ;;  %v9908_v45 = vadd.f32 %v9814_v1, %v6031_v21 }
 0x778   : > { %v6019_v3 = vpop.f32.mrf.mxu0  ;;  %v9914_v56 = vadd.f32 %v9822_v58, %v6033_v40  ;;  %v10500_v59 = vunpack.i.l.bf16 %v9804_v25 }
 0x779   : > { %v6447_v53 = vpop.f32.mrf.mxu1  ;;  %v6038_v42 = vadd.f32 %v6019_v3, %v9800_v17  ;;  %v9892_v37 = vadd.f32 %v6180_v15, %v6037_v43 }
 0x77a   : > { %v6484_v27 = vadd.f32 %v6447_v53, %v6443_v31  ;;  %v6021_v47 = vpop.f32.mrf.mxu0  ;;  %v10501_v36 = vmov %v10500_v59 }
 0x77b   : > { %v6449_v13 = vpop.f32.mrf.mxu1  ;;  %v6039_v17 = vadd.f32 %v6021_v47, %v9806_v61  ;;  %v9905_v26 = vadd.f32 %v6182_v18, %v6038_v42  ;;  %v10502_v42 = vunpack.i.h.bf16 %v9804_v25 }
 0x77c   : > { %v6531_v52 = vrot.slane %v6484_v27, 7  ;;  %v6485_v31 = vadd.f32 %v6449_v13, %v6445_v55  ;;  %v6281_v22 = vpop.f32.mrf.mxu0 }
 0x77d   : > { %v6453_v38 = vpop.f32.mrf.mxu1  ;;  %v6320_v49 = vadd.f32 %v6281_v22, %v6187_v50 }
 0x77e   : > { %v6579_v7 = vsel %vm1565_vm8, 0.0, %v6531_v52  ;;  %v6532_v61 = vrot.slane %v6485_v31, 7  ;;  %v6486_v15 = vadd.f32 %v6453_v38, %v6447_v53  ;;  %v6500_v43 = vadd.f32 %v6484_v27, %v6453_v38  ;;  %v6283_v28 = vpop.f32.mrf.mxu0 }
 0x77f   : > { %v6623_v0 = vmul.f32 %v10500_v59, %v6579_v7  ;;  %v6644_v24 = vrot.slane %v6579_v7, 1  ;;  %v6751_v1 = vrot.slane %v6579_v7, 2  ;;  %v6455_v63 = vpop.f32.mrf.mxu1  ;;  %v6348_v58 = vadd.f32 %v9868_v57, %v6320_v49 }
 0x780   : > { %v6580_v46 = vsel %vm1565_vm8, 0.0, %v6532_v61  ;;  %v6321_v18 = vadd.f32 %v6283_v28, %v6188_v23  ;;  %v6487_v19 = vadd.f32 %v6455_v63, %v6449_v13  ;;  %v6533_v12 = vrot.slane %v6500_v43, 7  ;;  %v6285_v14 = vpop.f32.mrf.mxu0 }
 0x781   : > { %v6624_v39 = vmul.f32 %v10501_v36, %v6580_v46  ;;  %v6647_v11 = vrot.slane %v6580_v46, 1  ;;  %v6754_v9 = vrot.slane %v6580_v46, 2  ;;  %v6457_v8 = vpop.f32.mrf.mxu1  ;;  %v6364_v60 = vmax.f32 %v6348_v58, 0.0 }
 0x782   : > { %v6349_v55 = vadd.f32 %v9873_v35, %v6321_v18  ;;  %v6501_v50 = vadd.f32 %v6485_v31, %v6455_v63  ;;  %v6322_v21 = vadd.f32 %v6285_v14, %v6189_v51  ;;  %v6534_v2 = vsel %vm1565_vm8, %v6531_v52, %v6533_v12  ;;  %v6287_v4 = vpop.f32.mrf.mxu0 }
 0x783   : > { %v6488_v40 = vadd.f32 %v6457_v8, %v6453_v38  ;;  %v9928_v23 = vadd.f32 %v6486_v15, %v6457_v8  ;;  %v9930_v3 = vpop.f32.mrf.mxu1  ;;  %v9933_v53 = vadd.f32 %v9858_v20, %v6039_v17  ;;  %7256 = vst [vmem:[%s8588_s27 + $0x100] sm:$0xff] %v6364_v60  ;;  %v6625_v27 = vmul.f32 %v10502_v42, %v6534_v2 }
 0x784   : > { %v6645_v47 = vrot.slane %v6534_v2, 1  ;;  %v6752_v13 = vrot.slane %v6534_v2, 2  ;;  %v6365_v31 = vmax.f32 %v6349_v55, 0.0  ;;  %v6535_v51 = vrot.slane %v6501_v50, 7 }
 0x785   : > { %v6350_v52 = vadd.f32 %v9868_v57, %v6322_v21  ;;  %v6537_v22 = vrot.slane %v9928_v23, 7  ;;  %v6323_v38 = vadd.f32 %v6287_v4, %v6190_v30  ;;  %v6489_v20 = vadd.f32 %v9930_v3, %v6455_v63  ;;  %v6291_v63 = vpop.f32.mrf.mxu0 }
 0x786   : > { %v6646_v7 = vsel %vm1590_vm10, %v6644_v24, %v6645_v47  ;;  %v6753_v49 = vsel %vm1867_vm14, %v6751_v1, %v6752_v13  ;;  %7257 = vst.msk [vmem:[%s8588_s27 + $0x108] sm:$0xff] %vm1112_vm7, %v6365_v31  ;;  %v9946_v17 = vadd.f32 %v6487_v19, %v9930_v3  ;;  %v10503_v59 = vunpack.i.l.bf16 %v9826_v33  ;;  %v6463_v19 = vpop.f32.mrf.mxu1 }
 0x787   : > { %v6694_v15 = vadd.f32 %v6646_v7, %v6623_v0  ;;  %v6536_v28 = vsel %vm1565_vm8, %v6532_v61, %v6535_v51  ;;  %v6366_v46 = vmax.f32 %v6350_v52, 0.0  ;;  %v10504_v30 = vmov %v10502_v42  ;;  %v6293_v7 = vpop.f32.mrf.mxu0 }
 0x788   : > { %v6801_v43 = vmul.f32 %v10503_v59, %v6753_v49  ;;  %v6626_v24 = vmul.f32 %v10504_v30, %v6536_v28  ;;  %v6648_v58 = vrot.slane %v6536_v28, 1  ;;  %v6755_v18 = vrot.slane %v6536_v28, 2 }
 0x789   : > { %v9956_v1 = vsel %vm1565_vm8, %v6533_v12, %v6537_v22  ;;  %7258 = vst [vmem:[%s8588_s27 + $0x110] sm:$0xff] %v6366_v46  ;;  %v10505_v0 = vunpack.i.l.bf16 %v9810_v41  ;;  %v6351_v12 = vadd.f32 %v9873_v35, %v6323_v38  ;;  %v6539_v50 = vrot.slane %v9946_v17, 7 }
 0x78a   : > { %v6817_v36 = vadd.f32 %v6801_v43, %v6694_v15  ;;  %v6650_v61 = vrot.slane %v9956_v1, 1  ;;  %v6757_v25 = vrot.slane %v9956_v1, 2  ;;  %v6649_v60 = vsel %vm1590_vm10, %v6647_v11, %v6648_v58 }
 0x78b   : > { %v9962_v14 = vmul.f32 %v10505_v0, %v9956_v1  ;;  %v6756_v55 = vsel %vm1867_vm14, %v6754_v9, %v6755_v18  ;;  %v6695_v2 = vadd.f32 %v6649_v60, %v6624_v39  ;;  %v10506_v4 = vmov %v10503_v59  ;;  %v6465_v39 = vpop.f32.mrf.mxu1 }
 0x78c   : > { %v6833_v21 = vmul.f32 0.11111111, %v6817_v36  ;;  %v6802_v42 = vmul.f32 %v10506_v4, %v6756_v55  ;;  %v6651_v31 = vsel %vm1590_vm10, %v6645_v47, %v6650_v61  ;;  %v6758_v11 = vsel %vm1867_vm14, %v6752_v13, %v6757_v25 }
 0x78d   : > { %v6696_v52 = vadd.f32 %v6651_v31, %v6625_v27  ;;  %v6367_v9 = vmax.f32 %v6351_v12, 0.0  ;;  %v9981_v38 = vsel %vm1565_vm8, %v6535_v51, %v6539_v50  ;;  %v10507_v59 = vunpack.i.h.bf16 %v9826_v33 }
 0x78e   : > { %v6861_v49 = vadd.f32 %v9836_v10, %v6833_v21  ;;  %v6818_v15 = vadd.f32 %v6802_v42, %v6695_v2  ;;  %v10508_v27 = vmov %v10505_v0  ;;  %v6652_v13 = vrot.slane %v9981_v38, 1 }
 0x78f   : > { %v6803_v43 = vmul.f32 %v10507_v59, %v6758_v11  ;;  %v9989_v47 = vmul.f32 %v10508_v27, %v9981_v38  ;;  %7259 = vst.msk [vmem:[%s8588_s27 + $0x118] sm:$0xff] %vm1112_vm7, %v6367_v9  ;;  %v6759_v51 = vrot.slane %v9981_v38, 2  ;;  %v6324_v28 = vadd.f32 %v6291_v63, %v9896_v62  ;;  %v6295_v62 = vpop.f32.mrf.mxu0  ;;  %v10509_v63 = vld [vmem:[#allocation46_spill] sm:$0xff] }
 0x790   : > { %v6490_v46 = vadd.f32 %v6463_v19, %v6457_v8  ;;  %v6877_v30 = vmax.f32 %v6861_v49, 0.0  ;;  %v6834_v36 = vmul.f32 0.11111111, %v6818_v15  ;;  %v9996_v60 = vadd.f32 %v6488_v40, %v6463_v19  ;;  %v6467_v8 = vpop.f32.mrf.mxu1 }
 0x791   : > { %v6819_v0 = vadd.f32 %v6803_v43, %v6696_v52  ;;  %v6653_v55 = vsel %vm1590_vm10, %v6648_v58, %v6652_v13  ;;  %v6760_v12 = vsel %vm1867_vm14, %v6755_v18, %v6759_v51  ;;  %v6352_v21 = vadd.f32 %v9868_v57, %v6324_v28  ;;  %v6297_v27 = vpop.f32.mrf.mxu0 }
 0x792   : > { %v6325_v2 = vadd.f32 %v6293_v7, %v9899_v16  ;;  %7278 = vst [vmem:[%s8588_s27 + $0x180] sm:$0xff] %v6877_v30  ;;  %v6862_v4 = vadd.f32 %v10509_v63, %v6834_v36  ;;  %v6697_v42 = vadd.f32 %v6653_v55, %v6626_v24  ;;  %v10510_v31 = vmov %v10507_v59  ;;  %v10021_v28 = vpop.f32.mrf.mxu1 }
 0x793   : > { %v6835_v40 = vmul.f32 0.11111111, %v6819_v0  ;;  %v6804_v52 = vmul.f32 %v10510_v31, %v6760_v12  ;;  %v6368_v58 = vmax.f32 %v6352_v21, 0.0  ;;  %v6541_v11 = vrot.slane %v9996_v60, 7 }
 0x794   : > { %v6353_v18 = vadd.f32 %v9873_v35, %v6325_v2  ;;  %v6491_v9 = vadd.f32 %v6465_v39, %v9930_v3  ;;  %v6878_v16 = vmax.f32 %v6862_v4, 0.0  ;;  %v10014_v15 = vadd.f32 %v6489_v20, %v6465_v39 }
 0x795   : > { %v6863_v7 = vadd.f32 %v9836_v10, %v6835_v40  ;;  %v6820_v49 = vadd.f32 %v6804_v52, %v6697_v42  ;;  %7260 = vst [vmem:[%s8588_s27 + $0x120] sm:$0xff] %v6368_v58  ;;  %v6542_v33 = vsel %vm1565_vm8, %v6537_v22, %v6541_v11  ;;  %v6326_v59 = vadd.f32 %v6295_v62, %v9902_v48  ;;  %v6301_v40 = vpop.f32.mrf.mxu0  ;;  %v10047_v42 = vpop.f32.mrf.mxu1 }
 0x796   : > { %v6369_v24 = vmax.f32 %v6353_v18, 0.0  ;;  %v6492_v43 = vadd.f32 %v6467_v8, %v6463_v19  ;;  %7279 = vst.msk [vmem:[%s8588_s27 + $0x188] sm:$0xff] %vm1112_vm7, %v6878_v16  ;;  %v10511_v20 = vunpack.i.h.bf16 %v9810_v41  ;;  %v6654_v0 = vrot.slane %v6542_v33, 1 }
 0x797   : > { %v6879_v3 = vmax.f32 %v6863_v7, 0.0  ;;  %v6836_v30 = vmul.f32 0.11111111, %v6820_v49  ;;  %v6761_v60 = vrot.slane %v6542_v33, 2  ;;  %v6543_v23 = vrot.slane %v10014_v15, 7  ;;  %v6303_v15 = vpop.f32.mrf.mxu0 }
 0x798   : > { %v6629_v36 = vmul.f32 %v10511_v20, %v6542_v33  ;;  %7261 = vst.msk [vmem:[%s8588_s27 + $0x128] sm:$0xff] %vm1112_vm7, %v6369_v24  ;;  %v6354_v22 = vadd.f32 %v9868_v57, %v6326_v59  ;;  %v10031_v48 = vadd.f32 %v6490_v46, %v6467_v8  ;;  %v6655_v55 = vsel %vm1590_vm10, %v6650_v61, %v6654_v0  ;;  %v10513_v59 = vld [vmem:[#allocation45_spill] sm:$0xff] }
 0x799   : > { %7280 = vst [vmem:[%s8588_s27 + $0x190] sm:$0xff] %v6879_v3  ;;  %v6864_v19 = vadd.f32 %v10509_v63, %v6836_v30  ;;  %v6327_v12 = vadd.f32 %v6297_v27, %v9908_v45  ;;  %v6493_v21 = vadd.f32 %v10021_v28, %v6465_v39  ;;  %v6698_v2 = vadd.f32 %v6655_v55, %v9962_v14  ;;  %v10087_v55 = vpop.f32.mrf.mxu1 }
 0x79a   : > { %v6762_v46 = vsel %vm1867_vm14, %v6757_v25, %v6761_v60  ;;  %v6544_v62 = vsel %vm1565_vm8, %v6539_v50, %v6543_v23  ;;  %v6370_v4 = vmax.f32 %v6354_v22, 0.0  ;;  %v10512_v39 = vmov %v10511_v20 }
 0x79b   : > { %v6880_v61 = vmax.f32 %v6864_v19, 0.0  ;;  %v6805_v45 = vmul.f32 %v7816_v54, %v6762_v46  ;;  %v6630_v31 = vmul.f32 %v10512_v39, %v6544_v62  ;;  %v6656_v14 = vrot.slane %v6544_v62, 1 }
 0x79c   : > { %v6763_v52 = vrot.slane %v6544_v62, 2  ;;  %7262 = vst [vmem:[%s8588_s27 + $0x130] sm:$0xff] %v6370_v4  ;;  %v6545_v1 = vrot.slane %v10031_v48, 7  ;;  %v6355_v17 = vadd.f32 %v9873_v35, %v6327_v12  ;;  %v10057_v25 = vadd.f32 %v6491_v9, %v10021_v28  ;;  %v6305_v12 = vpop.f32.mrf.mxu0 }
 0x79d   : > { %7281 = vst.msk [vmem:[%s8588_s27 + $0x198] sm:$0xff] %vm1112_vm7, %v6880_v61  ;;  %v6821_v50 = vadd.f32 %v6805_v45, %v6698_v2  ;;  %v6657_v58 = vsel %vm1590_vm10, %v6652_v13, %v6656_v14  ;;  %v6328_v41 = vadd.f32 %v6301_v40, %v9911_v34  ;;  %v6494_v18 = vadd.f32 %v10047_v42, %v6467_v8 }
 0x79e   : > { %v6699_v16 = vadd.f32 %v6657_v58, %v9989_v47  ;;  %v6764_v7 = vsel %vm1867_vm14, %v6759_v51, %v6763_v52  ;;  %v6546_v9 = vsel %vm1565_vm8, %v6541_v11, %v6545_v1  ;;  %v6371_v49 = vmax.f32 %v6355_v17, 0.0 }
 0x79f   : > { %v6837_v33 = vmul.f32 0.11111111, %v6821_v50  ;;  %v6806_v24 = vmul.f32 %v7816_v54, %v6764_v7  ;;  %v10514_v13 = vunpack.i.l.bf16 %v10513_v59  ;;  %v6658_v34 = vrot.slane %v6546_v9, 1 }
 0x7a0   : > { %v6765_v3 = vrot.slane %v6546_v9, 2  ;;  %7263 = vst.msk [vmem:[%s8588_s27 + $0x138] sm:$0xff] %vm1112_vm7, %v6371_v49  ;;  %v6547_v47 = vrot.slane %v10057_v25, 7  ;;  %v6356_v38 = vadd.f32 %v9868_v57, %v6328_v41  ;;  %v10080_v51 = vadd.f32 %v6492_v43, %v10047_v42  ;;  %v6477_v41 = vpop.f32.mrf.mxu1 }
 0x7a1   : > { %v6631_v27 = vmul.f32 %v10514_v13, %v6546_v9  ;;  %v6865_v8 = vadd.f32 %v9836_v10, %v6837_v33  ;;  %v6822_v11 = vadd.f32 %v6806_v24, %v6699_v16  ;;  %v6659_v54 = vsel %vm1590_vm10, %v6654_v0, %v6658_v34 }
 0x7a2   : > { %v6329_v30 = vadd.f32 %v6303_v15, %v9914_v56  ;;  %v6700_v20 = vadd.f32 %v6659_v54, %v6629_v36  ;;  %v6766_v22 = vsel %vm1867_vm14, %v6761_v60, %v6765_v3  ;;  %v6548_v48 = vsel %vm1565_vm8, %v6543_v23, %v6547_v47 }
 0x7a3   : > { %v6372_v19 = vmax.f32 %v6356_v38, 0.0  ;;  %v6881_v43 = vmax.f32 %v6865_v8, 0.0  ;;  %v6838_v2 = vmul.f32 0.11111111, %v6822_v11  ;;  %v10515_v46 = vunpack.i.h.bf16 %v9828_v5  ;;  %v6307_v11 = vpop.f32.mrf.mxu0 }
 0x7a4   : > { %v10516_v4 = vmov %v10514_v13  ;;  %v6660_v40 = vrot.slane %v6548_v48, 1  ;;  %v6767_v56 = vrot.slane %v6548_v48, 2  ;;  %v6549_v36 = vrot.slane %v10080_v51, 7 }
 0x7a5   : > { %v6807_v62 = vmul.f32 %v10515_v46, %v6766_v22  ;;  %v6632_v0 = vmul.f32 %v10516_v4, %v6548_v48  ;;  %7264 = vst [vmem:[%s8588_s27 + $0x140] sm:$0xff] %v6372_v19  ;;  %v6357_v60 = vadd.f32 %v9873_v35, %v6329_v30  ;;  %7282 = vst [vmem:[%s8588_s27 + $0x1a0] sm:$0xff] %v6881_v43  ;;  %v10517_v49 = vmov %v10515_v46  ;;  %v10519_v22 = vld [vmem:[#allocation35_spill] sm:$0xff] }
 0x7a6   : > { %v6866_v23 = vadd.f32 %v10509_v63, %v6838_v2  ;;  %v10099_v45 = vadd.f32 %v6493_v21, %v10087_v55  ;;  %v6330_v39 = vadd.f32 %v6305_v12, %v9917_v6  ;;  %v6661_v17 = vsel %vm1590_vm10, %v6656_v14, %v6660_v40 }
 0x7a7   : > { %v6823_v61 = vadd.f32 %v6807_v62, %v6700_v20  ;;  %v6768_v25 = vsel %vm1867_vm14, %v6763_v52, %v6767_v56  ;;  %v10105_v50 = vsel %vm1565_vm8, %v6545_v1, %v6549_v36  ;;  %v6373_v58 = vmax.f32 %v6357_v60, 0.0  ;;  %v6311_v60 = vpop.f32.mrf.mxu0 }
 0x7a8   : > { %v6882_v16 = vmax.f32 %v6866_v23, 0.0  ;;  %v6701_v9 = vadd.f32 %v6661_v17, %v6630_v31  ;;  %v6808_v15 = vmul.f32 %v10517_v49, %v6768_v25  ;;  %v10518_v21 = vunpack.i.h.bf16 %v10513_v59 }
 0x7a9   : > { %v6839_v7 = vmul.f32 0.11111111, %v6823_v61  ;;  %v6662_v6 = vrot.slane %v10105_v50, 1  ;;  %v6769_v14 = vrot.slane %v10105_v50, 2  ;;  %7265 = vst.msk [vmem:[%s8588_s27 + $0x148] sm:$0xff] %vm1112_vm7, %v6373_v58  ;;  %v6551_v52 = vrot.slane %v10099_v45, 7 }
 0x7aa   : > { %v10112_v33 = vmul.f32 %v10518_v21, %v10105_v50  ;;  %7283 = vst.msk [vmem:[%s8588_s27 + $0x1a8] sm:$0xff] %vm1112_vm7, %v6882_v16  ;;  %v6824_v1 = vadd.f32 %v6808_v15, %v6701_v9  ;;  %v6358_v5 = vadd.f32 %v9868_v57, %v6330_v39  ;;  %v6496_v24 = vadd.f32 %v6477_v41, %v10047_v42 }
 0x7ab   : > { %v6867_v31 = vadd.f32 %v9836_v10, %v6839_v7  ;;  %v6663_v13 = vsel %vm1590_vm10, %v6658_v34, %v6662_v6  ;;  %v6770_v38 = vsel %vm1867_vm14, %v6765_v3, %v6769_v14  ;;  %v10129_v51 = vsel %vm1565_vm8, %v6547_v47, %v6551_v52 }
 0x7ac   : > { %v6510_v8 = vadd.f32 %v6494_v18, %v6477_v41  ;;  %v6840_v30 = vmul.f32 0.11111111, %v6824_v1  ;;  %v6702_v20 = vadd.f32 %v6663_v13, %v6631_v27  ;;  %v10520_v48 = vunpack.i.l.bf16 %v10519_v22  ;;  %v10523_v41 = vld [vmem:[#allocation37_spill] sm:$0xff] }
 0x7ad   : > { %v6883_v54 = vmax.f32 %v6867_v31, 0.0  ;;  %v10521_v42 = vmov %v10518_v21  ;;  %v6664_v3 = vrot.slane %v10129_v51, 1  ;;  %v6771_v12 = vrot.slane %v10129_v51, 2  ;;  %v6313_v31 = vpop.f32.mrf.mxu0 }
 0x7ae   : > { %v6809_v19 = vmul.f32 %v10520_v48, %v6770_v38  ;;  %v10136_v34 = vmul.f32 %v10521_v42, %v10129_v51  ;;  %v6374_v47 = vmax.f32 %v6358_v5, 0.0  ;;  %v6868_v18 = vadd.f32 %v10509_v63, %v6840_v30  ;;  %v6479_v30 = vpop.f32.mrf.mxu1 }
 0x7af   : > { %7284 = vst [vmem:[%s8588_s27 + $0x1b0] sm:$0xff] %v6883_v54  ;;  %v6553_v2 = vrot.slane %v6510_v8, 7  ;;  %v6557_v27 = vrot.slane %v6496_v24, 7  ;;  %v6665_v46 = vsel %vm1590_vm10, %v6660_v40, %v6664_v3  ;;  %v6772_v59 = vsel %vm1867_vm14, %v6767_v56, %v6771_v12 }
 0x7b0   : > { %v6825_v43 = vadd.f32 %v6809_v19, %v6702_v20  ;;  %7266 = vst [vmem:[%s8588_s27 + $0x150] sm:$0xff] %v6374_v47  ;;  %v6331_v62 = vadd.f32 %v6307_v11, %v9875_v44  ;;  %v6495_v4 = vadd.f32 %v10087_v55, %v10021_v28  ;;  %v6884_v23 = vmax.f32 %v6868_v18, 0.0 }
 0x7b1   : > { %v6703_v39 = vadd.f32 %v6665_v46, %v6632_v0  ;;  %v10522_v17 = vmov %v10520_v48  ;;  %v6554_v50 = vsel %vm1565_vm8, %v6549_v36, %v6553_v2  ;;  %v6558_v40 = vsel %vm1565_vm8, %v6553_v2, %v6557_v27 }
 0x7b2   : > { %v6841_v61 = vmul.f32 0.11111111, %v6825_v43  ;;  %v6810_v25 = vmul.f32 %v10522_v17, %v6772_v59  ;;  %v6581_v58 = vsel %vm1565_vm8, %v6557_v27, 0.0  ;;  %v6359_v56 = vadd.f32 %v9873_v35, %v6331_v62  ;;  %7285 = vst.msk [vmem:[%s8588_s27 + $0x1b8] sm:$0xff] %vm1112_vm7, %v6884_v23  ;;  %v6315_v27 = vpop.f32.mrf.mxu0 }
 0x7b3   : > { %v10524_v16 = vunpack.i.l.bf16 %v10523_v41  ;;  %v10525_v0 = vunpack.i.h.bf16 %v10523_v41  ;;  %v6666_v49 = vrot.slane %v6554_v50, 1  ;;  %v6670_v36 = vrot.slane %v6558_v40, 1 }
 0x7b4   : > { %v6869_v44 = vadd.f32 %v9836_v10, %v6841_v61  ;;  %v6826_v28 = vadd.f32 %v6810_v25, %v6703_v39  ;;  %v6674_v15 = vrot.slane %v6581_v58, 1  ;;  %v6773_v21 = vrot.slane %v6554_v50, 2 }
 0x7b5   : > { %v6635_v7 = vmul.f32 %v10524_v16, %v6554_v50  ;;  %v6637_v9 = vmul.f32 %v10525_v0, %v6558_v40  ;;  %v6777_v24 = vrot.slane %v6558_v40, 2  ;;  %v6781_v13 = vrot.slane %v6581_v58, 2 }
 0x7b6   : > { %v6885_v1 = vmax.f32 %v6869_v44, 0.0  ;;  %v6842_v5 = vmul.f32 0.11111111, %v6826_v28  ;;  %v6667_v38 = vsel %vm1590_vm10, %v6662_v6, %v6666_v49  ;;  %v6671_v8 = vsel %vm1590_vm10, %v6666_v49, %v6670_v36 }
 0x7b7   : > { %v6675_v11 = vsel %vm1590_vm10, %v6670_v36, %v6674_v15  ;;  %v6774_v54 = vsel %vm1867_vm14, %v6769_v14, %v6773_v21  ;;  %v6704_v48 = vadd.f32 %v6667_v38, %v10112_v33  ;;  %v6706_v19 = vadd.f32 %v6671_v8, %v6635_v7 }
 0x7b8   : > { %7286 = vst [vmem:[%s8588_s27 + $0x1c0] sm:$0xff] %v6885_v1  ;;  %v6870_v20 = vadd.f32 %v10509_v63, %v6842_v5  ;;  %v6708_v42 = vadd.f32 %v6675_v11, %v6637_v9  ;;  %v6778_v47 = vsel %vm1867_vm14, %v6773_v21, %v6777_v24  ;;  %v6782_v6 = vsel %vm1867_vm14, %v6777_v24, %v6781_v13 }
 0x7b9   : > { %v10526_v18 = vunpack.i.h.bf16 %v10519_v22  ;;  %v6375_v2 = vmax.f32 %v6359_v56, 0.0  ;;  %v10527_v46 = vunpack.i.l.bf16 %v9849_v29  ;;  %v10528_v62 = vunpack.i.h.bf16 %v9849_v29 }
 0x7ba   : > { %v6886_v14 = vmax.f32 %v6870_v20, 0.0  ;;  %v6497_v33 = vadd.f32 %v6479_v30, %v10087_v55  ;;  %v6511_v39 = vadd.f32 %v6495_v4, %v6479_v30  ;;  %v6332_v17 = vadd.f32 %v6311_v60, %v9884_v32  ;;  %v6317_v30 = vpop.f32.mrf.mxu0 }
 0x7bb   : > { %v6811_v43 = vmul.f32 %v10526_v18, %v6774_v54  ;;  %v6813_v59 = vmul.f32 %v10527_v46, %v6778_v47  ;;  %v6815_v23 = vmul.f32 %v10528_v62, %v6782_v6  ;;  %7267 = vst.msk [vmem:[%s8588_s27 + $0x158] sm:$0xff] %vm1112_vm7, %v6375_v2  ;;  %v6333_v25 = vadd.f32 %v6313_v31, %v9892_v37 }
 0x7bc   : > { %7287 = vst.msk [vmem:[%s8588_s27 + $0x1c8] sm:$0xff] %vm1112_vm7, %v6886_v14  ;;  %v6559_v58 = vrot.slane %v6497_v33, 7  ;;  %v6334_v56 = vadd.f32 %v6315_v27, %v9905_v26  ;;  %v6555_v28 = vrot.slane %v6511_v39, 7  ;;  %v6360_v16 = vadd.f32 %v9868_v57, %v6332_v17 }
 0x7bd   : > { %v6827_v61 = vadd.f32 %v6811_v43, %v6704_v48  ;;  %v6829_v50 = vadd.f32 %v6813_v59, %v6706_v19  ;;  %v6831_v40 = vadd.f32 %v6815_v23, %v6708_v42  ;;  %v6361_v55 = vadd.f32 %v9873_v35, %v6333_v25 }
 0x7be   : > { %v6582_v4 = vsel %vm1565_vm8, %v6559_v58, 0.0  ;;  %v6362_v32 = vadd.f32 %v9868_v57, %v6334_v56  ;;  %v6556_v60 = vsel %vm1565_vm8, %v6551_v52, %v6555_v28  ;;  %v6560_v26 = vsel %vm1565_vm8, %v6555_v28, %v6559_v58 }
 0x7bf   : > { %v6843_v44 = vmul.f32 0.11111111, %v6827_v61  ;;  %v6845_v7 = vmul.f32 0.11111111, %v6829_v50  ;;  %v6847_v0 = vmul.f32 0.11111111, %v6831_v40  ;;  %v10529_v15 = vunpack.i.l.bf16 %v10523_v41 }
 0x7c0   : > { %v6676_v9 = vrot.slane %v6582_v4, 1  ;;  %v10530_v31 = vunpack.i.h.bf16 %v10523_v41  ;;  %v6668_v45 = vrot.slane %v6556_v60, 1  ;;  %v6672_v5 = vrot.slane %v6560_v26, 1 }
 0x7c1   : > { %v6871_v37 = vadd.f32 %v9836_v10, %v6843_v44  ;;  %v6873_v49 = vadd.f32 %v9836_v10, %v6845_v7  ;;  %v6875_v36 = vadd.f32 %v9836_v10, %v6847_v0  ;;  %v6636_v21 = vmul.f32 %v10529_v15, %v6556_v60 }
 0x7c2   : > { %v6638_v57 = vmul.f32 %v10530_v31, %v6560_v26  ;;  %v6775_v24 = vrot.slane %v6556_v60, 2  ;;  %v6779_v38 = vrot.slane %v6560_v26, 2  ;;  %v6783_v8 = vrot.slane %v6582_v4, 2 }
 0x7c3   : > { %v6887_v1 = vmax.f32 %v6871_v37, 0.0  ;;  %v6889_v52 = vmax.f32 %v6873_v49, 0.0  ;;  %v6891_v13 = vmax.f32 %v6875_v36, 0.0  ;;  %v6669_v10 = vsel %vm1590_vm10, %v6664_v3, %v6668_v45 }
 0x7c4   : > { %v6673_v11 = vsel %vm1590_vm10, %v6668_v45, %v6672_v5  ;;  %v6677_v41 = vsel %vm1590_vm10, %v6672_v5, %v6676_v9  ;;  %v6776_v54 = vsel %vm1867_vm14, %v6771_v12, %v6775_v24  ;;  %v6705_v20 = vadd.f32 %v6669_v10, %v10136_v34 }
 0x7c5   : > { %7288 = vst [vmem:[%s8588_s27 + $0x1d0] sm:$0xff] %v6887_v1  ;;  %7290 = vst [vmem:[%s8588_s27 + $0x1e0] sm:$0xff] %v6889_v52  ;;  %v6707_v48 = vadd.f32 %v6673_v11, %v6636_v21  ;;  %v6709_v19 = vadd.f32 %v6677_v41, %v6638_v57  ;;  %v6780_v3 = vsel %vm1867_vm14, %v6775_v24, %v6779_v38  ;;  %v10531_v47 = vmov %v10526_v18 }
 0x7c6   : > { %7292 = vst [vmem:[%s8588_s27 + $0x1f0] sm:$0xff] %v6891_v13  ;;  %v6784_v42 = vsel %vm1867_vm14, %v6779_v38, %v6783_v8  ;;  %v6812_v6 = vmul.f32 %v10531_v47, %v6776_v54  ;;  %v10532_v51 = vmov %v10527_v46  ;;  %v6376_v18 = vmax.f32 %v6360_v16, 0.0 }
 0x7c7   : > { %v6814_v12 = vmul.f32 %v10532_v51, %v6780_v3  ;;  %v10533_v43 = vmov %v10528_v62  ;;  %v6377_v27 = vmax.f32 %v6361_v55, 0.0  ;;  %v6378_v34 = vmax.f32 %v6362_v32, 0.0 }
 0x7c8   : > { %v6816_v2 = vmul.f32 %v10533_v43, %v6784_v42  ;;  %v6335_v14 = vadd.f32 %v6317_v30, %v9933_v53  ;;  %v6828_v46 = vadd.f32 %v6812_v6, %v6705_v20  ;;  %7268 = vst [vmem:[%s8588_s27 + $0x160] sm:$0xff] %v6376_v18 }
 0x7c9   : > { %v6830_v59 = vadd.f32 %v6814_v12, %v6707_v48  ;;  %7269 = vst.msk [vmem:[%s8588_s27 + $0x168] sm:$0xff] %vm1112_vm7, %v6377_v27  ;;  %7270 = vst [vmem:[%s8588_s27 + $0x170] sm:$0xff] %v6378_v34 }
 0x7ca   : > { %v6832_v62 = vadd.f32 %v6816_v2, %v6709_v19  ;;  %v6363_v22 = vadd.f32 %v9873_v35, %v6335_v14  ;;  %v6844_v23 = vmul.f32 0.11111111, %v6828_v46 }
 0x7cb   : > { %v6846_v29 = vmul.f32 0.11111111, %v6830_v59 }
 0x7cc   : > { %v6848_v33 = vmul.f32 0.11111111, %v6832_v62  ;;  %v6379_v61 = vmax.f32 %v6363_v22, 0.0  ;;  %v6872_v39 = vadd.f32 %v10509_v63, %v6844_v23 }
 0x7cd   : > { %v6874_v53 = vadd.f32 %v10509_v63, %v6846_v29 }
 0x7ce   : > { %v6876_v17 = vadd.f32 %v10509_v63, %v6848_v33  ;;  %7271 = vst.msk [vmem:[%s8588_s27 + $0x178] sm:$0xff] %vm1112_vm7, %v6379_v61  ;;  %v6888_v25 = vmax.f32 %v6872_v39, 0.0 }
 0x7cf   : > { %v6890_v50 = vmax.f32 %v6874_v53, 0.0 }
 0x7d0   : > { %v6892_v40 = vmax.f32 %v6876_v17, 0.0  ;;  %7289 = vst.msk [vmem:[%s8588_s27 + $0x1d8] sm:$0xff] %vm1112_vm7, %v6888_v25 }
 0x7d1   : > { %7291 = vst.msk [vmem:[%s8588_s27 + $0x1e8] sm:$0xff] %vm1112_vm7, %v6890_v50 }
 0x7d2   : > { %7293 = vst.msk [vmem:[%s8588_s27 + $0x1f8] sm:$0xff] %vm1112_vm7, %v6892_v40 }
 0x7d3 PF: > { %s32_s3 = sadd.s32 1, %s7882_s3  }
 0x7d4   : > { %p29_p4 = scmp.ge.s32.totalorder %s32_s3, 4  }
 0x7d6   :  { %31 = sbr.rel (!%p29_p4) target bundleno = 8 (0x8), region = 177 }

</bundles_post_ra>
